<compile_context>
chip_gen: v6e
topology: v6e:2x2x1
jax: 0.10.0
libtpu: 0.0.40
codegen_flags: <defaults>
</compile_context>

<pallas_src>
import functools
import math

import jax
import jax.numpy as jnp
from jax import lax
from jax.experimental import pallas as pl
from jax.experimental.pallas import tpu as pltpu

EPS_LN = 1e-6


# ---------------------------------------------------------------------------
# In-kernel helpers
# ---------------------------------------------------------------------------
def _ln_stats(x):
    # f32 statistics, biased variance, eps=1e-6 (matches nn.LayerNorm).  The
    # affine (gamma/beta) of norm1/norm2 is folded into the following matmul.
    mu = jnp.mean(x, axis=-1, keepdims=True)
    var = jnp.mean((x - mu) ** 2, axis=-1, keepdims=True)
    return (x - mu) * lax.rsqrt(var + EPS_LN)


def _ln_affine(x, g, b):
    return _ln_stats(x) * g + b


# ---------------------------------------------------------------------------
# Kernel: grid = (batch_chunks, depth); depth is the inner "arbitrary" axis.
# One chunk's (b_tile*Np, C) activation slab is carried in x_sc across layers.
# ---------------------------------------------------------------------------
def vit_kernel(patches_ref, pw_ref, cp_ref, kmask_ref,
               wqkv_ref, bqkv_ref, wproj_ref, bproj_ref,
               w1_ref, b1_ref, w2_ref, b2_ref,
               ng_ref, nb_ref, hw_ref, hb_ref,
               cls_ref, tok_ref,
               x_sc, av_sc,
               *, num_heads, b_tile, n_pad, n_real):
    l = pl.program_id(1)
    n_layers = pl.num_programs(1)

    C = pw_ref.shape[1]
    H = num_heads
    hd = C // H
    # head-group width: as close to 128 lanes as possible (divides H)
    hg = max(1, min(H, 128 // max(hd, 1)))
    while H % hg:
        hg -= 1
    gw = hg * hd

    # ---- first-layer prologue: patch embed + cls token + positional embed.
    # cp_ref already holds pos_embed (+ patch bias on patch rows, cls_token on
    # row 0, zeros on pad rows); row 0 / pad rows of patches are zero.
    @pl.when(l == 0)
    def _init():
        emb = jnp.dot(patches_ref[...], pw_ref[...],
                      preferred_element_type=jnp.float32)          # (R, C) f32
        for b in range(b_tile):
            x_sc[b * n_pad:(b + 1) * n_pad, :] = (
                emb[b * n_pad:(b + 1) * n_pad, :] + cp_ref[...])

    x = x_sc[...]                                                   # (R, C) f32

    # ------------------------- multi-head self attention --------------------
    xn = _ln_stats(x).astype(jnp.bfloat16)                          # affine folded
    qkv = (jnp.dot(xn, wqkv_ref[0], preferred_element_type=jnp.float32)
           + bqkv_ref[0]).astype(jnp.bfloat16)                      # single bf16 cast

    for b in range(b_tile):                                         # per image
        r0, r1 = b * n_pad, (b + 1) * n_pad
        qkv_b = qkv[r0:r1, :]                                       # (Np, 3C) bf16
        for g in range(H // hg):                                    # head groups
            parts = []
            for j in range(hg):
                h = g * hg + j
                q_h = qkv_b[:, h * hd:(h + 1) * hd]
                k_h = qkv_b[:, C + h * hd:C + (h + 1) * hd]
                v_h = qkv_b[:, 2 * C + h * hd:2 * C + (h + 1) * hd]
                # 1/sqrt(hd) already folded into the Q columns of wqkv/bqkv.
                s = lax.dot_general(q_h, k_h, (((1,), (1,)), ((), ())),
                                    preferred_element_type=jnp.float32)  # (Np, Np)
                if n_real < n_pad:
                    s = s + kmask_ref[...]                          # mask pad keys
                s = s - jnp.max(s, axis=-1, keepdims=True)
                p = jnp.exp(s)
                p = p * pl.reciprocal(jnp.sum(p, axis=-1, keepdims=True),
                                      approx=False)
                parts.append(jnp.dot(p.astype(jnp.bfloat16), v_h,
                                     preferred_element_type=jnp.float32))
            av_g = parts[0] if hg == 1 else jnp.concatenate(parts, axis=-1)
            # lane-dense (gw-wide) store into the bf16 AV staging scratch
            av_sc[r0:r1, g * gw:(g + 1) * gw] = av_g.astype(jnp.bfloat16)

    attn = jnp.dot(av_sc[...], wproj_ref[0],
                   preferred_element_type=jnp.float32) + bproj_ref[0]
    x = x + attn                                                    # residual 1

    # --------------------------------- MLP -----------------------------------
    xn2 = _ln_stats(x).astype(jnp.bfloat16)                         # affine folded
    h1 = jnp.dot(xn2, w1_ref[0], preferred_element_type=jnp.float32) + b1_ref[0]
    # exact GELU (erf), matching nn.GELU default, computed in f32
    h1 = 0.5 * h1 * (1.0 + lax.erf(h1 * (1.0 / math.sqrt(2.0))))
    h2 = jnp.dot(h1.astype(jnp.bfloat16), w2_ref[0],
                 preferred_element_type=jnp.float32) + b2_ref[0]
    x = x + h2                                                      # residual 2
    x_sc[...] = x

    # ---- last-layer epilogue: final LayerNorm + classification head ---------
    @pl.when(l == n_layers - 1)
    def _fin():
        feat = _ln_affine(x, ng_ref[...], nb_ref[...])              # (R, C) f32
        tok_ref[...] = feat                                         # full slab out
        rows = [feat[b * n_pad:b * n_pad + 1, :] for b in range(b_tile)]
        cls_in = rows[0] if b_tile == 1 else jnp.concatenate(rows, axis=0)
        cls_ref[0] = (jnp.dot(cls_in.astype(jnp.bfloat16), hw_ref[...],
                              preferred_element_type=jnp.float32) + hb_ref[...])


# ---------------------------------------------------------------------------
# Parameters
# ---------------------------------------------------------------------------
def init_raw_params(key, *, img_size, patch_size, in_chans, embed_dim, depth,
                    num_heads, mlp_ratio, num_classes):
    """Raw f32 parameters (PyTorch-module-equivalent shapes, pre-transposed)."""
    del num_heads
    P = (img_size // patch_size) ** 2
    N = P + 1
    K = in_chans * patch_size * patch_size
    Hd = int(embed_dim * mlp_ratio)
    ks = jax.random.split(key, 20)
    nrm = lambda k, shp, std=0.02: std * jax.random.normal(k, shp, jnp.float32)
    return {
        "patch_w": nrm(ks[0], (K, embed_dim)),
        "patch_b": nrm(ks[1], (embed_dim,)),
        "cls_token": nrm(ks[2], (embed_dim,)),
        "pos_embed": nrm(ks[3], (N, embed_dim)),
        "norm_g": 1.0 + nrm(ks[4], (embed_dim,), 0.05),
        "norm_b": nrm(ks[5], (embed_dim,)),
        "head_w": nrm(ks[6], (embed_dim, num_classes)),
        "head_b": nrm(ks[7], (num_classes,)),
        "ln1_g": 1.0 + nrm(ks[8], (depth, embed_dim), 0.05),
        "ln1_b": nrm(ks[9], (depth, embed_dim)),
        "wqkv": nrm(ks[10], (depth, embed_dim, 3 * embed_dim)),
        "bqkv": nrm(ks[11], (depth, 3 * embed_dim)),
        "wproj": nrm(ks[12], (depth, embed_dim, embed_dim)),
        "bproj": nrm(ks[13], (depth, embed_dim)),
        "ln2_g": 1.0 + nrm(ks[14], (depth, embed_dim), 0.05),
        "ln2_b": nrm(ks[15], (depth, embed_dim)),
        "w1": nrm(ks[16], (depth, embed_dim, Hd)),
        "b1": nrm(ks[17], (depth, Hd)),
        "w2": nrm(ks[18], (depth, Hd, embed_dim)),
        "b2": nrm(ks[19], (depth, embed_dim)),
    }


def prepare_params(raw, *, num_heads, n_pad):
    """Fold LN affines + attention scale into the weights; cast to bf16."""
    C = raw["pos_embed"].shape[-1]
    N = raw["pos_embed"].shape[0]
    hd = C // num_heads
    scale = hd ** -0.5
    ncls = raw["head_w"].shape[1]
    ncp = max(128, ((ncls + 127) // 128) * 128)          # lane-dense class dim

    # norm1 affine + q-scale folded into the qkv projection
    wqkv = raw["wqkv"] * raw["ln1_g"][:, :, None]
    bqkv = raw["bqkv"] + jnp.einsum("dc,dck->dk", raw["ln1_b"], raw["wqkv"])
    qscale = jnp.concatenate([jnp.full((C,), scale, jnp.float32),
                              jnp.ones((2 * C,), jnp.float32)])
    wqkv = wqkv * qscale[None, None, :]
    bqkv = bqkv * qscale[None, :]

    # norm2 affine folded into fc1
    w1 = raw["w1"] * raw["ln2_g"][:, :, None]
    b1 = raw["b1"] + jnp.einsum("dc,dch->dh", raw["ln2_b"], raw["w1"])

    # cls token + positional embedding + patch bias -> one additive (Np, C) table
    cp = raw["pos_embed"]
    cp = cp.at[1:].add(raw["patch_b"][None, :])
    cp = cp.at[0].add(raw["cls_token"])
    cp = jnp.pad(cp, ((0, n_pad - N), (0, 0)))

    head_w = jnp.zeros((C, ncp), jnp.float32).at[:, :ncls].set(raw["head_w"])
    head_b = jnp.zeros((1, ncp), jnp.float32).at[0, :ncls].set(raw["head_b"])

    bf = lambda a: a.astype(jnp.bfloat16)
    return {
        "patch_w": bf(raw["patch_w"]),
        "cls_pos": cp,
        "wqkv": bf(wqkv), "bqkv": bqkv[:, None, :],
        "wproj": bf(raw["wproj"]), "bproj": raw["bproj"][:, None, :],
        "w1": bf(w1), "b1": b1[:, None, :],
        "w2": bf(raw["w2"]), "b2": raw["b2"][:, None, :],
        "norm_g": raw["norm_g"][None, :], "norm_b": raw["norm_b"][None, :],
        "head_w": bf(head_w), "head_b": head_b,
    }


def extract_patches(x, patch_size):
    # x: (B, C_in, H, W) NCHW -> (B, P, C_in*ps*ps), Conv2d(k=s=ps) ordering
    B, Cin, H, W = x.shape
    ps = patch_size
    x = x.reshape(B, Cin, H // ps, ps, W // ps, ps)
    x = x.transpose(0, 2, 4, 1, 3, 5)                    # (B, Hp, Wp, Cin, ps, ps)
    return x.reshape(B, (H // ps) * (W // ps), Cin * ps * ps)


# ---------------------------------------------------------------------------
# Forward (single fused pallas_call)
# ---------------------------------------------------------------------------
def vit_teacher_forward(prep, x, *, patch_size, num_heads, num_classes, b_tile=8):
    C = prep["cls_pos"].shape[-1]
    Np = prep["cls_pos"].shape[0]
    depth = prep["wqkv"].shape[0]
    Hd = prep["w1"].shape[-1]
    NCp = prep["head_w"].shape[-1]
    hd = C // num_heads

    patches = extract_patches(x, patch_size)                   # (B, P, K) f32
    B, P, K = patches.shape
    N = P + 1
    assert Np == ((N + 7) // 8) * 8, "prepared params padded for a different N"

    b_tile = max(1, min(b_tile, B))
    n_chunks = -(-B // b_tile)
    B_pad = n_chunks * b_tile
    R = b_tile * Np

    # zero row 0 (cls slot), zero pad rows, zero pad images
    patches = jnp.pad(patches, ((0, B_pad - B), (1, Np - N), (0, 0)))
    patches = patches.reshape(B_pad * Np, K).astype(jnp.bfloat16)

    kmask = jnp.where(jnp.arange(Np) < N, 0.0, -1e9).astype(jnp.float32)[None, :]

    # --- VMEM budget (double-buffered inputs/outputs + persistent scratch) ----
    per_layer_blk = ((C * 3 * C + C * C + C * Hd + Hd * C) * 2
                     + (3 * C + C + Hd + C) * 4)
    rep_blk = (R * K + K * C + C * NCp) * 2 + (Np * C + Np + 2 * C + NCp) * 4
    out_blk = (b_tile * NCp + R * C) * 4
    scratch_bytes = R * C * 4 + R * C * 2
    est = 2 * (per_layer_blk + rep_blk + out_blk) + scratch_bytes
    try:
        cap = int(pltpu.get_tpu_info().vmem_capacity_bytes) - (8 << 20)
    except Exception:
        cap = 96 << 20
    vmem_limit = max(32 << 20, min(int(est * 1.3) + (1 << 20), cap))

    # --- advisory cost estimate ------------------------------------------------
    flops_layer = (2 * R * C * 3 * C + 2 * R * C * C + 4 * R * C * Hd
                   + b_tile * num_heads * 4 * Np * Np * hd)
    flops = n_chunks * (depth * flops_layer + 2 * R * K * C + 2 * b_tile * C * NCp)
    transc = n_chunks * depth * (b_tile * num_heads * Np * Np + R * Hd)
    param_bytes = sum(int(v.size) * v.dtype.itemsize
                      for v in jax.tree_util.tree_leaves(prep))
    bytes_accessed = (n_chunks * param_bytes + int(patches.size) * 2
                      + (B_pad * Np * C + n_chunks * b_tile * NCp) * 4)

    def rep(shape):
        nd = len(shape)
        return pl.BlockSpec(shape, lambda c, l, _n=nd: (0,) * _n)

    def per_layer(shape):
        nd = len(shape)
        return pl.BlockSpec((1,) + shape, lambda c, l, _n=nd: (l,) + (0,) * _n)

    cls_pad, feat = pl.pallas_call(
        functools.partial(vit_kernel, num_heads=num_heads, b_tile=b_tile,
                          n_pad=Np, n_real=N),
        out_shape=(jax.ShapeDtypeStruct((n_chunks, b_tile, NCp), jnp.float32),
                   jax.ShapeDtypeStruct((B_pad * Np, C), jnp.float32)),
        grid=(n_chunks, depth),
        in_specs=[
            pl.BlockSpec((R, K), lambda c, l: (c, 0)),         # patches chunk
            rep((K, C)), rep((Np, C)), rep((1, Np)),           # patch_w, cls_pos, kmask
            per_layer((C, 3 * C)), per_layer((1, 3 * C)),      # wqkv / bqkv
            per_layer((C, C)), per_layer((1, C)),              # wproj / bproj
            per_layer((C, Hd)), per_layer((1, Hd)),            # w1 / b1
            per_layer((Hd, C)), per_layer((1, C)),             # w2 / b2
            rep((1, C)), rep((1, C)),                          # final norm g/b
            rep((C, NCp)), rep((1, NCp)),                      # head_w / head_b
        ],
        out_specs=(pl.BlockSpec((1, b_tile, NCp), lambda c, l: (c, 0, 0)),
                   pl.BlockSpec((R, C), lambda c, l: (c, 0))),
        scratch_shapes=[pltpu.VMEM((R, C), jnp.float32),       # activation slab
                        pltpu.VMEM((R, C), jnp.bfloat16)],     # AV staging (bf16)
        compiler_params=pltpu.CompilerParams(
            dimension_semantics=("parallel", "arbitrary"),
            vmem_limit_bytes=int(vmem_limit)),
        cost_estimate=pl.CostEstimate(flops=int(flops),
                                      transcendentals=int(transc),
                                      bytes_accessed=int(bytes_accessed)),
    )(patches, prep["patch_w"], prep["cls_pos"], kmask,
      prep["wqkv"], prep["bqkv"], prep["wproj"], prep["bproj"],
      prep["w1"], prep["b1"], prep["w2"], prep["b2"],
      prep["norm_g"], prep["norm_b"], prep["head_w"], prep["head_b"])

    cls_logits = cls_pad.reshape(B_pad, NCp)[:B, :num_classes]
    tokens = feat.reshape(B_pad, Np, C)[:B, 1:N, :]
    return cls_logits, tokens


# ---------------------------------------------------------------------------
# Pure-JAX f32 reference (PyTorch-module semantics) for a correctness check
# ---------------------------------------------------------------------------
def reference_forward(raw, x, *, patch_size, num_heads):
    C = raw["pos_embed"].shape[-1]
    H = num_heads
    hd = C // H
    scale = hd ** -0.5
    depth = raw["wqkv"].shape[0]

    def ln(z, g, b):
        mu = z.mean(-1, keepdims=True)
        var = ((z - mu) ** 2).mean(-1, keepdims=True)
        return (z - mu) * lax.rsqrt(var + EPS_LN) * g + b

    patches = extract_patches(x, patch_size)
    xt = patches @ raw["patch_w"] + raw["patch_b"]
    B, _, _ = xt.shape
    cls = jnp.broadcast_to(raw["cls_token"], (B, 1, C))
    xt = jnp.concatenate([cls, xt], axis=1) + raw["pos_embed"][None]
    N = xt.shape[1]
    for d in range(depth):
        xn = ln(xt, raw["ln1_g"][d], raw["ln1_b"][d])
        qkv = xn @ raw["wqkv"][d] + raw["bqkv"][d]
        q, k, v = jnp.split(qkv, 3, axis=-1)
        q = q.reshape(B, N, H, hd).transpose(0, 2, 1, 3)
        k = k.reshape(B, N, H, hd).transpose(0, 2, 1, 3)
        v = v.reshape(B, N, H, hd).transpose(0, 2, 1, 3)
        att = jnp.einsum("bhqd,bhkd->bhqk", q, k) * scale
        att = jax.nn.softmax(att, axis=-1)
        o = jnp.einsum("bhqk,bhkd->bhqd", att, v).transpose(0, 2, 1, 3).reshape(B, N, C)
        xt = xt + (o @ raw["wproj"][d] + raw["bproj"][d])
        xn2 = ln(xt, raw["ln2_g"][d], raw["ln2_b"][d])
        h1 = xn2 @ raw["w1"][d] + raw["b1"][d]
        h1 = 0.5 * h1 * (1.0 + lax.erf(h1 / math.sqrt(2.0)))
        xt = xt + (h1 @ raw["w2"][d] + raw["b2"][d])
    featr = ln(xt, raw["norm_g"], raw["norm_b"])
    cls_out = featr[:, 0] @ raw["head_w"] + raw["head_b"]
    return cls_out, featr[:, 1:]


# ---------------------------------------------------------------------------
if __name__ == "__main__":
    # Small, ViT-consistent config: 16x16 image, 4x4 patches -> 16 patches, N=17.
    img_size, patch_size, in_chans = 16, 4, 3
    embed_dim, depth, num_heads, mlp_ratio = 32, 2, 4, 4.0
    num_classes, batch = 10, 2

    key = jax.random.PRNGKey(0)
    pkey, xkey = jax.random.split(key)
    raw = init_raw_params(pkey, img_size=img_size, patch_size=patch_size,
                          in_chans=in_chans, embed_dim=embed_dim, depth=depth,
                          num_heads=num_heads, mlp_ratio=mlp_ratio,
                          num_classes=num_classes)
    N = (img_size // patch_size) ** 2 + 1
    Np = ((N + 7) // 8) * 8
    prep = prepare_params(raw, num_heads=num_heads, n_pad=Np)
    x = jax.random.normal(xkey, (batch, in_chans, img_size, img_size), jnp.float32)

    fwd = jax.jit(functools.partial(vit_teacher_forward, patch_size=patch_size,
                                    num_heads=num_heads, num_classes=num_classes,
                                    b_tile=4))
    cls_logits, tokens = fwd(prep, x)
    jax.block_until_ready((cls_logits, tokens))
    assert cls_logits.shape == (batch, num_classes)
    assert tokens.shape == (batch, (img_size // patch_size) ** 2, embed_dim)

    # Correctness check against the PyTorch-semantics f32 reference (loose
    # tolerance: kernel uses bf16 weights/activations on the MXU by design).
    ref_cls, ref_tok = reference_forward(raw, x, patch_size=patch_size,
                                         num_heads=num_heads)
    err_cls = float(jnp.max(jnp.abs(cls_logits - ref_cls)))
    err_tok = float(jnp.max(jnp.abs(tokens - ref_tok)))
    assert err_cls < 5e-2, f"cls logits mismatch vs reference: {err_cls}"
    assert err_tok < 1e-1, f"token features mismatch vs reference: {err_tok}"

    print("KERNEL_OK")
</pallas_src>

<mosaic_0001>
module attributes {stable_mosaic.version = 11 : i64} {
  func.func @vit_kernel(%arg0: i32, %arg1: i32, %arg2: memref<48x48xbf16, #tpu.memory_space<vmem>>, %arg3: memref<48x32xbf16, #tpu.memory_space<vmem>>, %arg4: memref<24x32xf32, #tpu.memory_space<vmem>>, %arg5: memref<1x24xf32, #tpu.memory_space<vmem>>, %arg6: memref<1x32x96xbf16, #tpu.memory_space<vmem>>, %arg7: memref<1x1x96xf32, #tpu.memory_space<vmem>>, %arg8: memref<1x32x32xbf16, #tpu.memory_space<vmem>>, %arg9: memref<1x1x32xf32, #tpu.memory_space<vmem>>, %arg10: memref<1x32x128xbf16, #tpu.memory_space<vmem>>, %arg11: memref<1x1x128xf32, #tpu.memory_space<vmem>>, %arg12: memref<1x128x32xbf16, #tpu.memory_space<vmem>>, %arg13: memref<1x1x32xf32, #tpu.memory_space<vmem>>, %arg14: memref<1x32xf32, #tpu.memory_space<vmem>>, %arg15: memref<1x32xf32, #tpu.memory_space<vmem>>, %arg16: memref<32x128xbf16, #tpu.memory_space<vmem>>, %arg17: memref<1x128xf32, #tpu.memory_space<vmem>>, %arg18: memref<1x2x128xf32, #tpu.memory_space<vmem>>, %arg19: memref<48x32xf32, #tpu.memory_space<vmem>>, %arg20: memref<48x32xf32, #tpu.memory_space<vmem>>, %arg21: memref<48x32xbf16, #tpu.memory_space<vmem>>) attributes {dimension_semantics = [#tpu.dimension_semantics<parallel>, #tpu.dimension_semantics<arbitrary>], iteration_bounds = array<i64: 1, 2>, scalar_prefetch = 0 : i64, scratch_operands = 2 : i64, tpu.core_type = #tpu.core_type<tc>, window_params = [{transform_indices = @transform_0, window_bounds = array<i64: 48, 48>}, {pipeline_mode = #tpu.pipeline_mode<synchronous>, transform_indices = @transform_1, window_bounds = array<i64: 48, 32>}, {pipeline_mode = #tpu.pipeline_mode<synchronous>, transform_indices = @transform_2, window_bounds = array<i64: 24, 32>}, {pipeline_mode = #tpu.pipeline_mode<synchronous>, transform_indices = @transform_3, window_bounds = array<i64: 1, 24>}, {transform_indices = @transform_4, window_bounds = array<i64: 1, 32, 96>}, {transform_indices = @transform_5, window_bounds = array<i64: 1, 1, 96>}, {transform_indices = @transform_6, window_bounds = array<i64: 1, 32, 32>}, {transform_indices = @transform_7, window_bounds = array<i64: 1, 1, 32>}, {transform_indices = @transform_8, window_bounds = array<i64: 1, 32, 128>}, {transform_indices = @transform_9, window_bounds = array<i64: 1, 1, 128>}, {transform_indices = @transform_10, window_bounds = array<i64: 1, 128, 32>}, {transform_indices = @transform_11, window_bounds = array<i64: 1, 1, 32>}, {pipeline_mode = #tpu.pipeline_mode<synchronous>, transform_indices = @transform_12, window_bounds = array<i64: 1, 32>}, {pipeline_mode = #tpu.pipeline_mode<synchronous>, transform_indices = @transform_13, window_bounds = array<i64: 1, 32>}, {pipeline_mode = #tpu.pipeline_mode<synchronous>, transform_indices = @transform_14, window_bounds = array<i64: 32, 128>}, {pipeline_mode = #tpu.pipeline_mode<synchronous>, transform_indices = @transform_15, window_bounds = array<i64: 1, 128>}, {transform_indices = @transform_16, window_bounds = array<i64: 1, 2, 128>}, {transform_indices = @transform_17, window_bounds = array<i64: 48, 32>}]} {
    %c0_i32 = arith.constant 0 : i32
    %0 = arith.cmpi eq, %arg1, %c0_i32 : i32
    %1 = arith.extui %0 : i1 to i32
    %c0_i32_0 = arith.constant 0 : i32
    %2 = arith.cmpi ne, %1, %c0_i32_0 : i32
    scf.if %2 {
      %c0_98 = arith.constant 0 : index
      %c0_99 = arith.constant 0 : index
      %247 = vector.load %arg2[%c0_98, %c0_99] : memref<48x48xbf16, #tpu.memory_space<vmem>>, vector<48x48xbf16>
      %c0_100 = arith.constant 0 : index
      %c0_101 = arith.constant 0 : index
      %248 = vector.load %arg3[%c0_100, %c0_101] : memref<48x32xbf16, #tpu.memory_space<vmem>>, vector<48x32xbf16>
      %cst_102 = arith.constant dense<0.000000e+00> : vector<48x32xf32>
      %249 = tpu.matmul %247, %248, %cst_102 {dimension_numbers = #tpu.dot_dimension_numbers<[1], [0], [0], [1], [0, 0, 1, 1], [], []>} : vector<48x48xbf16>, vector<48x32xbf16>, vector<48x32xf32> -> vector<48x32xf32>
      %250 = vector.extract_strided_slice %249 {offsets = [0, 0], sizes = [24, 32], strides = [1, 1]} : vector<48x32xf32> to vector<24x32xf32>
      %c0_103 = arith.constant 0 : index
      %c0_104 = arith.constant 0 : index
      %251 = vector.load %arg4[%c0_103, %c0_104] : memref<24x32xf32, #tpu.memory_space<vmem>>, vector<24x32xf32>
      %252 = arith.addf %250, %251 : vector<24x32xf32>
      %c0_105 = arith.constant 0 : index
      %c0_106 = arith.constant 0 : index
      %253 = vector.load %arg20[%c0_105, %c0_106] : memref<48x32xf32, #tpu.memory_space<vmem>>, vector<24x32xf32>
      tpu.vector_store %arg20[%c0_105, %c0_106], %252 {strides = array<i32>} : memref<48x32xf32, #tpu.memory_space<vmem>>, vector<24x32xf32>,
      %254 = vector.extract_strided_slice %249 {offsets = [24, 0], sizes = [24, 32], strides = [1, 1]} : vector<48x32xf32> to vector<24x32xf32>
      %c0_107 = arith.constant 0 : index
      %c0_108 = arith.constant 0 : index
      %255 = vector.load %arg4[%c0_107, %c0_108] : memref<24x32xf32, #tpu.memory_space<vmem>>, vector<24x32xf32>
      %256 = arith.addf %254, %255 : vector<24x32xf32>
      %c24_109 = arith.constant 24 : index
      %c0_110 = arith.constant 0 : index
      %257 = vector.load %arg20[%c24_109, %c0_110] : memref<48x32xf32, #tpu.memory_space<vmem>>, vector<24x32xf32>
      tpu.vector_store %arg20[%c24_109, %c0_110], %256 {strides = array<i32>} : memref<48x32xf32, #tpu.memory_space<vmem>>, vector<24x32xf32>,
    } else {
    }
    %c0 = arith.constant 0 : index
    %c0_1 = arith.constant 0 : index
    %3 = vector.load %arg20[%c0, %c0_1] : memref<48x32xf32, #tpu.memory_space<vmem>>, vector<48x32xf32>
    %cst = arith.constant dense<0.000000e+00> : vector<48xf32>
    %4 = vector.multi_reduction <add>, %3, %cst [1] : vector<48x32xf32> to vector<48xf32>
    %5 = vector.shape_cast %4 : vector<48xf32> to vector<48x1xf32>
    %cst_2 = arith.constant 3.200000e+01 : f32
    %6 = vector.broadcast %cst_2 : f32 to vector<48x1xf32>
    %7 = arith.divf %5, %6 : vector<48x1xf32>
    %8 = vector.broadcast %7 : vector<48x1xf32> to vector<48x32xf32>
    %9 = arith.subf %3, %8 : vector<48x32xf32>
    %10 = arith.mulf %9, %9 : vector<48x32xf32>
    %cst_3 = arith.constant dense<0.000000e+00> : vector<48xf32>
    %11 = vector.multi_reduction <add>, %10, %cst_3 [1] : vector<48x32xf32> to vector<48xf32>
    %12 = vector.shape_cast %11 : vector<48xf32> to vector<48x1xf32>
    %cst_4 = arith.constant 3.200000e+01 : f32
    %13 = vector.broadcast %cst_4 : f32 to vector<48x1xf32>
    %14 = arith.divf %12, %13 : vector<48x1xf32>
    %15 = vector.broadcast %7 : vector<48x1xf32> to vector<48x32xf32>
    %16 = arith.subf %3, %15 : vector<48x32xf32>
    %cst_5 = arith.constant 9.99999997E-7 : f32
    %17 = vector.broadcast %cst_5 : f32 to vector<48x1xf32>
    %18 = arith.addf %14, %17 : vector<48x1xf32>
    %19 = math.rsqrt %18 : vector<48x1xf32>
    %20 = vector.broadcast %19 : vector<48x1xf32> to vector<48x32xf32>
    %21 = arith.mulf %16, %20 : vector<48x32xf32>
    %22 = arith.truncf %21 : vector<48x32xf32> to vector<48x32xbf16>
    %c0_6 = arith.constant 0 : index
    %c0_7 = arith.constant 0 : index
    %c0_8 = arith.constant 0 : index
    %23 = vector.load %arg6[%c0_6, %c0_7, %c0_8] : memref<1x32x96xbf16, #tpu.memory_space<vmem>>, vector<1x32x96xbf16>
    %24 = vector.shape_cast %23 : vector<1x32x96xbf16> to vector<32x96xbf16>
    %cst_9 = arith.constant dense<0.000000e+00> : vector<48x96xf32>
    %25 = tpu.matmul %22, %24, %cst_9 {dimension_numbers = #tpu.dot_dimension_numbers<[1], [0], [0], [1], [0, 0, 1, 1], [], []>} : vector<48x32xbf16>, vector<32x96xbf16>, vector<48x96xf32> -> vector<48x96xf32>
    %c0_10 = arith.constant 0 : index
    %c0_11 = arith.constant 0 : index
    %c0_12 = arith.constant 0 : index
    %26 = vector.load %arg7[%c0_10, %c0_11, %c0_12] : memref<1x1x96xf32, #tpu.memory_space<vmem>>, vector<1x1x96xf32>
    %27 = vector.shape_cast %26 : vector<1x1x96xf32> to vector<1x96xf32>
    %28 = vector.broadcast %27 : vector<1x96xf32> to vector<48x96xf32>
    %29 = arith.addf %25, %28 : vector<48x96xf32>
    %30 = arith.truncf %29 : vector<48x96xf32> to vector<48x96xbf16>
    %31 = vector.extract_strided_slice %30 {offsets = [0, 0], sizes = [24, 96], strides = [1, 1]} : vector<48x96xbf16> to vector<24x96xbf16>
    %32 = vector.extract_strided_slice %31 {offsets = [0, 0], sizes = [24, 8], strides = [1, 1]} : vector<24x96xbf16> to vector<24x8xbf16>
    %33 = vector.extract_strided_slice %31 {offsets = [0, 32], sizes = [24, 8], strides = [1, 1]} : vector<24x96xbf16> to vector<24x8xbf16>
    %34 = vector.extract_strided_slice %31 {offsets = [0, 64], sizes = [24, 8], strides = [1, 1]} : vector<24x96xbf16> to vector<24x8xbf16>
    %cst_13 = arith.constant dense<0.000000e+00> : vector<24x24xf32>
    %35 = tpu.matmul %32, %33, %cst_13 {dimension_numbers = #tpu.dot_dimension_numbers<[1], [1], [0], [0], [0, 0, 1, 0], [], []>} : vector<24x8xbf16>, vector<24x8xbf16>, vector<24x24xf32> -> vector<24x24xf32>
    %c0_14 = arith.constant 0 : index
    %c0_15 = arith.constant 0 : index
    %36 = vector.load %arg5[%c0_14, %c0_15] : memref<1x24xf32, #tpu.memory_space<vmem>>, vector<1x24xf32>
    %37 = vector.broadcast %36 : vector<1x24xf32> to vector<24x24xf32>
    %38 = arith.addf %35, %37 : vector<24x24xf32>
    %cst_16 = arith.constant dense<0xFF800000> : vector<24xf32>
    %39 = vector.multi_reduction <maximumf>, %38, %cst_16 [1] : vector<24x24xf32> to vector<24xf32>
    %40 = vector.shape_cast %39 : vector<24xf32> to vector<24x1xf32>
    %41 = vector.broadcast %40 : vector<24x1xf32> to vector<24x24xf32>
    %42 = arith.subf %38, %41 : vector<24x24xf32>
    %43 = math.exp %42 : vector<24x24xf32>
    %cst_17 = arith.constant dense<0.000000e+00> : vector<24xf32>
    %44 = vector.multi_reduction <add>, %43, %cst_17 [1] : vector<24x24xf32> to vector<24xf32>
    %45 = vector.shape_cast %44 : vector<24xf32> to vector<24x1xf32>
    %46 = tpu.reciprocal %45 : vector<24x1xf32> -> vector<24x1xf32>
    %47 = vector.broadcast %46 : vector<24x1xf32> to vector<24x24xf32>
    %48 = arith.mulf %43, %47 : vector<24x24xf32>
    %49 = arith.truncf %48 : vector<24x24xf32> to vector<24x24xbf16>
    %cst_18 = arith.constant dense<0.000000e+00> : vector<24x8xf32>
    %50 = tpu.matmul %49, %34, %cst_18 {dimension_numbers = #tpu.dot_dimension_numbers<[1], [0], [0], [1], [0, 0, 1, 1], [], []>} : vector<24x24xbf16>, vector<24x8xbf16>, vector<24x8xf32> -> vector<24x8xf32>
    %51 = vector.extract_strided_slice %31 {offsets = [0, 8], sizes = [24, 8], strides = [1, 1]} : vector<24x96xbf16> to vector<24x8xbf16>
    %52 = vector.extract_strided_slice %31 {offsets = [0, 40], sizes = [24, 8], strides = [1, 1]} : vector<24x96xbf16> to vector<24x8xbf16>
    %53 = vector.extract_strided_slice %31 {offsets = [0, 72], sizes = [24, 8], strides = [1, 1]} : vector<24x96xbf16> to vector<24x8xbf16>
    %cst_19 = arith.constant dense<0.000000e+00> : vector<24x24xf32>
    %54 = tpu.matmul %51, %52, %cst_19 {dimension_numbers = #tpu.dot_dimension_numbers<[1], [1], [0], [0], [0, 0, 1, 0], [], []>} : vector<24x8xbf16>, vector<24x8xbf16>, vector<24x24xf32> -> vector<24x24xf32>
    %c0_20 = arith.constant 0 : index
    %c0_21 = arith.constant 0 : index
    %55 = vector.load %arg5[%c0_20, %c0_21] : memref<1x24xf32, #tpu.memory_space<vmem>>, vector<1x24xf32>
    %56 = vector.broadcast %55 : vector<1x24xf32> to vector<24x24xf32>
    %57 = arith.addf %54, %56 : vector<24x24xf32>
    %cst_22 = arith.constant dense<0xFF800000> : vector<24xf32>
    %58 = vector.multi_reduction <maximumf>, %57, %cst_22 [1] : vector<24x24xf32> to vector<24xf32>
    %59 = vector.shape_cast %58 : vector<24xf32> to vector<24x1xf32>
    %60 = vector.broadcast %59 : vector<24x1xf32> to vector<24x24xf32>
    %61 = arith.subf %57, %60 : vector<24x24xf32>
    %62 = math.exp %61 : vector<24x24xf32>
    %cst_23 = arith.constant dense<0.000000e+00> : vector<24xf32>
    %63 = vector.multi_reduction <add>, %62, %cst_23 [1] : vector<24x24xf32> to vector<24xf32>
    %64 = vector.shape_cast %63 : vector<24xf32> to vector<24x1xf32>
    %65 = tpu.reciprocal %64 : vector<24x1xf32> -> vector<24x1xf32>
    %66 = vector.broadcast %65 : vector<24x1xf32> to vector<24x24xf32>
    %67 = arith.mulf %62, %66 : vector<24x24xf32>
    %68 = arith.truncf %67 : vector<24x24xf32> to vector<24x24xbf16>
    %cst_24 = arith.constant dense<0.000000e+00> : vector<24x8xf32>
    %69 = tpu.matmul %68, %53, %cst_24 {dimension_numbers = #tpu.dot_dimension_numbers<[1], [0], [0], [1], [0, 0, 1, 1], [], []>} : vector<24x24xbf16>, vector<24x8xbf16>, vector<24x8xf32> -> vector<24x8xf32>
    %70 = vector.extract_strided_slice %31 {offsets = [0, 16], sizes = [24, 8], strides = [1, 1]} : vector<24x96xbf16> to vector<24x8xbf16>
    %71 = vector.extract_strided_slice %31 {offsets = [0, 48], sizes = [24, 8], strides = [1, 1]} : vector<24x96xbf16> to vector<24x8xbf16>
    %72 = vector.extract_strided_slice %31 {offsets = [0, 80], sizes = [24, 8], strides = [1, 1]} : vector<24x96xbf16> to vector<24x8xbf16>
    %cst_25 = arith.constant dense<0.000000e+00> : vector<24x24xf32>
    %73 = tpu.matmul %70, %71, %cst_25 {dimension_numbers = #tpu.dot_dimension_numbers<[1], [1], [0], [0], [0, 0, 1, 0], [], []>} : vector<24x8xbf16>, vector<24x8xbf16>, vector<24x24xf32> -> vector<24x24xf32>
    %c0_26 = arith.constant 0 : index
    %c0_27 = arith.constant 0 : index
    %74 = vector.load %arg5[%c0_26, %c0_27] : memref<1x24xf32, #tpu.memory_space<vmem>>, vector<1x24xf32>
    %75 = vector.broadcast %74 : vector<1x24xf32> to vector<24x24xf32>
    %76 = arith.addf %73, %75 : vector<24x24xf32>
    %cst_28 = arith.constant dense<0xFF800000> : vector<24xf32>
    %77 = vector.multi_reduction <maximumf>, %76, %cst_28 [1] : vector<24x24xf32> to vector<24xf32>
    %78 = vector.shape_cast %77 : vector<24xf32> to vector<24x1xf32>
    %79 = vector.broadcast %78 : vector<24x1xf32> to vector<24x24xf32>
    %80 = arith.subf %76, %79 : vector<24x24xf32>
    %81 = math.exp %80 : vector<24x24xf32>
    %cst_29 = arith.constant dense<0.000000e+00> : vector<24xf32>
    %82 = vector.multi_reduction <add>, %81, %cst_29 [1] : vector<24x24xf32> to vector<24xf32>
    %83 = vector.shape_cast %82 : vector<24xf32> to vector<24x1xf32>
    %84 = tpu.reciprocal %83 : vector<24x1xf32> -> vector<24x1xf32>
    %85 = vector.broadcast %84 : vector<24x1xf32> to vector<24x24xf32>
    %86 = arith.mulf %81, %85 : vector<24x24xf32>
    %87 = arith.truncf %86 : vector<24x24xf32> to vector<24x24xbf16>
    %cst_30 = arith.constant dense<0.000000e+00> : vector<24x8xf32>
    %88 = tpu.matmul %87, %72, %cst_30 {dimension_numbers = #tpu.dot_dimension_numbers<[1], [0], [0], [1], [0, 0, 1, 1], [], []>} : vector<24x24xbf16>, vector<24x8xbf16>, vector<24x8xf32> -> vector<24x8xf32>
    %89 = vector.extract_strided_slice %31 {offsets = [0, 24], sizes = [24, 8], strides = [1, 1]} : vector<24x96xbf16> to vector<24x8xbf16>
    %90 = vector.extract_strided_slice %31 {offsets = [0, 56], sizes = [24, 8], strides = [1, 1]} : vector<24x96xbf16> to vector<24x8xbf16>
    %91 = vector.extract_strided_slice %31 {offsets = [0, 88], sizes = [24, 8], strides = [1, 1]} : vector<24x96xbf16> to vector<24x8xbf16>
    %cst_31 = arith.constant dense<0.000000e+00> : vector<24x24xf32>
    %92 = tpu.matmul %89, %90, %cst_31 {dimension_numbers = #tpu.dot_dimension_numbers<[1], [1], [0], [0], [0, 0, 1, 0], [], []>} : vector<24x8xbf16>, vector<24x8xbf16>, vector<24x24xf32> -> vector<24x24xf32>
    %c0_32 = arith.constant 0 : index
    %c0_33 = arith.constant 0 : index
    %93 = vector.load %arg5[%c0_32, %c0_33] : memref<1x24xf32, #tpu.memory_space<vmem>>, vector<1x24xf32>
    %94 = vector.broadcast %93 : vector<1x24xf32> to vector<24x24xf32>
    %95 = arith.addf %92, %94 : vector<24x24xf32>
    %cst_34 = arith.constant dense<0xFF800000> : vector<24xf32>
    %96 = vector.multi_reduction <maximumf>, %95, %cst_34 [1] : vector<24x24xf32> to vector<24xf32>
    %97 = vector.shape_cast %96 : vector<24xf32> to vector<24x1xf32>
    %98 = vector.broadcast %97 : vector<24x1xf32> to vector<24x24xf32>
    %99 = arith.subf %95, %98 : vector<24x24xf32>
    %100 = math.exp %99 : vector<24x24xf32>
    %cst_35 = arith.constant dense<0.000000e+00> : vector<24xf32>
    %101 = vector.multi_reduction <add>, %100, %cst_35 [1] : vector<24x24xf32> to vector<24xf32>
    %102 = vector.shape_cast %101 : vector<24xf32> to vector<24x1xf32>
    %103 = tpu.reciprocal %102 : vector<24x1xf32> -> vector<24x1xf32>
    %104 = vector.broadcast %103 : vector<24x1xf32> to vector<24x24xf32>
    %105 = arith.mulf %100, %104 : vector<24x24xf32>
    %106 = arith.truncf %105 : vector<24x24xf32> to vector<24x24xbf16>
    %cst_36 = arith.constant dense<0.000000e+00> : vector<24x8xf32>
    %107 = tpu.matmul %106, %91, %cst_36 {dimension_numbers = #tpu.dot_dimension_numbers<[1], [0], [0], [1], [0, 0, 1, 1], [], []>} : vector<24x24xbf16>, vector<24x8xbf16>, vector<24x8xf32> -> vector<24x8xf32>
    %108 = tpu.concatenate %50, %69, %88, %107 in 1 : vector<24x8xf32>, vector<24x8xf32>, vector<24x8xf32>, vector<24x8xf32> -> vector<24x32xf32>
    %109 = arith.truncf %108 : vector<24x32xf32> to vector<24x32xbf16>
    %c0_37 = arith.constant 0 : index
    %c0_38 = arith.constant 0 : index
    %110 = vector.load %arg21[%c0_37, %c0_38] : memref<48x32xbf16, #tpu.memory_space<vmem>>, vector<24x32xbf16>
    tpu.vector_store %arg21[%c0_37, %c0_38], %109 {strides = array<i32>} : memref<48x32xbf16, #tpu.memory_space<vmem>>, vector<24x32xbf16>,
    %111 = vector.extract_strided_slice %30 {offsets = [24, 0], sizes = [24, 96], strides = [1, 1]} : vector<48x96xbf16> to vector<24x96xbf16>
    %112 = vector.extract_strided_slice %111 {offsets = [0, 0], sizes = [24, 8], strides = [1, 1]} : vector<24x96xbf16> to vector<24x8xbf16>
    %113 = vector.extract_strided_slice %111 {offsets = [0, 32], sizes = [24, 8], strides = [1, 1]} : vector<24x96xbf16> to vector<24x8xbf16>
    %114 = vector.extract_strided_slice %111 {offsets = [0, 64], sizes = [24, 8], strides = [1, 1]} : vector<24x96xbf16> to vector<24x8xbf16>
    %cst_39 = arith.constant dense<0.000000e+00> : vector<24x24xf32>
    %115 = tpu.matmul %112, %113, %cst_39 {dimension_numbers = #tpu.dot_dimension_numbers<[1], [1], [0], [0], [0, 0, 1, 0], [], []>} : vector<24x8xbf16>, vector<24x8xbf16>, vector<24x24xf32> -> vector<24x24xf32>
    %c0_40 = arith.constant 0 : index
    %c0_41 = arith.constant 0 : index
    %116 = vector.load %arg5[%c0_40, %c0_41] : memref<1x24xf32, #tpu.memory_space<vmem>>, vector<1x24xf32>
    %117 = vector.broadcast %116 : vector<1x24xf32> to vector<24x24xf32>
    %118 = arith.addf %115, %117 : vector<24x24xf32>
    %cst_42 = arith.constant dense<0xFF800000> : vector<24xf32>
    %119 = vector.multi_reduction <maximumf>, %118, %cst_42 [1] : vector<24x24xf32> to vector<24xf32>
    %120 = vector.shape_cast %119 : vector<24xf32> to vector<24x1xf32>
    %121 = vector.broadcast %120 : vector<24x1xf32> to vector<24x24xf32>
    %122 = arith.subf %118, %121 : vector<24x24xf32>
    %123 = math.exp %122 : vector<24x24xf32>
    %cst_43 = arith.constant dense<0.000000e+00> : vector<24xf32>
    %124 = vector.multi_reduction <add>, %123, %cst_43 [1] : vector<24x24xf32> to vector<24xf32>
    %125 = vector.shape_cast %124 : vector<24xf32> to vector<24x1xf32>
    %126 = tpu.reciprocal %125 : vector<24x1xf32> -> vector<24x1xf32>
    %127 = vector.broadcast %126 : vector<24x1xf32> to vector<24x24xf32>
    %128 = arith.mulf %123, %127 : vector<24x24xf32>
    %129 = arith.truncf %128 : vector<24x24xf32> to vector<24x24xbf16>
    %cst_44 = arith.constant dense<0.000000e+00> : vector<24x8xf32>
    %130 = tpu.matmul %129, %114, %cst_44 {dimension_numbers = #tpu.dot_dimension_numbers<[1], [0], [0], [1], [0, 0, 1, 1], [], []>} : vector<24x24xbf16>, vector<24x8xbf16>, vector<24x8xf32> -> vector<24x8xf32>
    %131 = vector.extract_strided_slice %111 {offsets = [0, 8], sizes = [24, 8], strides = [1, 1]} : vector<24x96xbf16> to vector<24x8xbf16>
    %132 = vector.extract_strided_slice %111 {offsets = [0, 40], sizes = [24, 8], strides = [1, 1]} : vector<24x96xbf16> to vector<24x8xbf16>
    %133 = vector.extract_strided_slice %111 {offsets = [0, 72], sizes = [24, 8], strides = [1, 1]} : vector<24x96xbf16> to vector<24x8xbf16>
    %cst_45 = arith.constant dense<0.000000e+00> : vector<24x24xf32>
    %134 = tpu.matmul %131, %132, %cst_45 {dimension_numbers = #tpu.dot_dimension_numbers<[1], [1], [0], [0], [0, 0, 1, 0], [], []>} : vector<24x8xbf16>, vector<24x8xbf16>, vector<24x24xf32> -> vector<24x24xf32>
    %c0_46 = arith.constant 0 : index
    %c0_47 = arith.constant 0 : index
    %135 = vector.load %arg5[%c0_46, %c0_47] : memref<1x24xf32, #tpu.memory_space<vmem>>, vector<1x24xf32>
    %136 = vector.broadcast %135 : vector<1x24xf32> to vector<24x24xf32>
    %137 = arith.addf %134, %136 : vector<24x24xf32>
    %cst_48 = arith.constant dense<0xFF800000> : vector<24xf32>
    %138 = vector.multi_reduction <maximumf>, %137, %cst_48 [1] : vector<24x24xf32> to vector<24xf32>
    %139 = vector.shape_cast %138 : vector<24xf32> to vector<24x1xf32>
    %140 = vector.broadcast %139 : vector<24x1xf32> to vector<24x24xf32>
    %141 = arith.subf %137, %140 : vector<24x24xf32>
    %142 = math.exp %141 : vector<24x24xf32>
    %cst_49 = arith.constant dense<0.000000e+00> : vector<24xf32>
    %143 = vector.multi_reduction <add>, %142, %cst_49 [1] : vector<24x24xf32> to vector<24xf32>
    %144 = vector.shape_cast %143 : vector<24xf32> to vector<24x1xf32>
    %145 = tpu.reciprocal %144 : vector<24x1xf32> -> vector<24x1xf32>
    %146 = vector.broadcast %145 : vector<24x1xf32> to vector<24x24xf32>
    %147 = arith.mulf %142, %146 : vector<24x24xf32>
    %148 = arith.truncf %147 : vector<24x24xf32> to vector<24x24xbf16>
    %cst_50 = arith.constant dense<0.000000e+00> : vector<24x8xf32>
    %149 = tpu.matmul %148, %133, %cst_50 {dimension_numbers = #tpu.dot_dimension_numbers<[1], [0], [0], [1], [0, 0, 1, 1], [], []>} : vector<24x24xbf16>, vector<24x8xbf16>, vector<24x8xf32> -> vector<24x8xf32>
    %150 = vector.extract_strided_slice %111 {offsets = [0, 16], sizes = [24, 8], strides = [1, 1]} : vector<24x96xbf16> to vector<24x8xbf16>
    %151 = vector.extract_strided_slice %111 {offsets = [0, 48], sizes = [24, 8], strides = [1, 1]} : vector<24x96xbf16> to vector<24x8xbf16>
    %152 = vector.extract_strided_slice %111 {offsets = [0, 80], sizes = [24, 8], strides = [1, 1]} : vector<24x96xbf16> to vector<24x8xbf16>
    %cst_51 = arith.constant dense<0.000000e+00> : vector<24x24xf32>
    %153 = tpu.matmul %150, %151, %cst_51 {dimension_numbers = #tpu.dot_dimension_numbers<[1], [1], [0], [0], [0, 0, 1, 0], [], []>} : vector<24x8xbf16>, vector<24x8xbf16>, vector<24x24xf32> -> vector<24x24xf32>
    %c0_52 = arith.constant 0 : index
    %c0_53 = arith.constant 0 : index
    %154 = vector.load %arg5[%c0_52, %c0_53] : memref<1x24xf32, #tpu.memory_space<vmem>>, vector<1x24xf32>
    %155 = vector.broadcast %154 : vector<1x24xf32> to vector<24x24xf32>
    %156 = arith.addf %153, %155 : vector<24x24xf32>
    %cst_54 = arith.constant dense<0xFF800000> : vector<24xf32>
    %157 = vector.multi_reduction <maximumf>, %156, %cst_54 [1] : vector<24x24xf32> to vector<24xf32>
    %158 = vector.shape_cast %157 : vector<24xf32> to vector<24x1xf32>
    %159 = vector.broadcast %158 : vector<24x1xf32> to vector<24x24xf32>
    %160 = arith.subf %156, %159 : vector<24x24xf32>
    %161 = math.exp %160 : vector<24x24xf32>
    %cst_55 = arith.constant dense<0.000000e+00> : vector<24xf32>
    %162 = vector.multi_reduction <add>, %161, %cst_55 [1] : vector<24x24xf32> to vector<24xf32>
    %163 = vector.shape_cast %162 : vector<24xf32> to vector<24x1xf32>
    %164 = tpu.reciprocal %163 : vector<24x1xf32> -> vector<24x1xf32>
    %165 = vector.broadcast %164 : vector<24x1xf32> to vector<24x24xf32>
    %166 = arith.mulf %161, %165 : vector<24x24xf32>
    %167 = arith.truncf %166 : vector<24x24xf32> to vector<24x24xbf16>
    %cst_56 = arith.constant dense<0.000000e+00> : vector<24x8xf32>
    %168 = tpu.matmul %167, %152, %cst_56 {dimension_numbers = #tpu.dot_dimension_numbers<[1], [0], [0], [1], [0, 0, 1, 1], [], []>} : vector<24x24xbf16>, vector<24x8xbf16>, vector<24x8xf32> -> vector<24x8xf32>
    %169 = vector.extract_strided_slice %111 {offsets = [0, 24], sizes = [24, 8], strides = [1, 1]} : vector<24x96xbf16> to vector<24x8xbf16>
    %170 = vector.extract_strided_slice %111 {offsets = [0, 56], sizes = [24, 8], strides = [1, 1]} : vector<24x96xbf16> to vector<24x8xbf16>
    %171 = vector.extract_strided_slice %111 {offsets = [0, 88], sizes = [24, 8], strides = [1, 1]} : vector<24x96xbf16> to vector<24x8xbf16>
    %cst_57 = arith.constant dense<0.000000e+00> : vector<24x24xf32>
    %172 = tpu.matmul %169, %170, %cst_57 {dimension_numbers = #tpu.dot_dimension_numbers<[1], [1], [0], [0], [0, 0, 1, 0], [], []>} : vector<24x8xbf16>, vector<24x8xbf16>, vector<24x24xf32> -> vector<24x24xf32>
    %c0_58 = arith.constant 0 : index
    %c0_59 = arith.constant 0 : index
    %173 = vector.load %arg5[%c0_58, %c0_59] : memref<1x24xf32, #tpu.memory_space<vmem>>, vector<1x24xf32>
    %174 = vector.broadcast %173 : vector<1x24xf32> to vector<24x24xf32>
    %175 = arith.addf %172, %174 : vector<24x24xf32>
    %cst_60 = arith.constant dense<0xFF800000> : vector<24xf32>
    %176 = vector.multi_reduction <maximumf>, %175, %cst_60 [1] : vector<24x24xf32> to vector<24xf32>
    %177 = vector.shape_cast %176 : vector<24xf32> to vector<24x1xf32>
    %178 = vector.broadcast %177 : vector<24x1xf32> to vector<24x24xf32>
    %179 = arith.subf %175, %178 : vector<24x24xf32>
    %180 = math.exp %179 : vector<24x24xf32>
    %cst_61 = arith.constant dense<0.000000e+00> : vector<24xf32>
    %181 = vector.multi_reduction <add>, %180, %cst_61 [1] : vector<24x24xf32> to vector<24xf32>
    %182 = vector.shape_cast %181 : vector<24xf32> to vector<24x1xf32>
    %183 = tpu.reciprocal %182 : vector<24x1xf32> -> vector<24x1xf32>
    %184 = vector.broadcast %183 : vector<24x1xf32> to vector<24x24xf32>
    %185 = arith.mulf %180, %184 : vector<24x24xf32>
    %186 = arith.truncf %185 : vector<24x24xf32> to vector<24x24xbf16>
    %cst_62 = arith.constant dense<0.000000e+00> : vector<24x8xf32>
    %187 = tpu.matmul %186, %171, %cst_62 {dimension_numbers = #tpu.dot_dimension_numbers<[1], [0], [0], [1], [0, 0, 1, 1], [], []>} : vector<24x24xbf16>, vector<24x8xbf16>, vector<24x8xf32> -> vector<24x8xf32>
    %188 = tpu.concatenate %130, %149, %168, %187 in 1 : vector<24x8xf32>, vector<24x8xf32>, vector<24x8xf32>, vector<24x8xf32> -> vector<24x32xf32>
    %189 = arith.truncf %188 : vector<24x32xf32> to vector<24x32xbf16>
    %c24 = arith.constant 24 : index
    %c0_63 = arith.constant 0 : index
    %190 = vector.load %arg21[%c24, %c0_63] : memref<48x32xbf16, #tpu.memory_space<vmem>>, vector<24x32xbf16>
    tpu.vector_store %arg21[%c24, %c0_63], %189 {strides = array<i32>} : memref<48x32xbf16, #tpu.memory_space<vmem>>, vector<24x32xbf16>,
    %c0_64 = arith.constant 0 : index
    %c0_65 = arith.constant 0 : index
    %191 = vector.load %arg21[%c0_64, %c0_65] : memref<48x32xbf16, #tpu.memory_space<vmem>>, vector<48x32xbf16>
    %c0_66 = arith.constant 0 : index
    %c0_67 = arith.constant 0 : index
    %c0_68 = arith.constant 0 : index
    %192 = vector.load %arg8[%c0_66, %c0_67, %c0_68] : memref<1x32x32xbf16, #tpu.memory_space<vmem>>, vector<1x32x32xbf16>
    %193 = vector.shape_cast %192 : vector<1x32x32xbf16> to vector<32x32xbf16>
    %cst_69 = arith.constant dense<0.000000e+00> : vector<48x32xf32>
    %194 = tpu.matmul %191, %193, %cst_69 {dimension_numbers = #tpu.dot_dimension_numbers<[1], [0], [0], [1], [0, 0, 1, 1], [], []>} : vector<48x32xbf16>, vector<32x32xbf16>, vector<48x32xf32> -> vector<48x32xf32>
    %c0_70 = arith.constant 0 : index
    %c0_71 = arith.constant 0 : index
    %c0_72 = arith.constant 0 : index
    %195 = vector.load %arg9[%c0_70, %c0_71, %c0_72] : memref<1x1x32xf32, #tpu.memory_space<vmem>>, vector<1x1x32xf32>
    %196 = vector.shape_cast %195 : vector<1x1x32xf32> to vector<1x32xf32>
    %197 = vector.broadcast %196 : vector<1x32xf32> to vector<48x32xf32>
    %198 = arith.addf %194, %197 : vector<48x32xf32>
    %199 = arith.addf %3, %198 : vector<48x32xf32>
    %cst_73 = arith.constant dense<0.000000e+00> : vector<48xf32>
    %200 = vector.multi_reduction <add>, %199, %cst_73 [1] : vector<48x32xf32> to vector<48xf32>
    %201 = vector.shape_cast %200 : vector<48xf32> to vector<48x1xf32>
    %cst_74 = arith.constant 3.200000e+01 : f32
    %202 = vector.broadcast %cst_74 : f32 to vector<48x1xf32>
    %203 = arith.divf %201, %202 : vector<48x1xf32>
    %204 = vector.broadcast %203 : vector<48x1xf32> to vector<48x32xf32>
    %205 = arith.subf %199, %204 : vector<48x32xf32>
    %206 = arith.mulf %205, %205 : vector<48x32xf32>
    %cst_75 = arith.constant dense<0.000000e+00> : vector<48xf32>
    %207 = vector.multi_reduction <add>, %206, %cst_75 [1] : vector<48x32xf32> to vector<48xf32>
    %208 = vector.shape_cast %207 : vector<48xf32> to vector<48x1xf32>
    %cst_76 = arith.constant 3.200000e+01 : f32
    %209 = vector.broadcast %cst_76 : f32 to vector<48x1xf32>
    %210 = arith.divf %208, %209 : vector<48x1xf32>
    %211 = vector.broadcast %203 : vector<48x1xf32> to vector<48x32xf32>
    %212 = arith.subf %199, %211 : vector<48x32xf32>
    %cst_77 = arith.constant 9.99999997E-7 : f32
    %213 = vector.broadcast %cst_77 : f32 to vector<48x1xf32>
    %214 = arith.addf %210, %213 : vector<48x1xf32>
    %215 = math.rsqrt %214 : vector<48x1xf32>
    %216 = vector.broadcast %215 : vector<48x1xf32> to vector<48x32xf32>
    %217 = arith.mulf %212, %216 : vector<48x32xf32>
    %218 = arith.truncf %217 : vector<48x32xf32> to vector<48x32xbf16>
    %c0_78 = arith.constant 0 : index
    %c0_79 = arith.constant 0 : index
    %c0_80 = arith.constant 0 : index
    %219 = vector.load %arg10[%c0_78, %c0_79, %c0_80] : memref<1x32x128xbf16, #tpu.memory_space<vmem>>, vector<1x32x128xbf16>
    %220 = vector.shape_cast %219 : vector<1x32x128xbf16> to vector<32x128xbf16>
    %cst_81 = arith.constant dense<0.000000e+00> : vector<48x128xf32>
    %221 = tpu.matmul %218, %220, %cst_81 {dimension_numbers = #tpu.dot_dimension_numbers<[1], [0], [0], [1], [0, 0, 1, 1], [], []>} : vector<48x32xbf16>, vector<32x128xbf16>, vector<48x128xf32> -> vector<48x128xf32>
    %c0_82 = arith.constant 0 : index
    %c0_83 = arith.constant 0 : index
    %c0_84 = arith.constant 0 : index
    %222 = vector.load %arg11[%c0_82, %c0_83, %c0_84] : memref<1x1x128xf32, #tpu.memory_space<vmem>>, vector<1x1x128xf32>
    %223 = vector.shape_cast %222 : vector<1x1x128xf32> to vector<1x128xf32>
    %224 = vector.broadcast %223 : vector<1x128xf32> to vector<48x128xf32>
    %225 = arith.addf %221, %224 : vector<48x128xf32>
    %cst_85 = arith.constant 5.000000e-01 : f32
    %226 = vector.broadcast %cst_85 : f32 to vector<48x128xf32>
    %227 = arith.mulf %226, %225 : vector<48x128xf32>
    %cst_86 = arith.constant 0.707106769 : f32
    %228 = vector.broadcast %cst_86 : f32 to vector<48x128xf32>
    %229 = arith.mulf %225, %228 : vector<48x128xf32>
    %230 = math.erf %229 : vector<48x128xf32>
    %cst_87 = arith.constant 1.000000e+00 : f32
    %231 = vector.broadcast %cst_87 : f32 to vector<48x128xf32>
    %232 = arith.addf %231, %230 : vector<48x128xf32>
    %233 = arith.mulf %227, %232 : vector<48x128xf32>
    %234 = arith.truncf %233 : vector<48x128xf32> to vector<48x128xbf16>
    %c0_88 = arith.constant 0 : index
    %c0_89 = arith.constant 0 : index
    %c0_90 = arith.constant 0 : index
    %235 = vector.load %arg12[%c0_88, %c0_89, %c0_90] : memref<1x128x32xbf16, #tpu.memory_space<vmem>>, vector<1x128x32xbf16>
    %236 = vector.shape_cast %235 : vector<1x128x32xbf16> to vector<128x32xbf16>
    %cst_91 = arith.constant dense<0.000000e+00> : vector<48x32xf32>
    %237 = tpu.matmul %234, %236, %cst_91 {dimension_numbers = #tpu.dot_dimension_numbers<[1], [0], [0], [1], [0, 0, 1, 1], [], []>} : vector<48x128xbf16>, vector<128x32xbf16>, vector<48x32xf32> -> vector<48x32xf32>
    %c0_92 = arith.constant 0 : index
    %c0_93 = arith.constant 0 : index
    %c0_94 = arith.constant 0 : index
    %238 = vector.load %arg13[%c0_92, %c0_93, %c0_94] : memref<1x1x32xf32, #tpu.memory_space<vmem>>, vector<1x1x32xf32>
    %239 = vector.shape_cast %238 : vector<1x1x32xf32> to vector<1x32xf32>
    %240 = vector.broadcast %239 : vector<1x32xf32> to vector<48x32xf32>
    %241 = arith.addf %237, %240 : vector<48x32xf32>
    %242 = arith.addf %199, %241 : vector<48x32xf32>
    %c0_95 = arith.constant 0 : index
    %c0_96 = arith.constant 0 : index
    %243 = vector.load %arg20[%c0_95, %c0_96] : memref<48x32xf32, #tpu.memory_space<vmem>>, vector<48x32xf32>
    tpu.vector_store %arg20[%c0_95, %c0_96], %242 {strides = array<i32>} : memref<48x32xf32, #tpu.memory_space<vmem>>, vector<48x32xf32>,
    %c1_i32 = arith.constant 1 : i32
    %244 = arith.cmpi eq, %arg1, %c1_i32 : i32
    %245 = arith.extui %244 : i1 to i32
    %c0_i32_97 = arith.constant 0 : i32
    %246 = arith.cmpi ne, %245, %c0_i32_97 : i32
    scf.if %246 {
      %c0_98 = arith.constant 0 : index
      %c0_99 = arith.constant 0 : index
      %247 = vector.load %arg14[%c0_98, %c0_99] : memref<1x32xf32, #tpu.memory_space<vmem>>, vector<1x32xf32>
      %c0_100 = arith.constant 0 : index
      %c0_101 = arith.constant 0 : index
      %248 = vector.load %arg15[%c0_100, %c0_101] : memref<1x32xf32, #tpu.memory_space<vmem>>, vector<1x32xf32>
      %cst_102 = arith.constant dense<0.000000e+00> : vector<48xf32>
      %249 = vector.multi_reduction <add>, %242, %cst_102 [1] : vector<48x32xf32> to vector<48xf32>
      %250 = vector.shape_cast %249 : vector<48xf32> to vector<48x1xf32>
      %cst_103 = arith.constant 3.200000e+01 : f32
      %251 = vector.broadcast %cst_103 : f32 to vector<48x1xf32>
      %252 = arith.divf %250, %251 : vector<48x1xf32>
      %253 = vector.broadcast %252 : vector<48x1xf32> to vector<48x32xf32>
      %254 = arith.subf %242, %253 : vector<48x32xf32>
      %255 = arith.mulf %254, %254 : vector<48x32xf32>
      %cst_104 = arith.constant dense<0.000000e+00> : vector<48xf32>
      %256 = vector.multi_reduction <add>, %255, %cst_104 [1] : vector<48x32xf32> to vector<48xf32>
      %257 = vector.shape_cast %256 : vector<48xf32> to vector<48x1xf32>
      %cst_105 = arith.constant 3.200000e+01 : f32
      %258 = vector.broadcast %cst_105 : f32 to vector<48x1xf32>
      %259 = arith.divf %257, %258 : vector<48x1xf32>
      %260 = vector.broadcast %252 : vector<48x1xf32> to vector<48x32xf32>
      %261 = arith.subf %242, %260 : vector<48x32xf32>
      %cst_106 = arith.constant 9.99999997E-7 : f32
      %262 = vector.broadcast %cst_106 : f32 to vector<48x1xf32>
      %263 = arith.addf %259, %262 : vector<48x1xf32>
      %264 = math.rsqrt %263 : vector<48x1xf32>
      %265 = vector.broadcast %264 : vector<48x1xf32> to vector<48x32xf32>
      %266 = arith.mulf %261, %265 : vector<48x32xf32>
      %267 = vector.broadcast %247 : vector<1x32xf32> to vector<48x32xf32>
      %268 = arith.mulf %266, %267 : vector<48x32xf32>
      %269 = vector.broadcast %248 : vector<1x32xf32> to vector<48x32xf32>
      %270 = arith.addf %268, %269 : vector<48x32xf32>
      %c0_107 = arith.constant 0 : index
      %c0_108 = arith.constant 0 : index
      %271 = vector.load %arg19[%c0_107, %c0_108] : memref<48x32xf32, #tpu.memory_space<vmem>>, vector<48x32xf32>
      tpu.vector_store %arg19[%c0_107, %c0_108], %270 {strides = array<i32>} : memref<48x32xf32, #tpu.memory_space<vmem>>, vector<48x32xf32>,
      %272 = vector.extract_strided_slice %270 {offsets = [0, 0], sizes = [1, 32], strides = [1, 1]} : vector<48x32xf32> to vector<1x32xf32>
      %273 = vector.extract_strided_slice %270 {offsets = [24, 0], sizes = [1, 32], strides = [1, 1]} : vector<48x32xf32> to vector<1x32xf32>
      %274 = tpu.concatenate %272, %273 in 0 : vector<1x32xf32>, vector<1x32xf32> -> vector<2x32xf32>
      %275 = arith.truncf %274 : vector<2x32xf32> to vector<2x32xbf16>
      %c0_109 = arith.constant 0 : index
      %c0_110 = arith.constant 0 : index
      %276 = vector.load %arg16[%c0_109, %c0_110] : memref<32x128xbf16, #tpu.memory_space<vmem>>, vector<32x128xbf16>
      %cst_111 = arith.constant dense<0.000000e+00> : vector<2x128xf32>
      %277 = tpu.matmul %275, %276, %cst_111 {dimension_numbers = #tpu.dot_dimension_numbers<[1], [0], [0], [1], [0, 0, 1, 1], [], []>} : vector<2x32xbf16>, vector<32x128xbf16>, vector<2x128xf32> -> vector<2x128xf32>
      %c0_112 = arith.constant 0 : index
      %c0_113 = arith.constant 0 : index
      %278 = vector.load %arg17[%c0_112, %c0_113] : memref<1x128xf32, #tpu.memory_space<vmem>>, vector<1x128xf32>
      %279 = vector.broadcast %278 : vector<1x128xf32> to vector<2x128xf32>
      %280 = arith.addf %277, %279 : vector<2x128xf32>
      %c0_114 = arith.constant 0 : index
      %c0_115 = arith.constant 0 : index
      %c0_116 = arith.constant 0 : index
      %281 = vector.load %arg18[%c0_114, %c0_115, %c0_116] : memref<1x2x128xf32, #tpu.memory_space<vmem>>, vector<1x2x128xf32>
      %282 = vector.shape_cast %281 : vector<1x2x128xf32> to vector<2x128xf32>
      %283 = vector.shape_cast %280 : vector<2x128xf32> to vector<1x2x128xf32>
      tpu.vector_store %arg18[%c0_114, %c0_115, %c0_116], %283 {strides = array<i32>} : memref<1x2x128xf32, #tpu.memory_space<vmem>>, vector<1x2x128xf32>,
    } else {
    }
    return
  }
  func.func @transform_0(%arg0: i32, %arg1: i32) -> (i32, i32) {
    %c0_i32 = arith.constant 0 : i32
    %c0_i32_0 = arith.constant 0 : i32
    return %arg0, %c0_i32 : i32, i32
  }
  func.func @transform_1(%arg0: i32, %arg1: i32) -> (i32, i32) {
    %c0_i32 = arith.constant 0 : i32
    %c0_i32_0 = arith.constant 0 : i32
    %c0_i32_1 = arith.constant 0 : i32
    return %c0_i32, %c0_i32_0 : i32, i32
  }
  func.func @transform_2(%arg0: i32, %arg1: i32) -> (i32, i32) {
    %c0_i32 = arith.constant 0 : i32
    %c0_i32_0 = arith.constant 0 : i32
    %c0_i32_1 = arith.constant 0 : i32
    return %c0_i32, %c0_i32_0 : i32, i32
  }
  func.func @transform_3(%arg0: i32, %arg1: i32) -> (i32, i32) {
    %c0_i32 = arith.constant 0 : i32
    %c0_i32_0 = arith.constant 0 : i32
    %c0_i32_1 = arith.constant 0 : i32
    return %c0_i32, %c0_i32_0 : i32, i32
  }
  func.func @transform_4(%arg0: i32, %arg1: i32) -> (i32, i32, i32) {
    %c0_i32 = arith.constant 0 : i32
    %c0_i32_0 = arith.constant 0 : i32
    %c0_i32_1 = arith.constant 0 : i32
    return %arg1, %c0_i32, %c0_i32_0 : i32, i32, i32
  }
  func.func @transform_5(%arg0: i32, %arg1: i32) -> (i32, i32, i32) {
    %c0_i32 = arith.constant 0 : i32
    %c0_i32_0 = arith.constant 0 : i32
    %c0_i32_1 = arith.constant 0 : i32
    return %arg1, %c0_i32, %c0_i32_0 : i32, i32, i32
  }
  func.func @transform_6(%arg0: i32, %arg1: i32) -> (i32, i32, i32) {
    %c0_i32 = arith.constant 0 : i32
    %c0_i32_0 = arith.constant 0 : i32
    %c0_i32_1 = arith.constant 0 : i32
    return %arg1, %c0_i32, %c0_i32_0 : i32, i32, i32
  }
  func.func @transform_7(%arg0: i32, %arg1: i32) -> (i32, i32, i32) {
    %c0_i32 = arith.constant 0 : i32
    %c0_i32_0 = arith.constant 0 : i32
    %c0_i32_1 = arith.constant 0 : i32
    return %arg1, %c0_i32, %c0_i32_0 : i32, i32, i32
  }
  func.func @transform_8(%arg0: i32, %arg1: i32) -> (i32, i32, i32) {
    %c0_i32 = arith.constant 0 : i32
    %c0_i32_0 = arith.constant 0 : i32
    %c0_i32_1 = arith.constant 0 : i32
    return %arg1, %c0_i32, %c0_i32_0 : i32, i32, i32
  }
  func.func @transform_9(%arg0: i32, %arg1: i32) -> (i32, i32, i32) {
    %c0_i32 = arith.constant 0 : i32
    %c0_i32_0 = arith.constant 0 : i32
    %c0_i32_1 = arith.constant 0 : i32
    return %arg1, %c0_i32, %c0_i32_0 : i32, i32, i32
  }
  func.func @transform_10(%arg0: i32, %arg1: i32) -> (i32, i32, i32) {
    %c0_i32 = arith.constant 0 : i32
    %c0_i32_0 = arith.constant 0 : i32
    %c0_i32_1 = arith.constant 0 : i32
    return %arg1, %c0_i32, %c0_i32_0 : i32, i32, i32
  }
  func.func @transform_11(%arg0: i32, %arg1: i32) -> (i32, i32, i32) {
    %c0_i32 = arith.constant 0 : i32
    %c0_i32_0 = arith.constant 0 : i32
    %c0_i32_1 = arith.constant 0 : i32
    return %arg1, %c0_i32, %c0_i32_0 : i32, i32, i32
  }
  func.func @transform_12(%arg0: i32, %arg1: i32) -> (i32, i32) {
    %c0_i32 = arith.constant 0 : i32
    %c0_i32_0 = arith.constant 0 : i32
    %c0_i32_1 = arith.constant 0 : i32
    return %c0_i32, %c0_i32_0 : i32, i32
  }
  func.func @transform_13(%arg0: i32, %arg1: i32) -> (i32, i32) {
    %c0_i32 = arith.constant 0 : i32
    %c0_i32_0 = arith.constant 0 : i32
    %c0_i32_1 = arith.constant 0 : i32
    return %c0_i32, %c0_i32_0 : i32, i32
  }
  func.func @transform_14(%arg0: i32, %arg1: i32) -> (i32, i32) {
    %c0_i32 = arith.constant 0 : i32
    %c0_i32_0 = arith.constant 0 : i32
    %c0_i32_1 = arith.constant 0 : i32
    return %c0_i32, %c0_i32_0 : i32, i32
  }
  func.func @transform_15(%arg0: i32, %arg1: i32) -> (i32, i32) {
    %c0_i32 = arith.constant 0 : i32
    %c0_i32_0 = arith.constant 0 : i32
    %c0_i32_1 = arith.constant 0 : i32
    return %c0_i32, %c0_i32_0 : i32, i32
  }
  func.func @transform_16(%arg0: i32, %arg1: i32) -> (i32, i32, i32) {
    %c0_i32 = arith.constant 0 : i32
    %c0_i32_0 = arith.constant 0 : i32
    %c0_i32_1 = arith.constant 0 : i32
    return %arg0, %c0_i32, %c0_i32_0 : i32, i32, i32
  }
  func.func @transform_17(%arg0: i32, %arg1: i32) -> (i32, i32) {
    %c0_i32 = arith.constant 0 : i32
    %c0_i32_0 = arith.constant 0 : i32
    return %arg0, %c0_i32 : i32, i32
  }
}

</mosaic_0001>

<bundles_post_ra>
// kernel: vit_teacher_forward.1
= control target key start
LH: loop header
LB: loop body
LE: loop exit
PB: predicated region body
PF: predicated region fallthrough
CT: control target
= control target key end

     0   :  { %s5010_s0 = inlined_call_operand.vmem [shape: bf16[48,48], index: 0, kind: input, shape index: {}]   ;;  %s5011_s1 = inlined_call_operand.vmem [shape: bf16[48,32], index: 1, kind: input, shape index: {}]   ;;  %s5012_s2 = inlined_call_operand.vmem [shape: f32[24,32], index: 2, kind: input, shape index: {}]   ;;  %s5013_s3 = inlined_call_operand.vmem [shape: f32[1,24], index: 3, kind: input, shape index: {}]   ;;  %s5014_s4 = inlined_call_operand.vmem [shape: bf16[2,32,96], index: 4, kind: input, shape index: {}]   ;;  %s5015_s5 = inlined_call_operand.vmem [shape: f32[2,1,96], index: 5, kind: input, shape index: {}]   ;;  %s5016_s6 = inlined_call_operand.vmem [shape: bf16[2,32,32], index: 6, kind: input, shape index: {}]   ;;  %s5017_s7 = inlined_call_operand.vmem [shape: f32[2,1,32], index: 7, kind: input, shape index: {}]   ;;  %s5018_s8 = inlined_call_operand.vmem [shape: bf16[2,32,128], index: 8, kind: input, shape index: {}]   ;;  %s5019_s9 = inlined_call_operand.vmem [shape: f32[2,1,128], index: 9, kind: input, shape index: {}]   ;;  %s5020_s10 = inlined_call_operand.vmem [shape: bf16[2,128,32], index: 10, kind: input, shape index: {}]   ;;  %s5021_s11 = inlined_call_operand.vmem [shape: f32[2,1,32], index: 11, kind: input, shape index: {}]   ;;  %s5022_s12 = inlined_call_operand.vmem [shape: f32[1,32], index: 12, kind: input, shape index: {}]   ;;  %s5023_s13 = inlined_call_operand.vmem [shape: f32[1,32], index: 13, kind: input, shape index: {}]   ;;  %s5024_s14 = inlined_call_operand.vmem [shape: bf16[32,128], index: 14, kind: input, shape index: {}]   ;;  %s5025_s15 = inlined_call_operand.vmem [shape: f32[1,128], index: 15, kind: input, shape index: {}]   ;;  %s5026_s16 = inlined_call_operand.hbm [shape: f32[1,2,128], index: 16, kind: output, shape index: {0}]   ;;  %s5027_s17 = inlined_call_operand.vmem [shape: f32[48,32], index: 17, kind: output, shape index: {1}]  }
   0x1   :  { %5033 = sst [smem:[#allocation10_spill]] %s5010_s0 }
   0x2   :  { %5034 = sst [smem:[#allocation11_spill]] %s5011_s1 }
   0x3   :  { %5035 = sst [smem:[#allocation12_spill]] %s5014_s4 }
   0x4   :  { %5036 = sst [smem:[#allocation13_spill]] %s5016_s6 }
   0x5   :  { %5037 = sst [smem:[#allocation14_spill]] %s5025_s15 }
   0x6   :  { %5038 = sst [smem:[#allocation15_spill]] %s5026_s16 }
   0x7   :  { %5039 = sst [smem:[#allocation16_spill]] %s5027_s17 }
   0x8   :  { %23 = vsyncpa [#allocation5], 0  ;;  %s4214_s24 = smov 0   ;;  %s4216_s25 = smov 0  }
   0x9   :  { %s4218_s26 = smov 0  }
   0xa LB: > { %5040 = sst [smem:[#allocation7_spill]] %s4097_s25  ;;  %s38_s28 = sadd.s32 1, %s4097_s25  ;;  %s4101_s26 = sphi %s4218_s26, %s29_s26   ;;  %s4097_s25 = sphi %s4216_s25, %s5057_s25   ;;  %s4093_s24 = sphi %s4214_s24, %s5056_s24  }
   0xb   : > { %5041 = sst [smem:[#allocation8_spill]] %s4101_s26  ;;  %p39_p0 = scmp.ge.s32.totalorder %s38_s28, 2 }
   0xc   : > { %p3308_p1 = scmp.ge.s32.totalorder %s4101_s26, 1  ;;  %p576_p2 = scmp.lt.s32.totalorder %s4101_s26, 3 }
   0xd   : > { %s5059_s28 = smov (%p39_p0, %s38_s28), 0 }
   0xe   : > { %5042 = sst [smem:[#allocation9_spill]] %s5059_s28  ;;  %p577_p3 = pnand %p3308_p1, %p576_p2 }
   0xf   : > { %p666_p4 = scmp.lt.s32.totalorder (!%p577_p3), %s4093_s24, 1  ;;  %s5043_s4 = sld [smem:[#allocation12_spill]] (!%p577_p3) }
  0x10   : > { %580 = sbr.rel (%p577_p3) target bundleno = 5946 (0x173a), region = 84  ;;  %s5044_s6 = sld [smem:[#allocation13_spill]] (!%p577_p3) }
  0x11   : > { %p3317_p5 = scmp.ne.s32.totalorder (!%p577_p3), %s4093_s24, 0 }
  0x15   : > { %s4237_s29 = scalar_select %p666_p4, %s4093_s24, 1 }
  0x16   : > { %s5045_s28 = sld [smem:[#allocation11_spill]] (!%p3317_p5) }
  0x17   : > { %s3410_s0 = sshll.u32 %s4237_s29, 4  ;;  %s681_s16 = scalar_lea.vmem %s5017_s7, %s4237_s29 }
  0x18   : > { %s4247_s21 = scalar_lea.vmem %s5043_s4, %s3410_s0  ;;  %s4252_s27 = scalar_lea.vmem %s5044_s6, %s3410_s0 }
  0x19   : > { %s4261_s17 = scalar_lea.vmem %s5018_s8, %s3410_s0  ;;  %s689_s1 = scalar_lea.vmem %s5019_s9, %s4237_s29 }
  0x1a   : > { %s3413_s20 = sshll.u32 %s4237_s29, 6  ;;  %708 = sbr.rel (%p3317_p5) target bundleno = 252 (0xfc), region = 88 }
  0x1b   : > { %s4271_s22 = scalar_lea.vmem %s5020_s10, %s3413_s20  ;;  %s5046_s20 = sld [smem:[#allocation10_spill]] (!%p3317_p5) }
  0x1f   : > { %v3830_v0 = vld [vmem:[%s5045_s28 + $0x10] sm:$0xff]   ;;  %v4103_v1 = vmov 0.0   ;;  %v3831_v2 = vld [vmem:[%s5045_s28 + $0x8] sm:$0xff]   ;;  %vm4104_vm0 = vmmov 0   ;;  %v3832_v3 = vld [vmem:[%s5045_s28] sm:$0xff]   ;;  %vm754_vm1 = vcmask 392192  }
  0x20   : > { %3749 = vmatprep.subr.bf16.mxu1 %v4103_v1  ;;  %3519 = vmatprep.subr.bf16.mxu0 %v4103_v1  ;;  %v823_v7 = vld [vmem:[%s5012_s2 + $0x10] sm:$0xff]  ;;  %vm827_vm2 = vcmask 261120   ;;  %v821_v10 = vld [vmem:[%s5012_s2] sm:$0xff]  ;;  %v822_v15 = vld [vmem:[%s5012_s2 + $0x8] sm:$0xff] }
  0x21   : > { %3752 = vmatpush3.bf16.msra.mxu1 %v3830_v0  ;;  %3520 = vmatpush3.bf16.msra.mxu0 %v3830_v0  ;;  %v3833_v4 = vld [vmem:[%s5046_s20 + $0x8] sm:$0xff]   ;;  %v3834_v5 = vld [vmem:[%s5046_s20] sm:$0xff]   ;;  %v3835_v6 = vld [vmem:[%s5046_s20 + $0x10] sm:$0xff]  }
  0x22   : > { %3750 = vmatprep.subr.bf16.mxu1 %v4103_v1  ;;  %3521 = vmatprep.subr.bf16.mxu0 %v4103_v1 }
  0x23   : > { %3529 = vmatprep.mubr.msk.bf16.mxu1 %vm4104_vm0, %v4103_v1  ;;  %3525 = vmatprep.mubr.msk.bf16.mxu0 %vm4104_vm0, %v4103_v1 }
  0x25   : > { %3753 = vmatpush3.bf16.msra.mxu1 %v3831_v2  ;;  %3522 = vmatpush3.bf16.msra.mxu0 %v3831_v2 }
  0x26   : > { %3751 = vmatprep.subr.bf16.mxu1 %v4103_v1  ;;  %3523 = vmatprep.subr.bf16.mxu0 %v4103_v1 }
  0x29   : > { %3754 = vmatpush3.bf16.msra.mxu1 %v3832_v3  ;;  %3524 = vmatpush3.bf16.msra.mxu0 %v3832_v3 }
  0x2c   : > { %3530 = vmatmul.mubr.msk.bf16.vlgmr.msra.gmra.mxu1 %vm754_vm1, %v3833_v4  ;;  %3526 = vmatmul.mubr.msk.bf16.vlgmr.msra.gmra.mxu0 %vm754_vm1, %v3834_v5 }
  0x2d   : > { %3533 = vmatprep.mubr.msk.bf16.mxu1 %vm4104_vm0, %v4103_v1 }
  0x34   : > { %3534 = vmatmul.mubr.msk.bf16.gmra.mxu1 %vm754_vm1, %v3835_v6 }
  0xec   : > { %v806_v8 = vpop.f32.mrf.mxu1  ;;  %v798_v9 = vpop.f32.mrf.mxu0 }
  0xed   : > { %v826_v11 = vadd.f32 %v823_v7, %v806_v8  ;;  %v824_v12 = vadd.f32 %v821_v10, %v798_v9 }
  0xee   : > { %v3531_v13 = vpop.f32.mrf.mxu1  ;;  %v3527_v14 = vpop.f32.mrf.mxu0 }
  0xef   : > { %830 = vst.msk [vmem:[#allocation2 + $0x10] sm:$0xff] %vm827_vm2, %v826_v11  ;;  %828 = vst.msk [vmem:[#allocation2] sm:$0xff] %vm827_vm2, %v824_v12 }
  0xf0   : > { %v809_v16 = vpop.f32.mrf.mxu1  ;;  %v801_v17 = vpop.f32.mrf.mxu0 }
  0xf1   : > { %v834_v18 = vadd.f32 %v821_v10, %v809_v16  ;;  %v825_v19 = vadd.f32 %v822_v15, %v801_v17 }
  0xf2   : > { %v3532_v20 = vpop.f32.mrf.mxu1  ;;  %v3528_v21 = vpop.f32.mrf.mxu0 }
  0xf3   : > { %837 = vst.msk [vmem:[#allocation2 + $0x18] sm:$0xff] %vm827_vm2, %v834_v18  ;;  %829 = vst.msk [vmem:[#allocation2 + $0x8] sm:$0xff] %vm827_vm2, %v825_v19 }
  0xf4   : > { %v814_v22 = vpop.f32.mrf.mxu1 }
  0xf5   : > { %v835_v23 = vadd.f32 %v822_v15, %v814_v22 }
  0xf6   : > { %v3535_v24 = vpop.f32.mrf.mxu1 }
  0xf7   : > { %838 = vst.msk [vmem:[#allocation2 + $0x20] sm:$0xff] %vm827_vm2, %v835_v23 }
  0xf8   : > { %v817_v25 = vpop.f32.mrf.mxu1 }
  0xf9   : > { %v836_v26 = vadd.f32 %v823_v7, %v817_v25 }
  0xfa   : > { %v3536_v27 = vpop.f32.mrf.mxu1 }
  0xfb   : > { %839 = vst.msk [vmem:[#allocation2 + $0x28] sm:$0xff] %vm827_vm2, %v836_v26 }
  0xfc PF: > { %v840_v28 = vld [vmem:[#allocation2] sm:$0xff]  ;;  %vm846_vm3 = vcmask 261120   ;;  %v842_v29 = vld [vmem:[#allocation2 + $0x10] sm:$0xff]  ;;  %v841_v30 = vld [vmem:[#allocation2 + $0x8] sm:$0xff]  ;;  %v4105_v61 = vmov 0.0   ;;  %vm4106_vm4 = vmmov 0   ;;  %s5047_s26 = scalar_lea.vmem %s5015_s5, %s4237_s29 }
  0xfd   : > { %v847_v31 = vsel %vm846_vm3, %v840_v28, 0.0  ;;  %v853_v32 = vsel %vm846_vm3, %v842_v29, 0.0  ;;  %v843_v33 = vld [vmem:[#allocation2 + $0x18] sm:$0xff]  ;;  %v850_v34 = vsel %vm846_vm3, %v841_v30, 0.0  ;;  %v3881_v60 = vld [vmem:[%s4247_s21 + $0x8] sm:$0xff]   ;;  %3537 = vmatprep.subr.bf16.mxu1 %v4105_v61  ;;  %v3882_v62 = vld [vmem:[%s4247_s21] sm:$0xff]   ;;  %3541 = vmatprep.mubr.msk.bf16.mxu1 %vm4106_vm4, %v4105_v61 }
  0xfe   : > { %848 = vadd.xlane.f32.xlu0 %v847_v31  ;;  %854 = vadd.xlane.f32.xlu1 %v853_v32  ;;  %v856_v35 = vsel %vm846_vm3, %v843_v33, 0.0  ;;  %v844_v54 = vld [vmem:[#allocation2 + $0x20] sm:$0xff]  ;;  %vm1034_vm5 = vcmask 64512   ;;  %s4107_s0 = smov 88   ;;  %s4108_s4 = smov 96   ;;  %vm1095_vm6 = vcmask 195584  }
  0xff   : > { %v859_v57 = vsel %vm846_vm3, %v844_v54, 0.0  ;;  %3538 = vmatpush3.bf16.msra.mxu1 %v3881_v60  ;;  %s4109_s6 = smov 120   ;;  %s4110_s19 = smov 80   ;;  %vm1142_vm7 = vcmask 1043456   ;;  %vm1728_vm8 = vcmask 130048   ;;  %vm1748_vm9 = vcmask 257024  }
 0x100   : > { %3539 = vmatprep.subr.bf16.mxu1 %v4105_v61  ;;  %s4111_s30 = smov 112   ;;  %s4112_s21 = smov 64  }
 0x101   : > { %s4113_s15 = smov 56   ;;  %s4115_s18 = smov 72  }
 0x102   : > { %851 = vadd.xlane.f32.xlu0 %v850_v34  ;;  %857 = vadd.xlane.f32.xlu1 %v856_v35  ;;  %v845_v58 = vld [vmem:[#allocation2 + $0x28] sm:$0xff]  ;;  %s4116_s23 = smov 104   ;;  %s4117_s25 = smov 40  }
 0x103   : > { %v862_v59 = vsel %vm846_vm3, %v845_v58, 0.0  ;;  %3540 = vmatpush3.bf16.msra.mxu1 %v3882_v62  ;;  %p3397_p6 = scmp.ne.s32.totalorder %s4093_s24, 1 }
 0x187   : > { %v849_v36 = vpop.xlane.xlu0 %848  ;;  %v855_v37 = vpop.xlane.xlu1 %854 }
 0x188   : > { %v866_v38 = vmul.f32 0.03125, %v849_v36  ;;  %v868_v39 = vmul.f32 0.03125, %v855_v37 }
 0x18a   : > { %v4315_v40 = vsub.f32 %v840_v28, %v866_v38  ;;  %v4317_v41 = vsub.f32 %v842_v29, %v868_v39 }
 0x18b   : > { %v852_v42 = vpop.xlane.xlu0 %851  ;;  %v858_v43 = vpop.xlane.xlu1 %857 }
 0x18c   : > { %v867_v44 = vmul.f32 0.03125, %v852_v42  ;;  %v869_v45 = vmul.f32 0.03125, %v858_v43  ;;  %v878_v46 = vmul.f32 %v4315_v40, %v4315_v40  ;;  %v880_v47 = vmul.f32 %v4317_v41, %v4317_v41  ;;  %v4356_v43 = vld [vmem:[%s5047_s26] ss:$0 sm:$0xff]  ;;  %s4114_s26 = smov 48  }
 0x18e   : > { %v873_v48 = vsub.f32 %v841_v30, %v867_v44  ;;  %v4323_v49 = vsub.f32 %v843_v33, %v869_v45  ;;  %v884_v50 = vsel %vm846_vm3, %v878_v46, 0.0  ;;  %v890_v51 = vsel %vm846_vm3, %v880_v47, 0.0 }
 0x18f   : > { %885 = vadd.xlane.f32.xlu0 %v884_v50 }
 0x190   : > { %v879_v52 = vmul.f32 %v873_v48, %v873_v48  ;;  %v881_v53 = vmul.f32 %v4323_v49, %v4323_v49 }
 0x192   : > { %v887_v55 = vsel %vm846_vm3, %v879_v52, 0.0  ;;  %v893_v56 = vsel %vm846_vm3, %v881_v53, 0.0 }
 0x193   : > { %891 = vadd.xlane.f32.xlu0 %v890_v51  ;;  %888 = vadd.xlane.f32.xlu1 %v887_v55 }
 0x197   : > { %894 = vadd.xlane.f32.xlu1 %v893_v56  ;;  %860 = vadd.xlane.f32.xlu0 %v859_v57 }
 0x19b   : > { %863 = vadd.xlane.f32.xlu1 %v862_v59 }
 0x218   : > { %v886_v63 = vpop.xlane.xlu0 %885 }
 0x219   : > { %v902_v0 = vmul.f32 0.03125, %v886_v63 }
 0x21b   : > { %v908_v1 = vadd.f32 1e-06, %v902_v0 }
 0x21c   : > { %v889_v2 = vpop.xlane.xlu1 %888  ;;  %v892_v3 = vpop.xlane.xlu0 %891 }
 0x21d   : > { %v903_v4 = vmul.f32 0.03125, %v889_v2  ;;  %3898 = vrsqrt.f32 %v908_v1  ;;  %v904_v6 = vmul.f32 0.03125, %v892_v3 }
 0x21f   : > { %v909_v5 = vadd.f32 1e-06, %v903_v4  ;;  %v910_v11 = vadd.f32 1e-06, %v904_v6 }
 0x220   : > { %v895_v7 = vpop.xlane.xlu1 %894  ;;  %v861_v8 = vpop.xlane.xlu0 %860 }
 0x221   : > { %3900 = vrsqrt.f32 %v909_v5  ;;  %v905_v9 = vmul.f32 0.03125, %v895_v7  ;;  %v870_v10 = vmul.f32 0.03125, %v861_v8 }
 0x223   : > { %v911_v12 = vadd.f32 1e-06, %v905_v9  ;;  %v876_v13 = vsub.f32 %v844_v54, %v870_v10 }
 0x224   : > { %v864_v14 = vpop.xlane.xlu1 %863 }
 0x225   : > { %3902 = vrsqrt.f32 %v911_v12  ;;  %v871_v15 = vmul.f32 0.03125, %v864_v14  ;;  %v882_v16 = vmul.f32 %v876_v13, %v876_v13 }
 0x226   : > { %3904 = vrsqrt.f32 %v910_v11 }
 0x227   : > { %v877_v17 = vsub.f32 %v845_v58, %v871_v15  ;;  %v896_v18 = vsel %vm846_vm3, %v882_v16, 0.0 }
 0x228   : > { %897 = vadd.xlane.f32.xlu0 %v896_v18 }
 0x229   : > { %v883_v19 = vmul.f32 %v877_v17, %v877_v17 }
 0x22a   : > { %v3899_v21 = vpop.eup %3898 }
 0x22b   : > { %v899_v20 = vsel %vm846_vm3, %v883_v19, 0.0  ;;  %v920_v23 = vmul.f32 %v3899_v21, %v4315_v40  ;;  %v4417_v19 = vld [vmem:[%s5013_s3] ss:$0 sm:$0xff] }
 0x22c   : > { %900 = vadd.xlane.f32.xlu1 %v899_v20 }
 0x22e   : > { %v3901_v22 = vpop.eup %3900 }
 0x22f   : > { %v921_v24 = vmul.f32 %v3901_v22, %v873_v48 }
 0x231   : > { %v926_v25 = vpack.c.bf16 %v921_v24, %v920_v23 }
 0x232   : > { %v3903_v26 = vpop.eup %3902 }
 0x233   : > { %3542 = vmatmul.mubr.msk.bf16.vlgmr.msra.gmra.mxu1 %vm846_vm3, %v926_v25  ;;  %v3905_v27 = vpop.eup %3904  ;;  %v923_v28 = vmul.f32 %v3903_v26, %v4323_v49 }
 0x234   : > { %3545 = vmatprep.mubr.msk.bf16.mxu1 %vm4106_vm4, %v4105_v61  ;;  %v922_v29 = vmul.f32 %v3905_v27, %v4317_v41 }
 0x236   : > { %v927_v30 = vpack.c.bf16 %v923_v28, %v922_v29 }
 0x23b   : > { %3546 = vmatmul.mubr.msk.bf16.gmra.mxu1 %vm846_vm3, %v927_v30 }
 0x23c   : > { %3549 = vmatprep.mubr.msk.bf16.mxu1 %vm4106_vm4, %v4105_v61 }
 0x2b1   : > { %v898_v31 = vpop.xlane.xlu0 %897 }
 0x2b2   : > { %v906_v32 = vmul.f32 0.03125, %v898_v31 }
 0x2b4   : > { %v912_v33 = vadd.f32 1e-06, %v906_v32 }
 0x2b5   : > { %v901_v34 = vpop.xlane.xlu1 %900 }
 0x2b6   : > { %v907_v35 = vmul.f32 0.03125, %v901_v34  ;;  %3906 = vrsqrt.f32 %v912_v33 }
 0x2b8   : > { %v913_v36 = vadd.f32 1e-06, %v907_v35 }
 0x2ba   : > { %3908 = vrsqrt.f32 %v913_v36 }
 0x2c3   : > { %v3907_v37 = vpop.eup %3906 }
 0x2c4   : > { %v924_v38 = vmul.f32 %v3907_v37, %v876_v13 }
 0x2c7   : > { %v3909_v39 = vpop.eup %3908 }
 0x2c8   : > { %v925_v40 = vmul.f32 %v3909_v39, %v877_v17 }
 0x2ca   : > { %v928_v41 = vpack.c.bf16 %v925_v40, %v924_v38 }
 0x2cc   : > { %3550 = vmatmul.mubr.msk.bf16.gmra.mxu1 %vm846_vm3, %v928_v41 }
 0x2f3   : > { %v995_v42 = vpop.f32.mrf.mxu1 }
 0x2f4   : > { %v996_v46 = vadd.f32 %v4356_v43, %v995_v42 }
 0x2f5   : > { %v3543_v44 = vpop.f32.mrf.mxu1 }
 0x2f7   : > { %v998_v45 = vpop.f32.mrf.mxu1 }
 0x2f8   : > { %v999_v47 = vadd.f32 %v4356_v43, %v998_v45 }
 0x2f9   : > { %v3544_v48 = vpop.f32.mrf.mxu1 }
 0x2fa   : > { %v4360_v49 = vpack.c.bf16 %v999_v47, %v996_v46 }
 0x2fb   : > { %v1003_v50 = vpop.f32.mrf.mxu1 }
 0x2fc   : > { %3557 = vmatprep.mubr.msk.bf16.mxu1 %vm1034_vm5, %v4360_v49  ;;  %v1004_v53 = vadd.f32 %v4356_v43, %v1003_v50 }
 0x2fd   : > { %v3547_v51 = vpop.f32.mrf.mxu1 }
 0x2ff   : > { %v1006_v52 = vpop.f32.mrf.mxu1 }
 0x300   : > { %v1007_v54 = vadd.f32 %v4356_v43, %v1006_v52 }
 0x301   : > { %v3548_v55 = vpop.f32.mrf.mxu1 }
 0x302   : > { %v4366_v56 = vpack.c.bf16 %v1007_v54, %v1004_v53 }
 0x304   : > { %1200 = vrot.lane.b32.xlu1 %v4366_v56, %s4107_s0  ;;  %1032 = vrot.lane.b32.xlu0 %v4366_v56, %s4108_s4 }
 0x308   : > { %1030 = vrot.lane.b32.xlu1 %v4360_v49, %s4108_s4  ;;  %1194 = vrot.lane.b32.xlu0 %v4360_v49, %s4109_s6 }
 0x30c   : > { %1198 = vrot.lane.b32.xlu1 %v4360_v49, %s4107_s0  ;;  %1196 = vrot.lane.b32.xlu0 %v4366_v56, %s4109_s6 }
 0x310   : > { %1365 = vrot.lane.b32.xlu1 %v4366_v56, %s4110_s19  ;;  %1359 = vrot.lane.b32.xlu0 %v4360_v49, %s4111_s30 }
 0x314   : > { %1363 = vrot.lane.b32.xlu1 %v4360_v49, %s4110_s19 }
 0x318   : > { %1361 = vrot.lane.b32.xlu1 %v4366_v56, %s4111_s30 }
 0x376   : > { %v1201_v57 = vpop.permute.xlu1 %1200  ;;  %v1033_v58 = vpop.permute.xlu0 %1032 }
 0x377   : > { %3755 = vmatprep.subr.msk.bf16.mxu1 %vm1034_vm5, %v1033_v58  ;;  %3758 = vmatprep.subr.msk.bf16.mxu0 %vm1034_vm5, %v1201_v57  ;;  %v1045_v59 = vsel %vm1034_vm5, %v1033_v58, 0  ;;  %v1212_v60 = vsel %vm1034_vm5, %v1201_v57, 0 }
 0x378   : > { %3554 = vmatpush3.bf16.xpose.msra.mxu1 %v1045_v59  ;;  %3570 = vmatpush3.bf16.xpose.msra.mxu0 %v1212_v60 }
 0x37a   : > { %v1031_v62 = vpop.permute.xlu1 %1030  ;;  %v1195_v63 = vpop.permute.xlu0 %1194 }
 0x37b   : > { %3756 = vmatprep.subr.msk.bf16.mxu1 %vm1034_vm5, %v1031_v62  ;;  %3573 = vmatprep.mubr.msk.bf16.mxu0 %vm1034_vm5, %v1195_v63  ;;  %v1042_v1 = vsel %vm1034_vm5, %v1031_v62, 0 }
 0x37e   : > { %v1199_v0 = vpop.permute.xlu1 %1198  ;;  %v1197_v3 = vpop.permute.xlu0 %1196 }
 0x37f   : > { %3759 = vmatprep.subr.msk.bf16.mxu0 %vm1034_vm5, %v1199_v0  ;;  %v1209_v2 = vsel %vm1034_vm5, %v1199_v0, 0 }
 0x380   : > { %3556 = vmatpush3.bf16.xpose.msra.mxu1 %v1042_v1  ;;  %3572 = vmatpush3.bf16.xpose.msra.mxu0 %v1209_v2 }
 0x382   : > { %v1366_v4 = vpop.permute.xlu1 %1365  ;;  %v1360_v5 = vpop.permute.xlu0 %1359 }
 0x383   : > { %3761 = vmatprep.subr.msk.bf16.mxu0 %vm1034_vm5, %v1366_v4  ;;  %v1377_v6 = vsel %vm1034_vm5, %v1366_v4, 0 }
 0x386   : > { %v1364_v7 = vpop.permute.xlu1 %1363 }
 0x387   : > { %3558 = vmatmul.mubr.msk.bf16.vlgmr.msra.gmra.mxu1 %vm1034_vm5, %v4366_v56  ;;  %3574 = vmatmul.mubr.msk.bf16.vlgmr.msra.gmra.mxu0 %vm1034_vm5, %v1197_v3  ;;  %v1374_v11 = vsel %vm1034_vm5, %v1364_v7, 0 }
 0x388   : > { %3586 = vmatpush3.bf16.xpose.msra.mxu0 %v1377_v6  ;;  %3589 = vmatprep.mubr.msk.bf16.mxu0 %vm1034_vm5, %v1360_v5 }
 0x389   : > { %3762 = vmatprep.subr.msk.bf16.mxu0 %vm1034_vm5, %v1364_v7 }
 0x38a   : > { %v1362_v16 = vpop.permute.xlu1 %1361 }
 0x38c   : > { %v1011_v8 = vpop.f32.mrf.mxu1 }
 0x38d   : > { %v4405_v10 = vadd.f32 %v4356_v43, %v1011_v8 }
 0x38e   : > { %v3551_v9 = vpop.f32.mrf.mxu1 }
 0x390   : > { %v1014_v12 = vpop.f32.mrf.mxu1  ;;  %3588 = vmatpush3.bf16.xpose.msra.mxu0 %v1374_v11 }
 0x391   : > { %v4409_v13 = vadd.f32 %v4356_v43, %v1014_v12 }
 0x392   : > { %v3552_v14 = vpop.f32.mrf.mxu1 }
 0x393   : > { %v1020_v15 = vpack.c.bf16 %v4409_v13, %v4405_v10 }
 0x397   : > { %3590 = vmatmul.mubr.msk.bf16.vlgmr.msra.gmra.mxu0 %vm1034_vm5, %v1362_v16 }
 0x447   : > { %v3559_v17 = vpop.f32.mrf.mxu1  ;;  %v3575_v18 = vpop.f32.mrf.mxu0 }
 0x448   : > { %v1090_v25 = vadd.f32 %v3559_v17, %v4417_v19  ;;  %v1257_v29 = vadd.f32 %v3575_v18, %v4417_v19 }
 0x449   : > { %v1081_v20 = vpop.f32.mrf.mxu1  ;;  %v1248_v21 = vpop.f32.mrf.mxu0 }
 0x44a   : > { %v1082_v22 = vadd.f32 %v4417_v19, %v1081_v20  ;;  %v1249_v30 = vadd.f32 %v4417_v19, %v1248_v21  ;;  %v1102_v32 = vsel %vm1095_vm6, %v1090_v25, -inf  ;;  %v1268_v35 = vsel %vm1095_vm6, %v1257_v29, -inf }
 0x44b   : > { %v3560_v23 = vpop.f32.mrf.mxu1  ;;  %v3576_v24 = vpop.f32.mrf.mxu0 }
 0x44c   : > { %v1096_v26 = vsel %vm1095_vm6, %v1082_v22, -inf  ;;  %v1262_v36 = vsel %vm1095_vm6, %v1249_v30, -inf }
 0x44d   : > { %v1084_v27 = vpop.f32.mrf.mxu1  ;;  %1097 = vmax.xlane.f32.xlu0 %v1096_v26  ;;  %v1251_v33 = vpop.f32.mrf.mxu0 }
 0x44e   : > { %v1085_v28 = vadd.f32 %v4417_v19, %v1084_v27  ;;  %v1252_v34 = vadd.f32 %v4417_v19, %v1251_v33 }
 0x450   : > { %v1099_v31 = vsel %vm1095_vm6, %v1085_v28, -inf  ;;  %v1265_v38 = vsel %vm1095_vm6, %v1252_v34, -inf }
 0x451   : > { %1100 = vmax.xlane.f32.xlu1 %v1099_v31  ;;  %1103 = vmax.xlane.f32.xlu0 %v1102_v32 }
 0x455   : > { %1269 = vmax.xlane.f32.xlu1 %v1268_v35  ;;  %1263 = vmax.xlane.f32.xlu0 %v1262_v36 }
 0x457   : > { %v3591_v37 = vpop.f32.mrf.mxu0 }
 0x458   : > { %v1422_v42 = vadd.f32 %v3591_v37, %v4417_v19 }
 0x459   : > { %1266 = vmax.xlane.f32.xlu0 %v1265_v38  ;;  %v1413_v39 = vpop.f32.mrf.mxu0 }
 0x45a   : > { %v1414_v40 = vadd.f32 %v4417_v19, %v1413_v39  ;;  %v1433_v47 = vsel %vm1095_vm6, %v1422_v42, -inf }
 0x45b   : > { %v3592_v41 = vpop.f32.mrf.mxu0 }
 0x45c   : > { %v1427_v43 = vsel %vm1095_vm6, %v1414_v40, -inf }
 0x45d   : > { %v1416_v44 = vpop.f32.mrf.mxu0  ;;  %1428 = vmax.xlane.f32.xlu0 %v1427_v43 }
 0x45e   : > { %v4435_v45 = vadd.f32 %v4417_v19, %v1416_v44 }
 0x460   : > { %v1430_v46 = vsel %vm1095_vm6, %v4435_v45, -inf }
 0x461   : > { %1431 = vmax.xlane.f32.xlu1 %v1430_v46  ;;  %1434 = vmax.xlane.f32.xlu0 %v1433_v47 }
 0x472   : > { %1131 = vrot.lane.b32.xlu1 %v4360_v49, %s4112_s21 }
 0x476   : > { %1299 = vrot.lane.b32.xlu1 %v4366_v56, %s4113_s15 }
 0x477   : > { %1133 = vrot.lane.b32.xlu0 %v4366_v56, %s4112_s21 }
 0x47a   : > { %1297 = vrot.lane.b32.xlu1 %v4360_v49, %s4113_s15 }
 0x4d6   : > { %v1098_v48 = vpop.xlane.xlu0 %1097 }
 0x4d7   : > { %v1105_v50 = vsub.f32 %v1082_v22, %v1098_v48 }
 0x4d9   : > { %v1108_v55 = vmul.f32 1.442695, %v1105_v50 }
 0x4da   : > { %v1101_v51 = vpop.xlane.xlu1 %1100  ;;  %v1104_v52 = vpop.xlane.xlu0 %1103 }
 0x4db   : > { %v1107_v53 = vsub.f32 %v1090_v25, %v1104_v52  ;;  %v1106_v62 = vsub.f32 %v1085_v28, %v1101_v51 }
 0x4dd   : > { %v1112_v54 = vmul.f32 1.442695, %v1107_v53  ;;  %v1110_v3 = vmul.f32 1.442695, %v1106_v62 }
 0x4de   : > { %v1270_v57 = vpop.xlane.xlu1 %1269  ;;  %v1264_v58 = vpop.xlane.xlu0 %1263 }
 0x4df   : > { %v1273_v59 = vsub.f32 %v1257_v29, %v1270_v57  ;;  %v1271_v60 = vsub.f32 %v1249_v30, %v1264_v58  ;;  %3910 = vpow2.f32 %v1112_v54 }
 0x4e0   : > { %3912 = vpow2.f32 %v1108_v55 }
 0x4e1   : > { %v1278_v63 = vmul.f32 1.442695, %v1273_v59  ;;  %v1274_v0 = vmul.f32 1.442695, %v1271_v60 }
 0x4e2   : > { %v1267_v1 = vpop.xlane.xlu0 %1266 }
 0x4e3   : > { %3914 = vpow2.f32 %v1278_v63  ;;  %v1272_v2 = vsub.f32 %v1252_v34, %v1267_v1 }
 0x4e4   : > { %3916 = vpow2.f32 %v1274_v0 }
 0x4e5   : > { %v1276_v4 = vmul.f32 1.442695, %v1272_v2 }
 0x4e6   : > { %v1429_v5 = vpop.xlane.xlu0 %1428 }
 0x4e7   : > { %3918 = vpow2.f32 %v1276_v4  ;;  %v1436_v6 = vsub.f32 %v1414_v40, %v1429_v5 }
 0x4e8   : > { %3920 = vpow2.f32 %v1110_v3 }
 0x4e9   : > { %v1439_v14 = vmul.f32 1.442695, %v1436_v6 }
 0x4ea   : > { %v1432_v7 = vpop.xlane.xlu1 %1431  ;;  %v1435_v8 = vpop.xlane.xlu0 %1434 }
 0x4eb   : > { %v1438_v9 = vsub.f32 %v1422_v42, %v1435_v8  ;;  %v1437_v36 = vsub.f32 %v4435_v45, %v1432_v7 }
 0x4ec   : > { %v4448_v11 = vpop.eup %3910 }
 0x4ed   : > { %v1443_v12 = vmul.f32 1.442695, %v1438_v9  ;;  %v1120_v17 = vsel %vm1095_vm6, %v4448_v11, 0.0  ;;  %v4452_v20 = vpop.eup %3912  ;;  %v1441_v37 = vmul.f32 1.442695, %v1437_v36 }
 0x4ee   : > { %v1132_v16 = vpop.permute.xlu1 %1131  ;;  %v1134_v18 = vpop.permute.xlu0 %1133  ;;  %1121 = vadd.xlane.f32.xlu1 %v1120_v17  ;;  %v1114_v25 = vsel %vm1095_vm6, %v4452_v20, 0.0 }
 0x4ef   : > { %v1144_v21 = vsel %vm1142_vm7, %v1134_v18, 0  ;;  %3757 = vmatprep.subr.msk.bf16.mxu1 %vm1142_vm7, %v1134_v18  ;;  %3922 = vpow2.f32 %v1443_v12 }
 0x4f0   : > { %v4456_v22 = vpop.eup %3914  ;;  %3562 = vmatpush3.bf16.msra.mxu1 %v1144_v21  ;;  %3924 = vpow2.f32 %v1439_v14 }
 0x4f1   : > { %3563 = vmatprep.subr.bf16.mxu1 %v1132_v16  ;;  %v1286_v23 = vsel %vm1095_vm6, %v4456_v22, 0.0  ;;  %v3917_v24 = vpop.eup %3916  ;;  %3926 = vpow2.f32 %v1441_v37 }
 0x4f2   : > { %1287 = vadd.xlane.f32.xlu0 %v1286_v23  ;;  %1115 = vadd.xlane.f32.xlu1 %v1114_v25  ;;  %v1300_v27 = vpop.permute.xlu1 %1299  ;;  %v1280_v28 = vsel %vm1095_vm6, %v3917_v24, 0.0 }
 0x4f3   : > { %v1309_v1 = vsel %vm1142_vm7, %v1300_v27, 0 }
 0x4f4   : > { %v3919_v26 = vpop.eup %3918  ;;  %3564 = vmatpush3.bf16.msra.mxu1 %v1132_v16 }
 0x4f5   : > { %3760 = vmatprep.subr.msk.bf16.mxu1 %vm1142_vm7, %v1300_v27  ;;  %v1283_v29 = vsel %vm1095_vm6, %v3919_v26, 0.0  ;;  %v3921_v30 = vpop.eup %3920 }
 0x4f6   : > { %1281 = vadd.xlane.f32.xlu0 %v1280_v28  ;;  %1284 = vadd.xlane.f32.xlu1 %v1283_v29  ;;  %v1117_v31 = vsel %vm1095_vm6, %v3921_v30, 0.0  ;;  %v1298_v40 = vpop.permute.xlu1 %1297 }
 0x4fa   : > { %1118 = vadd.xlane.f32.xlu0 %v1117_v31 }
 0x4fc   : > { %v4466_v32 = vpop.eup %3922 }
 0x4fd   : > { %v1451_v33 = vsel %vm1095_vm6, %v4466_v32, 0.0  ;;  %v4470_v34 = vpop.eup %3924 }
 0x4fe   : > { %1452 = vadd.xlane.f32.xlu1 %v1451_v33  ;;  %v1445_v35 = vsel %vm1095_vm6, %v4470_v34, 0.0  ;;  %v3927_v38 = vpop.eup %3926 }
 0x4ff   : > { %v1448_v39 = vsel %vm1095_vm6, %v3927_v38, 0.0 }
 0x502   : > { %1446 = vadd.xlane.f32.xlu1 %v1445_v35 }
 0x510   : > { %1464 = vrot.lane.b32.xlu0 %v4366_v56, %s4114_s26 }
 0x513   : > { %1462 = vrot.lane.b32.xlu1 %v4360_v49, %s4114_s26 }
 0x517   : > { %1528 = vrot.lane.b32.xlu1 %v4360_v49, %s4115_s18 }
 0x51b   : > { %1526 = vrot.lane.b32.xlu1 %v4366_v56, %s4116_s23 }
 0x52f   : > { %1449 = vadd.xlane.f32.xlu0 %v1448_v39 }
 0x545   : > { %1530 = vrot.lane.b32.xlu0 %v4366_v56, %s4115_s18 }
 0x549   : > { %1524 = vrot.lane.b32.xlu0 %v4360_v49, %s4116_s23 }
 0x577   : > { %v1122_v41 = vpop.xlane.xlu1 %1121 }
 0x578   : > { %3928 = vrcp.f32 %v1122_v41 }
 0x57b   : > { %v1288_v42 = vpop.xlane.xlu0 %1287  ;;  %v1116_v43 = vpop.xlane.xlu1 %1115 }
 0x57c   : > { %3930 = vrcp.f32 %v1116_v43 }
 0x57f   : > { %v1282_v44 = vpop.xlane.xlu0 %1281  ;;  %v1285_v45 = vpop.xlane.xlu1 %1284 }
 0x580   : > { %3932 = vrcp.f32 %v1282_v44 }
 0x581   : > { %3934 = vrcp.f32 %v1285_v45 }
 0x583   : > { %v1119_v46 = vpop.xlane.xlu0 %1118 }
 0x584   : > { %3936 = vrcp.f32 %v1119_v46 }
 0x585   : > { %3938 = vrcp.f32 %v1288_v42  ;;  %v3929_v47 = vpop.eup %3928 }
 0x586   : > { %v1128_v53 = vmul.f32 %v3929_v47, %v4448_v11 }
 0x587   : > { %v1453_v59 = vpop.xlane.xlu1 %1452  ;;  %v1465_v4 = vpop.permute.xlu0 %1464 }
 0x588   : > { %v1130_v62 = vpack.c.bf16 %v1128_v53, %v1128_v53  ;;  %v1474_v6 = vsel %vm1142_vm7, %v1465_v4, 0  ;;  %3940 = vrcp.f32 %v1453_v59 }
 0x589   : > { %v3931_v48 = vpop.eup %3930 }
 0x58a   : > { %v1126_v54 = vmul.f32 %v3931_v48, %v4452_v20 }
 0x58b   : > { %v1447_v3 = vpop.xlane.xlu1 %1446 }
 0x58c   : > { %3942 = vrcp.f32 %v1447_v3 }
 0x58d   : > { %v3933_v50 = vpop.eup %3932 }
 0x58e   : > { %v3935_v51 = vpop.eup %3934  ;;  %v1292_v57 = vmul.f32 %v3933_v50, %v3917_v24 }
 0x58f   : > { %v1293_v58 = vmul.f32 %v3935_v51, %v3919_v26  ;;  %v1463_v7 = vpop.permute.xlu1 %1462 }
 0x591   : > { %v3937_v52 = vpop.eup %3936  ;;  %v1295_v0 = vpack.c.bf16 %v1293_v58, %v1292_v57 }
 0x592   : > { %v1127_v55 = vmul.f32 %v3937_v52, %v3921_v30  ;;  %v3939_v63 = vpop.eup %3938 }
 0x593   : > { %v1294_v2 = vmul.f32 %v3939_v63, %v4456_v22  ;;  %v1529_v24 = vpop.permute.xlu1 %1528 }
 0x594   : > { %v1129_v60 = vpack.c.bf16 %v1127_v55, %v1126_v54  ;;  %v1539_v25 = vsel %vm1034_vm5, %v1529_v24, 0 }
 0x595   : > { %v1296_v5 = vpack.c.bf16 %v1294_v2, %v1294_v2  ;;  %v3941_v11 = vpop.eup %3940 }
 0x596   : > { %3565 = vmatprep.mubr.msk.bf16.mxu1 %vm1095_vm6, %v1129_v60  ;;  %v1459_v16 = vmul.f32 %v3941_v11, %v4466_v32 }
 0x597   : > { %3566 = vmatmul.mubr.msk.bf16.vlgmr.msra.gmra.mxu1 %vm1095_vm6, %v1130_v62  ;;  %v1527_v26 = vpop.permute.xlu1 %1526 }
 0x598   : > { %3578 = vmatpush3.bf16.msra.mxu1 %v1309_v1  ;;  %3581 = vmatprep.mubr.msk.bf16.mxu1 %vm1095_vm6, %v1295_v0  ;;  %v1461_v21 = vpack.c.bf16 %v1459_v16, %v1459_v16 }
 0x599   : > { %3579 = vmatprep.subr.bf16.mxu1 %v1298_v40  ;;  %v3943_v12 = vpop.eup %3942 }
 0x59a   : > { %v1457_v17 = vmul.f32 %v3943_v12, %v4470_v34 }
 0x59c   : > { %3580 = vmatpush3.bf16.msra.mxu1 %v1298_v40 }
 0x59d   : > { %3763 = vmatprep.subr.msk.bf16.mxu1 %vm1142_vm7, %v1465_v4 }
 0x59f   : > { %3582 = vmatmul.mubr.msk.bf16.vlgmr.msra.gmra.mxu1 %vm1095_vm6, %v1296_v5  ;;  %v4544_v5 = vrot.slane %v1020_v15, 4 }
 0x5a0   : > { %3594 = vmatpush3.bf16.msra.mxu1 %v1474_v6  ;;  %v1761_v6 = vrot.slane %v4366_v56, 4 }
 0x5a1   : > { %3595 = vmatprep.subr.bf16.mxu1 %v1463_v7 }
 0x5a4   : > { %3596 = vmatpush3.bf16.msra.mxu1 %v1463_v7  ;;  %v4553_v7 = vsel %vm1142_vm7, %v1761_v6, %v4544_v5 }
 0x5b8   : > { %v1450_v8 = vpop.xlane.xlu0 %1449 }
 0x5b9   : > { %3944 = vrcp.f32 %v1450_v8 }
 0x5bc   : > { %v1531_v9 = vpop.permute.xlu0 %1530 }
 0x5bd   : > { %3764 = vmatprep.subr.msk.bf16.mxu1 %vm1034_vm5, %v1531_v9  ;;  %v1542_v22 = vsel %vm1034_vm5, %v1531_v9, 0 }
 0x5c0   : > { %v1525_v23 = vpop.permute.xlu0 %1524 }
 0x5c6   : > { %v3945_v14 = vpop.eup %3944 }
 0x5c7   : > { %v1458_v18 = vmul.f32 %v3945_v14, %v3927_v38 }
 0x5c9   : > { %v1460_v20 = vpack.c.bf16 %v1458_v18, %v1457_v17 }
 0x5cb   : > { %3597 = vmatprep.mubr.msk.bf16.mxu1 %vm1095_vm6, %v1460_v20 }
 0x5cc   : > { %3598 = vmatmul.mubr.msk.bf16.vlgmr.msra.gmra.mxu1 %vm1095_vm6, %v1461_v21 }
 0x5cd   : > { %3602 = vmatpush3.bf16.xpose.msra.mxu1 %v1542_v22  ;;  %3605 = vmatprep.mubr.msk.bf16.mxu1 %vm1034_vm5, %v1525_v23 }
 0x5ce   : > { %3765 = vmatprep.subr.msk.bf16.mxu1 %vm1034_vm5, %v1529_v24 }
 0x5d5   : > { %3604 = vmatpush3.bf16.xpose.msra.mxu1 %v1539_v25 }
 0x5dc   : > { %3606 = vmatmul.mubr.msk.bf16.vlgmr.msra.gmra.mxu1 %vm1034_vm5, %v1527_v26 }
 0x657   : > { %v4508_v27 = vpop.f32.mrf.mxu1 }
 0x659   : > { %v4510_v28 = vpop.f32.mrf.mxu1 }
 0x65b   : > { %v3568_v29 = vpop.f32.mrf.mxu1 }
 0x65d   : > { %v4512_v30 = vpop.f32.mrf.mxu1 }
 0x65f   : > { %v4514_v31 = vpop.f32.mrf.mxu1 }
 0x661   : > { %v4516_v32 = vpop.f32.mrf.mxu1 }
 0x663   : > { %v3584_v33 = vpop.f32.mrf.mxu1 }
 0x665   : > { %v4518_v34 = vpop.f32.mrf.mxu1 }
 0x666   : > { %v3836_v35 = vpack.i.bf16 %v4518_v34, %v4516_v32 }
 0x68c   : > { %v4522_v36 = vpop.f32.mrf.mxu1 }
 0x68e   : > { %v4524_v37 = vpop.f32.mrf.mxu1 }
 0x690   : > { %v3600_v38 = vpop.f32.mrf.mxu1 }
 0x692   : > { %v4526_v39 = vpop.f32.mrf.mxu1 }
 0x693   : > { %v3841_v40 = vpack.i.bf16 %v4526_v39, %v4524_v37 }
 0x69c   : > { %v3607_v41 = vpop.f32.mrf.mxu1 }
 0x69d   : > { %v1587_v45 = vadd.f32 %v3607_v41, %v4417_v19 }
 0x69e   : > { %v1578_v42 = vpop.f32.mrf.mxu1 }
 0x69f   : > { %v1579_v43 = vadd.f32 %v4417_v19, %v1578_v42  ;;  %v1598_v51 = vsel %vm1095_vm6, %v1587_v45, -inf }
 0x6a0   : > { %v3608_v44 = vpop.f32.mrf.mxu1 }
 0x6a1   : > { %v1592_v46 = vsel %vm1095_vm6, %v1579_v43, -inf }
 0x6a2   : > { %v1581_v47 = vpop.f32.mrf.mxu1  ;;  %1593 = vmax.xlane.f32.xlu0 %v1592_v46 }
 0x6a3   : > { %v1582_v48 = vadd.f32 %v4417_v19, %v1581_v47 }
 0x6a5   : > { %v1595_v50 = vsel %vm1095_vm6, %v1582_v48, -inf }
 0x6a6   : > { %1596 = vmax.xlane.f32.xlu1 %v1595_v50  ;;  %1599 = vmax.xlane.f32.xlu0 %v1598_v51 }
 0x72b   : > { %v1594_v52 = vpop.xlane.xlu0 %1593 }
 0x72c   : > { %v1601_v53 = vsub.f32 %v1579_v43, %v1594_v52 }
 0x72e   : > { %v1604_v54 = vmul.f32 1.442695, %v1601_v53 }
 0x72f   : > { %v1597_v55 = vpop.xlane.xlu1 %1596  ;;  %v1600_v57 = vpop.xlane.xlu0 %1599 }
 0x730   : > { %3946 = vpow2.f32 %v1604_v54  ;;  %v1602_v58 = vsub.f32 %v1582_v48, %v1597_v55  ;;  %v1603_v59 = vsub.f32 %v1587_v45, %v1600_v57 }
 0x732   : > { %v1606_v60 = vmul.f32 1.442695, %v1602_v58  ;;  %v1608_v62 = vmul.f32 1.442695, %v1603_v59 }
 0x734   : > { %3948 = vpow2.f32 %v1606_v60 }
 0x735   : > { %3950 = vpow2.f32 %v1608_v62 }
 0x73d   : > { %v3947_v63 = vpop.eup %3946 }
 0x73e   : > { %v1610_v0 = vsel %vm1095_vm6, %v3947_v63, 0.0 }
 0x73f   : > { %1611 = vadd.xlane.f32.xlu0 %v1610_v0 }
 0x741   : > { %v3949_v1 = vpop.eup %3948 }
 0x742   : > { %v3951_v2 = vpop.eup %3950  ;;  %v1613_v3 = vsel %vm1095_vm6, %v3949_v1, 0.0 }
 0x743   : > { %1614 = vadd.xlane.f32.xlu0 %v1613_v3  ;;  %v1616_v4 = vsel %vm1095_vm6, %v3951_v2, 0.0 }
 0x744   : > { %1617 = vadd.xlane.f32.xlu1 %v1616_v4 }
 0x755   : > { %1627 = vrot.lane.b32.xlu1 %v4360_v49, %s4117_s25 }
 0x759   : > { %1766 = vrot.lane.b32.xlu1 %v4544_v5, %s4108_s4  ;;  %1629 = vrot.lane.b32.xlu0 %v4366_v56, %s4117_s25 }
 0x75d   : > { %1764 = vrot.lane.b32.xlu1 %v4553_v7, %s4108_s4 }
 0x7c8   : > { %v1612_v49 = vpop.xlane.xlu0 %1611 }
 0x7c9   : > { %3952 = vrcp.f32 %v1612_v49 }
 0x7cc   : > { %v1615_v10 = vpop.xlane.xlu0 %1614 }
 0x7cd   : > { %v1618_v13 = vpop.xlane.xlu1 %1617  ;;  %3954 = vrcp.f32 %v1615_v10 }
 0x7ce   : > { %3956 = vrcp.f32 %v1618_v13 }
 0x7d0   : > { %v1630_v15 = vpop.permute.xlu0 %1629 }
 0x7d1   : > { %v1628_v8 = vpop.permute.xlu1 %1627  ;;  %v1639_v9 = vsel %vm1142_vm7, %v1630_v15, 0  ;;  %3766 = vmatprep.subr.msk.bf16.mxu0 %vm1142_vm7, %v1630_v15 }
 0x7d2   : > { %3610 = vmatpush3.bf16.msra.mxu0 %v1639_v9 }
 0x7d3   : > { %3611 = vmatprep.subr.bf16.mxu0 %v1628_v8 }
 0x7d5   : > { %v1767_v56 = vpop.permute.xlu1 %1766 }
 0x7d6   : > { %3612 = vmatpush3.bf16.msra.mxu0 %v1628_v8  ;;  %v3953_v11 = vpop.eup %3952  ;;  %v1778_v22 = vsel %vm1034_vm5, %v1767_v56, 0 }
 0x7d7   : > { %3767 = vmatprep.subr.msk.bf16.mxu0 %vm1034_vm5, %v1767_v56  ;;  %v1622_v16 = vmul.f32 %v3953_v11, %v3947_v63 }
 0x7d9   : > { %v1765_v23 = vpop.permute.xlu1 %1764 }
 0x7da   : > { %v3955_v12 = vpop.eup %3954  ;;  %v1775_v24 = vsel %vm1034_vm5, %v1765_v23, 0 }
 0x7db   : > { %v3957_v14 = vpop.eup %3956  ;;  %v1623_v17 = vmul.f32 %v3955_v12, %v3949_v1 }
 0x7dc   : > { %v1624_v18 = vmul.f32 %v3957_v14, %v3951_v2 }
 0x7dd   : > { %v1625_v20 = vpack.c.bf16 %v1623_v17, %v1622_v16 }
 0x7de   : > { %v1626_v21 = vpack.c.bf16 %v1624_v18, %v1624_v18 }
 0x7df   : > { %3613 = vmatprep.mubr.msk.bf16.mxu0 %vm1095_vm6, %v1625_v20 }
 0x7e0   : > { %3614 = vmatmul.mubr.msk.bf16.vlgmr.msra.gmra.mxu0 %vm1095_vm6, %v1626_v21 }
 0x7e1   : > { %3618 = vmatpush3.bf16.xpose.msra.mxu0 %v1778_v22  ;;  %3621 = vmatprep.mubr.msk.bf16.mxu0 %vm1034_vm5, %v4553_v7 }
 0x7e2   : > { %3768 = vmatprep.subr.msk.bf16.mxu0 %vm1034_vm5, %v1765_v23 }
 0x7e9   : > { %3620 = vmatpush3.bf16.xpose.msra.mxu0 %v1775_v24 }
 0x7f0   : > { %3622 = vmatmul.mubr.msk.bf16.vlgmr.msra.gmra.mxu0 %vm1034_vm5, %v4544_v5 }
 0x8a0   : > { %v4569_v25 = vpop.f32.mrf.mxu0 }
 0x8a2   : > { %v4571_v26 = vpop.f32.mrf.mxu0 }
 0x8a4   : > { %v3616_v29 = vpop.f32.mrf.mxu0 }
 0x8a6   : > { %v4573_v33 = vpop.f32.mrf.mxu0 }
 0x8a7   : > { %v3846_v38 = vpack.i.bf16 %v4573_v33, %v4571_v26 }
 0x8b0   : > { %v3623_v41 = vpop.f32.mrf.mxu0 }
 0x8b1   : > { %v1823_v45 = vadd.f32 %v3623_v41, %v4417_v19 }
 0x8b2   : > { %v1814_v42 = vpop.f32.mrf.mxu0 }
 0x8b3   : > { %v1815_v43 = vadd.f32 %v4417_v19, %v1814_v42  ;;  %v1834_v51 = vsel %vm1095_vm6, %v1823_v45, -inf }
 0x8b4   : > { %v3624_v44 = vpop.f32.mrf.mxu0 }
 0x8b5   : > { %v1828_v46 = vsel %vm1095_vm6, %v1815_v43, -inf }
 0x8b6   : > { %v1817_v47 = vpop.f32.mrf.mxu0  ;;  %1829 = vmax.xlane.f32.xlu0 %v1828_v46 }
 0x8b7   : > { %v1818_v48 = vadd.f32 %v4417_v19, %v1817_v47 }
 0x8b9   : > { %v1831_v50 = vsel %vm1095_vm6, %v1818_v48, -inf }
 0x8ba   : > { %1832 = vmax.xlane.f32.xlu1 %v1831_v50  ;;  %1835 = vmax.xlane.f32.xlu0 %v1834_v51 }
 0x93f   : > { %v1830_v52 = vpop.xlane.xlu0 %1829 }
 0x940   : > { %v1837_v53 = vsub.f32 %v1815_v43, %v1830_v52 }
 0x942   : > { %v1840_v54 = vmul.f32 1.442695, %v1837_v53 }
 0x943   : > { %v1833_v55 = vpop.xlane.xlu1 %1832  ;;  %v1836_v57 = vpop.xlane.xlu0 %1835 }
 0x944   : > { %3958 = vpow2.f32 %v1840_v54  ;;  %v1838_v58 = vsub.f32 %v1818_v48, %v1833_v55  ;;  %v1839_v59 = vsub.f32 %v1823_v45, %v1836_v57 }
 0x946   : > { %v1842_v60 = vmul.f32 1.442695, %v1838_v58  ;;  %v1844_v62 = vmul.f32 1.442695, %v1839_v59 }
 0x948   : > { %3960 = vpow2.f32 %v1842_v60 }
 0x949   : > { %3962 = vpow2.f32 %v1844_v62 }
 0x951   : > { %v3959_v63 = vpop.eup %3958 }
 0x952   : > { %v1846_v0 = vsel %vm1095_vm6, %v3959_v63, 0.0 }
 0x953   : > { %1847 = vadd.xlane.f32.xlu0 %v1846_v0 }
 0x955   : > { %v3961_v1 = vpop.eup %3960 }
 0x956   : > { %v3963_v2 = vpop.eup %3962  ;;  %v1849_v3 = vsel %vm1095_vm6, %v3961_v1, 0.0 }
 0x957   : > { %1850 = vadd.xlane.f32.xlu0 %v1849_v3  ;;  %v1852_v4 = vsel %vm1095_vm6, %v3963_v2, 0.0 }
 0x958   : > { %1853 = vadd.xlane.f32.xlu1 %v1852_v4 }
 0x969   : > { %1863 = vrot.lane.b32.xlu1 %v4553_v7, %s4112_s21 }
 0x96d   : > { %1931 = vrot.lane.b32.xlu1 %v4544_v5, %s4107_s0  ;;  %1865 = vrot.lane.b32.xlu0 %v4544_v5, %s4112_s21  ;;  %s5048_s21 = scalar_lea.vmem %s5021_s11, %s4237_s29 }
 0x971   : > { %1929 = vrot.lane.b32.xlu1 %v4553_v7, %s4107_s0  ;;  %1925 = vrot.lane.b32.xlu0 %v4553_v7, %s4109_s6 }
 0x975   : > { %1927 = vrot.lane.b32.xlu1 %v4544_v5, %s4109_s6  ;;  %s4118_s6 = smov 8  }
 0x9dc   : > { %v1848_v6 = vpop.xlane.xlu0 %1847 }
 0x9dd   : > { %3964 = vrcp.f32 %v1848_v6 }
 0x9e0   : > { %v1851_v49 = vpop.xlane.xlu0 %1850 }
 0x9e1   : > { %v1854_v10 = vpop.xlane.xlu1 %1853  ;;  %3966 = vrcp.f32 %v1851_v49 }
 0x9e2   : > { %3968 = vrcp.f32 %v1854_v10 }
 0x9e4   : > { %v1866_v13 = vpop.permute.xlu0 %1865 }
 0x9e5   : > { %v1864_v15 = vpop.permute.xlu1 %1863  ;;  %v1875_v8 = vsel %vm1142_vm7, %v1866_v13, 0  ;;  %3769 = vmatprep.subr.msk.bf16.mxu1 %vm1142_vm7, %v1866_v13 }
 0x9e6   : > { %3626 = vmatpush3.bf16.msra.mxu1 %v1875_v8 }
 0x9e7   : > { %3627 = vmatprep.subr.bf16.mxu1 %v1864_v15 }
 0x9e8   : > { %v1926_v22 = vpop.permute.xlu0 %1925 }
 0x9e9   : > { %v1932_v9 = vpop.permute.xlu1 %1931 }
 0x9ea   : > { %3628 = vmatpush3.bf16.msra.mxu1 %v1864_v15  ;;  %v3965_v56 = vpop.eup %3964  ;;  %v1943_v21 = vsel %vm1034_vm5, %v1932_v9, 0 }
 0x9eb   : > { %3770 = vmatprep.subr.msk.bf16.mxu1 %vm1034_vm5, %v1932_v9  ;;  %v1858_v14 = vmul.f32 %v3965_v56, %v3959_v63 }
 0x9ed   : > { %v1930_v23 = vpop.permute.xlu1 %1929 }
 0x9ee   : > { %v3967_v11 = vpop.eup %3966  ;;  %v1940_v24 = vsel %vm1034_vm5, %v1930_v23, 0 }
 0x9ef   : > { %v3969_v12 = vpop.eup %3968  ;;  %v1859_v16 = vmul.f32 %v3967_v11, %v3961_v1 }
 0x9f0   : > { %v1860_v17 = vmul.f32 %v3969_v12, %v3963_v2 }
 0x9f1   : > { %v1861_v18 = vpack.c.bf16 %v1859_v16, %v1858_v14  ;;  %v1928_v29 = vpop.permute.xlu1 %1927 }
 0x9f2   : > { %v1862_v20 = vpack.c.bf16 %v1860_v17, %v1860_v17 }
 0x9f3   : > { %3629 = vmatprep.mubr.msk.bf16.mxu1 %vm1095_vm6, %v1861_v18 }
 0x9f4   : > { %3630 = vmatmul.mubr.msk.bf16.vlgmr.msra.gmra.mxu1 %vm1095_vm6, %v1862_v20 }
 0x9f5   : > { %3634 = vmatpush3.bf16.xpose.msra.mxu1 %v1943_v21  ;;  %3637 = vmatprep.mubr.msk.bf16.mxu1 %vm1034_vm5, %v1926_v22 }
 0x9f6   : > { %3771 = vmatprep.subr.msk.bf16.mxu1 %vm1034_vm5, %v1930_v23 }
 0x9fd   : > { %3636 = vmatpush3.bf16.xpose.msra.mxu1 %v1940_v24 }
 0xa04   : > { %3638 = vmatmul.mubr.msk.bf16.vlgmr.msra.gmra.mxu1 %vm1034_vm5, %v1928_v29 }
 0xab4   : > { %v4608_v41 = vpop.f32.mrf.mxu1 }
 0xab6   : > { %v4610_v42 = vpop.f32.mrf.mxu1 }
 0xab8   : > { %v3632_v43 = vpop.f32.mrf.mxu1 }
 0xaba   : > { %v4612_v44 = vpop.f32.mrf.mxu1 }
 0xac4   : > { %v3639_v45 = vpop.f32.mrf.mxu1 }
 0xac5   : > { %v1988_v50 = vadd.f32 %v3639_v45, %v4417_v19 }
 0xac6   : > { %v1979_v46 = vpop.f32.mrf.mxu1 }
 0xac7   : > { %v1980_v47 = vadd.f32 %v4417_v19, %v1979_v46  ;;  %v1999_v55 = vsel %vm1095_vm6, %v1988_v50, -inf }
 0xac8   : > { %v3640_v48 = vpop.f32.mrf.mxu1 }
 0xac9   : > { %v1993_v51 = vsel %vm1095_vm6, %v1980_v47, -inf }
 0xaca   : > { %v1982_v52 = vpop.f32.mrf.mxu1  ;;  %1994 = vmax.xlane.f32.xlu0 %v1993_v51 }
 0xacb   : > { %v1983_v53 = vadd.f32 %v4417_v19, %v1982_v52 }
 0xacd   : > { %v1996_v54 = vsel %vm1095_vm6, %v1983_v53, -inf }
 0xace   : > { %1997 = vmax.xlane.f32.xlu1 %v1996_v54  ;;  %2000 = vmax.xlane.f32.xlu0 %v1999_v55 }
 0xb53   : > { %v1995_v57 = vpop.xlane.xlu0 %1994 }
 0xb54   : > { %v2002_v58 = vsub.f32 %v1980_v47, %v1995_v57 }
 0xb56   : > { %v2005_v59 = vmul.f32 1.442695, %v2002_v58 }
 0xb57   : > { %v1998_v60 = vpop.xlane.xlu1 %1997  ;;  %v2001_v62 = vpop.xlane.xlu0 %2000 }
 0xb58   : > { %3970 = vpow2.f32 %v2005_v59  ;;  %v2003_v63 = vsub.f32 %v1983_v53, %v1998_v60  ;;  %v2004_v0 = vsub.f32 %v1988_v50, %v2001_v62 }
 0xb5a   : > { %v2007_v1 = vmul.f32 1.442695, %v2003_v63  ;;  %v2009_v2 = vmul.f32 1.442695, %v2004_v0 }
 0xb5c   : > { %3972 = vpow2.f32 %v2007_v1 }
 0xb5d   : > { %3974 = vpow2.f32 %v2009_v2 }
 0xb65   : > { %v3971_v3 = vpop.eup %3970 }
 0xb66   : > { %v2011_v4 = vsel %vm1095_vm6, %v3971_v3, 0.0 }
 0xb67   : > { %2012 = vadd.xlane.f32.xlu0 %v2011_v4 }
 0xb69   : > { %v3973_v6 = vpop.eup %3972 }
 0xb6a   : > { %v3975_v49 = vpop.eup %3974  ;;  %v2014_v10 = vsel %vm1095_vm6, %v3973_v6, 0.0 }
 0xb6b   : > { %2015 = vadd.xlane.f32.xlu0 %v2014_v10  ;;  %v2017_v13 = vsel %vm1095_vm6, %v3975_v49, 0.0 }
 0xb6c   : > { %2018 = vadd.xlane.f32.xlu1 %v2017_v13 }
 0xb7d   : > { %2028 = vrot.lane.b32.xlu1 %v4553_v7, %s4113_s15 }
 0xb81   : > { %2096 = vrot.lane.b32.xlu1 %v4544_v5, %s4110_s19  ;;  %2030 = vrot.lane.b32.xlu0 %v4544_v5, %s4113_s15 }
 0xb85   : > { %2094 = vrot.lane.b32.xlu1 %v4553_v7, %s4110_s19  ;;  %2090 = vrot.lane.b32.xlu0 %v4553_v7, %s4111_s30  ;;  %s4119_s19 = smov 16  }
 0xb89   : > { %2092 = vrot.lane.b32.xlu1 %v4544_v5, %s4111_s30  ;;  %s4120_s30 = smov 24  }
 0xbf0   : > { %v2013_v15 = vpop.xlane.xlu0 %2012 }
 0xbf1   : > { %3976 = vrcp.f32 %v2013_v15 }
 0xbf4   : > { %v2016_v8 = vpop.xlane.xlu0 %2015 }
 0xbf5   : > { %v2019_v9 = vpop.xlane.xlu1 %2018  ;;  %3978 = vrcp.f32 %v2016_v8 }
 0xbf6   : > { %3980 = vrcp.f32 %v2019_v9 }
 0xbf8   : > { %v2031_v56 = vpop.permute.xlu0 %2030 }
 0xbf9   : > { %v2029_v11 = vpop.permute.xlu1 %2028  ;;  %v2040_v12 = vsel %vm1142_vm7, %v2031_v56, 0  ;;  %3772 = vmatprep.subr.msk.bf16.mxu0 %vm1142_vm7, %v2031_v56 }
 0xbfa   : > { %3642 = vmatpush3.bf16.msra.mxu0 %v2040_v12 }
 0xbfb   : > { %3643 = vmatprep.subr.bf16.mxu0 %v2029_v11 }
 0xbfc   : > { %v2091_v43 = vpop.permute.xlu0 %2090 }
 0xbfd   : > { %v2097_v14 = vpop.permute.xlu1 %2096 }
 0xbfe   : > { %3644 = vmatpush3.bf16.msra.mxu0 %v2029_v11  ;;  %v3977_v16 = vpop.eup %3976  ;;  %v2108_v29 = vsel %vm1034_vm5, %v2097_v14, 0 }
 0xbff   : > { %3773 = vmatprep.subr.msk.bf16.mxu0 %vm1034_vm5, %v2097_v14  ;;  %v2023_v20 = vmul.f32 %v3977_v16, %v3971_v3 }
 0xc01   : > { %v2095_v45 = vpop.permute.xlu1 %2094 }
 0xc02   : > { %v3979_v17 = vpop.eup %3978  ;;  %v2105_v46 = vsel %vm1034_vm5, %v2095_v45, 0 }
 0xc03   : > { %v3981_v18 = vpop.eup %3980  ;;  %v2024_v21 = vmul.f32 %v3979_v17, %v3973_v6 }
 0xc04   : > { %v2025_v22 = vmul.f32 %v3981_v18, %v3975_v49 }
 0xc05   : > { %v2026_v23 = vpack.c.bf16 %v2024_v21, %v2023_v20  ;;  %v2093_v47 = vpop.permute.xlu1 %2092 }
 0xc06   : > { %v2027_v24 = vpack.c.bf16 %v2025_v22, %v2025_v22 }
 0xc07   : > { %3645 = vmatprep.mubr.msk.bf16.mxu0 %vm1095_vm6, %v2026_v23 }
 0xc08   : > { %3646 = vmatmul.mubr.msk.bf16.vlgmr.msra.gmra.mxu0 %vm1095_vm6, %v2027_v24 }
 0xc09   : > { %3650 = vmatpush3.bf16.xpose.msra.mxu0 %v2108_v29  ;;  %3653 = vmatprep.mubr.msk.bf16.mxu0 %vm1034_vm5, %v2091_v43 }
 0xc0a   : > { %3774 = vmatprep.subr.msk.bf16.mxu0 %vm1034_vm5, %v2095_v45 }
 0xc11   : > { %3652 = vmatpush3.bf16.xpose.msra.mxu0 %v2105_v46 }
 0xc18   : > { %3654 = vmatmul.mubr.msk.bf16.vlgmr.msra.gmra.mxu0 %vm1034_vm5, %v2093_v47 }
 0xcc8   : > { %v4645_v48 = vpop.f32.mrf.mxu0 }
 0xcca   : > { %v4647_v50 = vpop.f32.mrf.mxu0 }
 0xccc   : > { %v3648_v51 = vpop.f32.mrf.mxu0 }
 0xcce   : > { %v4649_v52 = vpop.f32.mrf.mxu0 }
 0xccf   : > { %v3866_v53 = vpack.i.bf16 %v4645_v48, %v4649_v52 }
 0xcd8   : > { %v3655_v54 = vpop.f32.mrf.mxu0 }
 0xcd9   : > { %v2153_v59 = vadd.f32 %v3655_v54, %v4417_v19 }
 0xcda   : > { %v2144_v55 = vpop.f32.mrf.mxu0 }
 0xcdb   : > { %v2145_v57 = vadd.f32 %v4417_v19, %v2144_v55  ;;  %v2164_v1 = vsel %vm1095_vm6, %v2153_v59, -inf }
 0xcdc   : > { %v3656_v58 = vpop.f32.mrf.mxu0 }
 0xcdd   : > { %v2158_v60 = vsel %vm1095_vm6, %v2145_v57, -inf }
 0xcde   : > { %v2147_v62 = vpop.f32.mrf.mxu0  ;;  %2159 = vmax.xlane.f32.xlu0 %v2158_v60 }
 0xcdf   : > { %v2148_v63 = vadd.f32 %v4417_v19, %v2147_v62 }
 0xce1   : > { %v2161_v0 = vsel %vm1095_vm6, %v2148_v63, -inf }
 0xce2   : > { %2162 = vmax.xlane.f32.xlu1 %v2161_v0  ;;  %2165 = vmax.xlane.f32.xlu0 %v2164_v1 }
 0xd67   : > { %v2160_v2 = vpop.xlane.xlu0 %2159 }
 0xd68   : > { %v2167_v3 = vsub.f32 %v2145_v57, %v2160_v2 }
 0xd6a   : > { %v2170_v4 = vmul.f32 1.442695, %v2167_v3 }
 0xd6b   : > { %v2163_v6 = vpop.xlane.xlu1 %2162  ;;  %v2166_v49 = vpop.xlane.xlu0 %2165 }
 0xd6c   : > { %3982 = vpow2.f32 %v2170_v4  ;;  %v2168_v10 = vsub.f32 %v2148_v63, %v2163_v6  ;;  %v2169_v13 = vsub.f32 %v2153_v59, %v2166_v49  ;;  %v4030_v6 = vld [vmem:[%s5013_s3] ss:$0 sm:$0xff] }
 0xd6e   : > { %v2172_v15 = vmul.f32 1.442695, %v2168_v10  ;;  %v2174_v8 = vmul.f32 1.442695, %v2169_v13 }
 0xd70   : > { %3984 = vpow2.f32 %v2172_v15 }
 0xd71   : > { %3986 = vpow2.f32 %v2174_v8 }
 0xd79   : > { %v3983_v9 = vpop.eup %3982 }
 0xd7a   : > { %v2176_v19 = vsel %vm1095_vm6, %v3983_v9, 0.0 }
 0xd7b   : > { %2177 = vadd.xlane.f32.xlu0 %v2176_v19 }
 0xd7d   : > { %v3985_v56 = vpop.eup %3984 }
 0xd7e   : > { %v3987_v11 = vpop.eup %3986  ;;  %v2179_v12 = vsel %vm1095_vm6, %v3985_v56, 0.0 }
 0xd7f   : > { %2180 = vadd.xlane.f32.xlu0 %v2179_v12  ;;  %v2182_v14 = vsel %vm1095_vm6, %v3987_v11, 0.0 }
 0xd80   : > { %2183 = vadd.xlane.f32.xlu1 %v2182_v14 }
 0xd91   : > { %2193 = vrot.lane.b32.xlu1 %v4553_v7, %s4114_s26 }
 0xd95   : > { %2261 = vrot.lane.b32.xlu1 %v4544_v5, %s4115_s18  ;;  %2195 = vrot.lane.b32.xlu0 %v4544_v5, %s4114_s26 }
 0xd99   : > { %2259 = vrot.lane.b32.xlu1 %v4553_v7, %s4115_s18  ;;  %2255 = vrot.lane.b32.xlu0 %v4553_v7, %s4116_s23 }
 0xd9d   : > { %2257 = vrot.lane.b32.xlu1 %v4544_v5, %s4116_s23  ;;  %s5050_s23 = sld [smem:[#allocation14_spill]] (!%p3397_p6) }
 0xe04   : > { %v2178_v16 = vpop.xlane.xlu0 %2177 }
 0xe05   : > { %3988 = vrcp.f32 %v2178_v16 }
 0xe08   : > { %v2181_v17 = vpop.xlane.xlu0 %2180 }
 0xe09   : > { %v2184_v18 = vpop.xlane.xlu1 %2183  ;;  %3990 = vrcp.f32 %v2181_v17 }
 0xe0a   : > { %3992 = vrcp.f32 %v2184_v18 }
 0xe0c   : > { %v2196_v20 = vpop.permute.xlu0 %2195 }
 0xe0d   : > { %v2194_v21 = vpop.permute.xlu1 %2193  ;;  %v2205_v22 = vsel %vm1142_vm7, %v2196_v20, 0  ;;  %3775 = vmatprep.subr.msk.bf16.mxu1 %vm1142_vm7, %v2196_v20 }
 0xe0e   : > { %3658 = vmatpush3.bf16.msra.mxu1 %v2205_v22 }
 0xe0f   : > { %3659 = vmatprep.subr.bf16.mxu1 %v2194_v21 }
 0xe10   : > { %v2256_v57 = vpop.permute.xlu0 %2255 }
 0xe11   : > { %v2262_v23 = vpop.permute.xlu1 %2261 }
 0xe12   : > { %3660 = vmatpush3.bf16.msra.mxu1 %v2194_v21  ;;  %v3989_v24 = vpop.eup %3988  ;;  %v2273_v55 = vsel %vm1034_vm5, %v2262_v23, 0 }
 0xe13   : > { %3776 = vmatprep.subr.msk.bf16.mxu1 %vm1034_vm5, %v2262_v23  ;;  %v2188_v45 = vmul.f32 %v3989_v24, %v3983_v9 }
 0xe15   : > { %v2260_v58 = vpop.permute.xlu1 %2259 }
 0xe16   : > { %v3991_v29 = vpop.eup %3990  ;;  %v2270_v59 = vsel %vm1034_vm5, %v2260_v58, 0 }
 0xe17   : > { %v3993_v43 = vpop.eup %3992  ;;  %v2189_v46 = vmul.f32 %v3991_v29, %v3985_v56 }
 0xe18   : > { %v2190_v47 = vmul.f32 %v3993_v43, %v3987_v11 }
 0xe19   : > { %v2191_v51 = vpack.c.bf16 %v2189_v46, %v2188_v45  ;;  %v2258_v60 = vpop.permute.xlu1 %2257 }
 0xe1a   : > { %v2192_v54 = vpack.c.bf16 %v2190_v47, %v2190_v47 }
 0xe1b   : > { %3661 = vmatprep.mubr.msk.bf16.mxu1 %vm1095_vm6, %v2191_v51 }
 0xe1c   : > { %3662 = vmatmul.mubr.msk.bf16.vlgmr.msra.gmra.mxu1 %vm1095_vm6, %v2192_v54 }
 0xe1d   : > { %3666 = vmatpush3.bf16.xpose.msra.mxu1 %v2273_v55  ;;  %3669 = vmatprep.mubr.msk.bf16.mxu1 %vm1034_vm5, %v2256_v57 }
 0xe1e   : > { %3777 = vmatprep.subr.msk.bf16.mxu1 %vm1034_vm5, %v2260_v58 }
 0xe25   : > { %3668 = vmatpush3.bf16.xpose.msra.mxu1 %v2270_v59 }
 0xe26   : > { %3697 = vmatprep.subr.bf16.mxu1 %v4105_v61 }
 0xe2c   : > { %3670 = vmatmul.mubr.msk.bf16.vlgmr.msra.gmra.mxu1 %vm1034_vm5, %v2258_v60 }
 0xe2d   : > { %3701 = vmatprep.mubr.msk.bf16.mxu1 %vm4106_vm4, %v4105_v61 }
 0xedc   : > { %v4687_v62 = vpop.f32.mrf.mxu1 }
 0xede   : > { %v2241_v63 = vpop.f32.mrf.mxu1 }
 0xedf   : > { %v3856_v32 = vpack.i.bf16 %v2241_v63, %v4522_v36 }
 0xee0   : > { %v3664_v0 = vpop.f32.mrf.mxu1 }
 0xee2   : > { %v4689_v1 = vpop.f32.mrf.mxu1 }
 0xee3   : > { %v3871_v2 = vpack.i.bf16 %v4687_v62, %v4689_v1  ;;  %v4032_v1 = vld [vmem:[#allocation2] sm:$0xff] }
 0xeec   : > { %v3671_v3 = vpop.f32.mrf.mxu1 }
 0xeed   : > { %v2318_v13 = vadd.f32 %v4030_v6, %v3671_v3 }
 0xeee   : > { %v2309_v4 = vpop.f32.mrf.mxu1 }
 0xeef   : > { %v2310_v49 = vadd.f32 %v4030_v6, %v2309_v4  ;;  %v2329_v56 = vsel %vm1095_vm6, %v2318_v13, -inf }
 0xef0   : > { %v3672_v10 = vpop.f32.mrf.mxu1 }
 0xef1   : > { %v2323_v15 = vsel %vm1095_vm6, %v2310_v49, -inf }
 0xef2   : > { %v2312_v8 = vpop.f32.mrf.mxu1  ;;  %2324 = vmax.xlane.f32.xlu0 %v2323_v15 }
 0xef3   : > { %v2313_v9 = vadd.f32 %v4030_v6, %v2312_v8 }
 0xef5   : > { %v2326_v19 = vsel %vm1095_vm6, %v2313_v9, -inf }
 0xef6   : > { %2327 = vmax.xlane.f32.xlu1 %v2326_v19  ;;  %2330 = vmax.xlane.f32.xlu0 %v2329_v56 }
 0xf7b   : > { %v2325_v11 = vpop.xlane.xlu0 %2324 }
 0xf7c   : > { %v2332_v12 = vsub.f32 %v2310_v49, %v2325_v11 }
 0xf7e   : > { %v2335_v14 = vmul.f32 1.442695, %v2332_v12 }
 0xf7f   : > { %v2328_v16 = vpop.xlane.xlu1 %2327  ;;  %v2331_v17 = vpop.xlane.xlu0 %2330 }
 0xf80   : > { %3994 = vpow2.f32 %v2335_v14  ;;  %v2333_v18 = vsub.f32 %v2313_v9, %v2328_v16  ;;  %v2334_v20 = vsub.f32 %v2318_v13, %v2331_v17  ;;  %v3883_v13 = vld [vmem:[%s4252_s27 + $0x8] sm:$0xff]  }
 0xf82   : > { %v2337_v21 = vmul.f32 1.442695, %v2333_v18  ;;  %v2339_v22 = vmul.f32 1.442695, %v2334_v20 }
 0xf84   : > { %3996 = vpow2.f32 %v2337_v21  ;;  %v4031_v21 = vld [vmem:[#allocation2 + $0x8] sm:$0xff] }
 0xf85   : > { %3998 = vpow2.f32 %v2339_v22 }
 0xf8d   : > { %v3995_v23 = vpop.eup %3994 }
 0xf8e   : > { %v2341_v24 = vsel %vm1095_vm6, %v3995_v23, 0.0 }
 0xf8f   : > { %2342 = vadd.xlane.f32.xlu0 %v2341_v24 }
 0xf91   : > { %v3997_v29 = vpop.eup %3996 }
 0xf92   : > { %v3999_v43 = vpop.eup %3998  ;;  %v2344_v45 = vsel %vm1095_vm6, %v3997_v29, 0.0 }
 0xf93   : > { %2345 = vadd.xlane.f32.xlu0 %v2344_v45  ;;  %v2347_v46 = vsel %vm1095_vm6, %v3999_v43, 0.0 }
 0xf94   : > { %2348 = vadd.xlane.f32.xlu1 %v2347_v46 }
 0xfa5   : > { %2358 = vrot.lane.b32.xlu1 %v4553_v7, %s4117_s25  ;;  %v3851_v7 = vpack.i.bf16 %v4647_v50, %v4514_v31 }
 0xfa9   : > { %3837 = vrot.lane.b32.xlu1 %v3836_v35, %s4118_s6  ;;  %2360 = vrot.lane.b32.xlu0 %v4544_v5, %s4117_s25 }
 0xfad   : > { %3842 = vrot.lane.b32.xlu1 %v3841_v40, %s4119_s19  ;;  %3847 = vrot.lane.b32.xlu0 %v3846_v38, %s4120_s30 }
 0xfb1   : > { %3852 = vrot.lane.b32.xlu1 %v3851_v7, %s4118_s6  ;;  %3857 = vrot.lane.b32.xlu0 %v3856_v32, %s4119_s19 }
 0xfb5   : > { %3867 = vrot.lane.b32.xlu0 %v3866_v53, %s4118_s6 }
0x1018   : > { %v2343_v34 = vpop.xlane.xlu0 %2342 }
0x1019   : > { %4000 = vrcp.f32 %v2343_v34 }
0x101c   : > { %v2346_v35 = vpop.xlane.xlu0 %2345 }
0x101d   : > { %v2349_v37 = vpop.xlane.xlu1 %2348  ;;  %4002 = vrcp.f32 %v2346_v35 }
0x101e   : > { %4004 = vrcp.f32 %v2349_v37 }
0x1020   : > { %v2361_v39 = vpop.permute.xlu0 %2360 }
0x1021   : > { %v2359_v40 = vpop.permute.xlu1 %2358  ;;  %v2370_v5 = vsel %vm1142_vm7, %v2361_v39, 0  ;;  %3778 = vmatprep.subr.msk.bf16.mxu0 %vm1142_vm7, %v2361_v39 }
0x1022   : > { %3674 = vmatpush3.bf16.msra.mxu0 %v2370_v5 }
0x1023   : > { %3675 = vmatprep.subr.bf16.mxu0 %v2359_v40 }
0x1024   : > { %v3848_v33 = vpop.permute.xlu0 %3847 }
0x1025   : > { %v3838_v31 = vpop.permute.xlu1 %3837  ;;  %v3850_v52 = vunpack.i.h.bf16 %v3848_v33  ;;  %v3849_v57 = vunpack.i.l.bf16 %v3848_v33 }
0x1026   : > { %3676 = vmatpush3.bf16.msra.mxu0 %v2359_v40  ;;  %v3840_v36 = vunpack.i.h.bf16 %v3838_v31  ;;  %v3839_v26 = vunpack.i.l.bf16 %v3838_v31  ;;  %v4001_v38 = vpop.eup %4000 }
0x1027   : > { %3681 = vmatprep.subr.bf16.mxu0 %v4105_v61  ;;  %v2353_v4 = vmul.f32 %v4001_v38, %v3995_v23 }
0x1028   : > { %v1726_v54 = vsel %vm1034_vm5, %v4512_v30, %v3840_v36  ;;  %v1725_v55 = vsel %vm1034_vm5, %v4510_v28, %v3839_v26  ;;  %v3884_v28 = vld [vmem:[%s4252_s27] sm:$0xff]  }
0x1029   : > { %v3843_v48 = vpop.permute.xlu1 %3842 }
0x102a   : > { %v4003_v50 = vpop.eup %4002  ;;  %v3845_v53 = vunpack.i.h.bf16 %v3843_v48  ;;  %v3844_v47 = vunpack.i.l.bf16 %v3843_v48 }
0x102b   : > { %v4005_v51 = vpop.eup %4004  ;;  %v2354_v58 = vmul.f32 %v4003_v50, %v3997_v29 }
0x102c   : > { %v1729_v59 = vsel %vm1728_vm8, %v1725_v55, %v3844_v47  ;;  %v1730_v60 = vsel %vm1728_vm8, %v1726_v54, %v3845_v53  ;;  %v2355_v63 = vmul.f32 %v4005_v51, %v3999_v43  ;;  %v3858_v43 = vpop.permute.xlu0 %3857 }
0x102d   : > { %v1732_v0 = vsel %vm1095_vm6, %v1729_v59, %v3849_v57  ;;  %v1733_v3 = vsel %vm1095_vm6, %v1730_v60, %v3850_v52  ;;  %v2356_v30 = vpack.c.bf16 %v2354_v58, %v2353_v4  ;;  %v3853_v29 = vpop.permute.xlu1 %3852  ;;  %v3860_v35 = vunpack.i.h.bf16 %v3858_v43 }
0x102e   : > { %v3414_v6 = vpack.c.bf16 %v1732_v0, %v1732_v0  ;;  %v3415_v49 = vpack.c.bf16 %v1733_v3, %v1733_v3  ;;  %v2357_v10 = vpack.c.bf16 %v2355_v63, %v2355_v63  ;;  %v3855_v45 = vunpack.i.h.bf16 %v3853_v29 }
0x102f   : > { %3677 = vmatprep.mubr.msk.bf16.mxu0 %vm1095_vm6, %v2356_v30  ;;  %v3854_v46 = vunpack.i.l.bf16 %v3853_v29  ;;  %v3859_v37 = vunpack.i.l.bf16 %v3858_v43 }
0x1030   : > { %1749 = vst.msk [vmem:[#allocation3] sm:$0xf] %vm1748_vm9, %v3414_v6  ;;  %1750 = vst.msk [vmem:[#allocation3 + $0x4] sm:$0xf] %vm1748_vm9, %v3415_v49  ;;  %3678 = vmatmul.mubr.msk.bf16.vlgmr.msra.gmra.mxu0 %vm1095_vm6, %v2357_v10  ;;  %v2456_v7 = vsel %vm1034_vm5, %v4610_v42, %v3855_v45  ;;  %v3868_v34 = vpop.permute.xlu0 %3867  ;;  %v4033_v10 = vld [vmem:[#allocation2 + $0x10] sm:$0xff] }
0x1031   : > { %3682 = vmatpush3.bf16.msra.mxu0 %v3883_v13  ;;  %3685 = vmatprep.mubr.msk.bf16.mxu0 %vm4106_vm4, %v4105_v61  ;;  %v1727_v32 = vsel %vm1034_vm5, %v4508_v27, %v3854_v46  ;;  %v3870_v31 = vunpack.i.h.bf16 %v3868_v34  ;;  %v3869_v36 = vunpack.i.l.bf16 %v3868_v34  ;;  %v2459_v33 = vsel %vm1728_vm8, %v2456_v7, %v3860_v35  ;;  %v4036_v7 = vld [vmem:[#allocation2 + $0x28] sm:$0xff] }
0x1032   : > { %3683 = vmatprep.subr.bf16.mxu0 %v4105_v61  ;;  %v1731_v26 = vsel %vm1728_vm8, %v1727_v32, %v3859_v37 }
0x1033   : > { %v2458_v55 = vsel %vm1034_vm5, %v4608_v41, %v3870_v31  ;;  %v2457_v57 = vsel %vm1034_vm5, %v4612_v44, %v3869_v36 }
0x1035   : > { %3684 = vmatpush3.bf16.msra.mxu0 %v3884_v28 }
0x1036   : > { %3713 = vmatprep.subr.bf16.mxu0 %v4105_v61 }
0x1037   : > { %v3885_v15 = vld [vmem:[#allocation3] sm:$0xff]  }
0x1038   : > { %3686 = vmatmul.mubr.msk.bf16.vlgmr.msra.gmra.mxu0 %vm846_vm3, %v3885_v15 }
0x1039   : > { %3689 = vmatprep.mubr.msk.bf16.mxu0 %vm4106_vm4, %v4105_v61 }
0x10f0   : > { %v3679_v8 = vpop.f32.mrf.mxu0 }
0x10f2   : > { %v2406_v9 = vpop.f32.mrf.mxu0 }
0x10f3   : > { %v3861_v19 = vpack.i.bf16 %v2406_v9, %v4569_v25  ;;  %v4760_v25 = vld [vmem:[%s681_s16] ss:$0 sm:$0xff] }
0x10f4   : > { %v3680_v56 = vpop.f32.mrf.mxu0 }
0x10f5   : > { %3862 = vrot.lane.b32.xlu1 %v3861_v19, %s4120_s30 }
0x10f6   : > { %v2409_v11 = vpop.f32.mrf.mxu0 }
0x10f7   : > { %v3876_v12 = vpack.i.bf16 %v3679_v8, %v2409_v11  ;;  %v4034_v11 = vld [vmem:[#allocation2 + $0x18] sm:$0xff] }
0x10f8   : > { %v2568_v14 = vpop.f32.mrf.mxu0 }
0x10f9   : > { %3872 = vrot.lane.b32.xlu1 %v3871_v2, %s4119_s19  ;;  %3877 = vrot.lane.b32.xlu0 %v3876_v12, %s4120_s30  ;;  %v2569_v23 = vadd.f32 %v4760_v25, %v2568_v14  ;;  %s5049_s30 = sld [smem:[#allocation16_spill]] (!%p3397_p6) }
0x10fa   : > { %v3687_v16 = vpop.f32.mrf.mxu0 }
0x10fb   : > { %v4768_v2 = vadd.f32 %v4032_v1, %v2569_v23  ;;  %v4035_v23 = vld [vmem:[#allocation2 + $0x20] sm:$0xff] }
0x10fc   : > { %v2571_v17 = vpop.f32.mrf.mxu0 }
0x10fd   : > { %v2572_v20 = vadd.f32 %v4760_v25, %v2571_v17  ;;  %v2597_v24 = vsel %vm846_vm3, %v4768_v2, 0.0 }
0x10fe   : > { %v3688_v18 = vpop.f32.mrf.mxu0 }
0x10ff   : > { %v4763_v22 = vadd.f32 %v4031_v21, %v2572_v20 }
0x1101   : > { %v2600_v62 = vsel %vm846_vm3, %v4763_v22, 0.0 }
0x1118   : > { %2601 = vadd.xlane.f32.xlu0 %v2600_v62 }
0x111d   : > { %2598 = vadd.xlane.f32.xlu1 %v2597_v24 }
0x1167   : > { %v3863_v39 = vpop.permute.xlu1 %3862 }
0x1168   : > { %v3865_v40 = vunpack.i.h.bf16 %v3863_v39  ;;  %v3864_v5 = vunpack.i.l.bf16 %v3863_v39  ;;  %v3888_v39 = vld [vmem:[%s4261_s17 + $0x8] sm:$0xff]  }
0x1169   : > { %3698 = vmatpush3.bf16.msra.mxu1 %v3888_v39 }
0x116a   : > { %v1734_v38 = vsel %vm1095_vm6, %v1731_v26, %v3864_v5  ;;  %v2462_v48 = vsel %vm1095_vm6, %v2459_v33, %v3865_v40  ;;  %v3889_v40 = vld [vmem:[%s4261_s17] sm:$0xff]   ;;  %3699 = vmatprep.subr.bf16.mxu1 %v4105_v61 }
0x116b   : > { %v3416_v42 = vpack.c.bf16 %v1734_v38, %v1734_v38  ;;  %v3417_v50 = vpack.c.bf16 %v2462_v48, %v2462_v48  ;;  %v3873_v52 = vpop.permute.xlu1 %3872  ;;  %v3878_v27 = vpop.permute.xlu0 %3877 }
0x116c   : > { %v3875_v53 = vunpack.i.h.bf16 %v3873_v52  ;;  %v3874_v47 = vunpack.i.l.bf16 %v3873_v52  ;;  %v3880_v51 = vunpack.i.h.bf16 %v3878_v27  ;;  %v3879_v54 = vunpack.i.l.bf16 %v3878_v27 }
0x116d   : > { %1751 = vst.msk [vmem:[#allocation3 + $0x8] sm:$0xf] %vm1748_vm9, %v3416_v42  ;;  %2478 = vst.msk [vmem:[#allocation3 + $0xc] sm:$0xf] %vm1748_vm9, %v3417_v50  ;;  %3700 = vmatpush3.bf16.msra.mxu1 %v3889_v40 }
0x116e   : > { %v2460_v58 = vsel %vm1728_vm8, %v2457_v57, %v3874_v47  ;;  %v2461_v59 = vsel %vm1728_vm8, %v2458_v55, %v3875_v53 }
0x116f   : > { %v2463_v60 = vsel %vm1095_vm6, %v2460_v58, %v3879_v54  ;;  %v2464_v63 = vsel %vm1095_vm6, %v2461_v59, %v3880_v51 }
0x1170   : > { %v3418_v0 = vpack.c.bf16 %v2463_v60, %v2463_v60  ;;  %v3419_v3 = vpack.c.bf16 %v2464_v63, %v2464_v63 }
0x1172   : > { %2479 = vst.msk [vmem:[#allocation3 + $0x10] sm:$0xf] %vm1748_vm9, %v3418_v0  ;;  %2480 = vst.msk [vmem:[#allocation3 + $0x14] sm:$0xf] %vm1748_vm9, %v3419_v3 }
0x1174   : > { %v3886_v41 = vld [vmem:[#allocation3 + $0x8] sm:$0xff]  }
0x1175   : > { %3690 = vmatmul.mubr.msk.bf16.gmra.mxu0 %vm846_vm3, %v3886_v41 }
0x1176   : > { %3693 = vmatprep.mubr.msk.bf16.mxu0 %vm4106_vm4, %v4105_v61 }
0x1179   : > { %v3887_v44 = vld [vmem:[#allocation3 + $0x10] sm:$0xff]  }
0x117d   : > { %3694 = vmatmul.mubr.msk.bf16.gmra.mxu0 %vm846_vm3, %v3887_v44 }
0x117e   : > { %3729 = vmatprep.mubr.msk.bf16.mxu0 %vm4106_vm4, %v4105_v61 }
0x11a1   : > { %v2602_v19 = vpop.xlane.xlu0 %2601 }
0x11a2   : > { %v2616_v16 = vmul.f32 0.03125, %v2602_v19  ;;  %v3893_v19 = vld [vmem:[%s4271_s22 + $0x20] sm:$0xff]  }
0x11a4   : > { %v2622_v24 = vsub.f32 %v4763_v22, %v2616_v16  ;;  %v3897_v16 = vld [vmem:[%s4271_s22] sm:$0xff]  }
0x11a6   : > { %v2599_v49 = vpop.xlane.xlu1 %2598  ;;  %v2628_v37 = vmul.f32 %v2622_v24, %v2622_v24 }
0x11a7   : > { %v2615_v15 = vmul.f32 0.03125, %v2599_v49 }
0x11a9   : > { %v2621_v17 = vsub.f32 %v4768_v2, %v2615_v15  ;;  %v3890_v15 = vld [vmem:[%s4271_s22 + $0x38] sm:$0xff]  }
0x11aa   : > { %3714 = vmatpush3.bf16.msra.mxu0 %v3890_v15 }
0x11ab   : > { %v2627_v45 = vmul.f32 %v2621_v17, %v2621_v17  ;;  %3715 = vmatprep.subr.bf16.mxu0 %v4105_v61 }
0x11ad   : > { %v2633_v34 = vsel %vm846_vm3, %v2627_v45, 0.0 }
0x1235   : > { %v2576_v4 = vpop.f32.mrf.mxu0 }
0x1236   : > { %v2577_v6 = vadd.f32 %v4760_v25, %v2576_v4 }
0x1237   : > { %v3691_v30 = vpop.f32.mrf.mxu0 }
0x1238   : > { %v4799_v13 = vadd.f32 %v4033_v10, %v2577_v6 }
0x1239   : > { %v2579_v28 = vpop.f32.mrf.mxu0 }
0x123a   : > { %v2580_v8 = vadd.f32 %v4760_v25, %v2579_v28  ;;  %v2603_v9 = vsel %vm846_vm3, %v4799_v13, 0.0 }
0x123b   : > { %2604 = vadd.xlane.f32.xlu0 %v2603_v9  ;;  %v3692_v56 = vpop.f32.mrf.mxu0  ;;  %v3892_v9 = vld [vmem:[%s4271_s22 + $0x28] sm:$0xff]  }
0x123c   : > { %v4804_v12 = vadd.f32 %v4034_v11, %v2580_v8  ;;  %v3891_v8 = vld [vmem:[%s4271_s22 + $0x30] sm:$0xff]   ;;  %v3894_v56 = vld [vmem:[%s4271_s22 + $0x18] sm:$0xff]  }
0x123d   : > { %v2584_v14 = vpop.f32.mrf.mxu0  ;;  %3716 = vmatpush3.bf16.msra.mxu0 %v3891_v8  ;;  %v3895_v11 = vld [vmem:[%s4271_s22 + $0x10] sm:$0xff]  }
0x123e   : > { %v2585_v18 = vadd.f32 %v4760_v25, %v2584_v14  ;;  %v2606_v20 = vsel %vm846_vm3, %v4804_v12, 0.0  ;;  %3717 = vmatprep.subr.bf16.mxu0 %v4105_v61  ;;  %v3896_v14 = vld [vmem:[%s4271_s22 + $0x8] sm:$0xff]  }
0x123f   : > { %2607 = vadd.xlane.f32.xlu0 %v2606_v20  ;;  %v3695_v21 = vpop.f32.mrf.mxu0 }
0x1240   : > { %v4810_v62 = vadd.f32 %v4035_v23, %v2585_v18 }
0x1241   : > { %v2587_v1 = vpop.f32.mrf.mxu0  ;;  %3718 = vmatpush3.bf16.msra.mxu0 %v3892_v9 }
0x1242   : > { %v2588_v29 = vadd.f32 %v4760_v25, %v2587_v1  ;;  %v2609_v43 = vsel %vm846_vm3, %v4810_v62, 0.0  ;;  %v2636_v25 = vsel %vm846_vm3, %v2628_v37, 0.0  ;;  %3719 = vmatprep.subr.bf16.mxu0 %v4105_v61 }
0x1243   : > { %2610 = vadd.xlane.f32.xlu1 %v2609_v43  ;;  %v3696_v46 = vpop.f32.mrf.mxu0 }
0x1244   : > { %v4816_v32 = vadd.f32 %v4036_v7, %v2588_v29 }
0x1245   : > { %3720 = vmatpush3.bf16.msra.mxu0 %v3893_v19 }
0x1246   : > { %v2612_v35 = vsel %vm846_vm3, %v4816_v32, 0.0  ;;  %3721 = vmatprep.subr.bf16.mxu0 %v4105_v61 }
0x1247   : > { %2634 = vadd.xlane.f32.xlu1 %v2633_v34  ;;  %2613 = vadd.xlane.f32.xlu0 %v2612_v35 }
0x1249   : > { %3722 = vmatpush3.bf16.msra.mxu0 %v3894_v56 }
0x124a   : > { %3723 = vmatprep.subr.bf16.mxu0 %v4105_v61 }
0x124b   : > { %2637 = vadd.xlane.f32.xlu0 %v2636_v25 }
0x124d   : > { %3724 = vmatpush3.bf16.msra.mxu0 %v3895_v11 }
0x124e   : > { %3725 = vmatprep.subr.bf16.mxu0 %v4105_v61 }
0x1251   : > { %3726 = vmatpush3.bf16.msra.mxu0 %v3896_v14 }
0x1252   : > { %3727 = vmatprep.subr.bf16.mxu0 %v4105_v61 }
0x1255   : > { %3728 = vmatpush3.bf16.msra.mxu0 %v3897_v16 }
0x12c4   : > { %v2605_v5 = vpop.xlane.xlu0 %2604 }
0x12c5   : > { %v2617_v31 = vmul.f32 0.03125, %v2605_v5 }
0x12c7   : > { %v4826_v36 = vsub.f32 %v4799_v13, %v2617_v31 }
0x12c8   : > { %v2608_v26 = vpop.xlane.xlu0 %2607 }
0x12c9   : > { %v2618_v33 = vmul.f32 0.03125, %v2608_v26  ;;  %v2629_v38 = vmul.f32 %v4826_v36, %v4826_v36 }
0x12cb   : > { %v4831_v48 = vsub.f32 %v4804_v12, %v2618_v33  ;;  %v2639_v42 = vsel %vm846_vm3, %v2629_v38, 0.0 }
0x12cc   : > { %2640 = vadd.xlane.f32.xlu1 %v2639_v42  ;;  %v2611_v50 = vpop.xlane.xlu1 %2610 }
0x12cd   : > { %v2619_v52 = vmul.f32 0.03125, %v2611_v50  ;;  %v2630_v27 = vmul.f32 %v4831_v48, %v4831_v48 }
0x12cf   : > { %v4837_v53 = vsub.f32 %v4810_v62, %v2619_v52  ;;  %v2642_v47 = vsel %vm846_vm3, %v2630_v27, 0.0 }
0x12d0   : > { %v2635_v51 = vpop.xlane.xlu1 %2634  ;;  %2643 = vadd.xlane.f32.xlu0 %v2642_v47  ;;  %v2614_v54 = vpop.xlane.xlu0 %2613 }
0x12d1   : > { %v2651_v55 = vmul.f32 0.03125, %v2635_v51  ;;  %v2620_v57 = vmul.f32 0.03125, %v2614_v54  ;;  %v2631_v58 = vmul.f32 %v4837_v53, %v4837_v53 }
0x12d3   : > { %v2657_v59 = vadd.f32 1e-06, %v2651_v55  ;;  %v4843_v60 = vsub.f32 %v4816_v32, %v2620_v57  ;;  %v2645_v63 = vsel %vm846_vm3, %v2631_v58, 0.0 }
0x12d4   : > { %2646 = vadd.xlane.f32.xlu1 %v2645_v63  ;;  %v2638_v0 = vpop.xlane.xlu0 %2637 }
0x12d5   : > { %v2652_v3 = vmul.f32 0.03125, %v2638_v0  ;;  %v2632_v41 = vmul.f32 %v4843_v60, %v4843_v60  ;;  %4006 = vrsqrt.f32 %v2657_v59 }
0x12d7   : > { %v2658_v44 = vadd.f32 1e-06, %v2652_v3  ;;  %v2648_v4 = vsel %vm846_vm3, %v2632_v41, 0.0 }
0x12d8   : > { %2649 = vadd.xlane.f32.xlu0 %v2648_v4 }
0x12d9   : > { %4008 = vrsqrt.f32 %v2658_v44 }
0x12e2   : > { %v4007_v6 = vpop.eup %4006 }
0x12e3   : > { %v2669_v30 = vmul.f32 %v4007_v6, %v2621_v17 }
0x12e6   : > { %v4009_v49 = vpop.eup %4008 }
0x12e7   : > { %v2670_v10 = vmul.f32 %v4009_v49, %v2622_v24 }
0x12e9   : > { %v2675_v28 = vpack.c.bf16 %v2670_v10, %v2669_v30 }
0x12eb   : > { %3702 = vmatmul.mubr.msk.bf16.vlgmr.msra.gmra.mxu1 %vm846_vm3, %v2675_v28 }
0x12ec   : > { %3705 = vmatprep.mubr.msk.bf16.mxu1 %vm4106_vm4, %v4105_v61 }
0x1355   : > { %v2641_v17 = vpop.xlane.xlu1 %2640 }
0x1356   : > { %v2653_v18 = vmul.f32 0.03125, %v2641_v17 }
0x1358   : > { %v2659_v20 = vadd.f32 1e-06, %v2653_v18 }
0x1359   : > { %v2644_v21 = vpop.xlane.xlu0 %2643 }
0x135a   : > { %v2654_v23 = vmul.f32 0.03125, %v2644_v21  ;;  %4010 = vrsqrt.f32 %v2659_v20 }
0x135c   : > { %v2660_v1 = vadd.f32 1e-06, %v2654_v23 }
0x135d   : > { %v2647_v24 = vpop.xlane.xlu1 %2646 }
0x135e   : > { %4012 = vrsqrt.f32 %v2660_v1  ;;  %v2655_v29 = vmul.f32 0.03125, %v2647_v24 }
0x1360   : > { %v2661_v43 = vadd.f32 1e-06, %v2655_v29 }
0x1361   : > { %v2650_v45 = vpop.xlane.xlu0 %2649 }
0x1362   : > { %v2656_v46 = vmul.f32 0.03125, %v2650_v45  ;;  %4014 = vrsqrt.f32 %v2661_v43 }
0x1364   : > { %v2662_v7 = vadd.f32 1e-06, %v2656_v46 }
0x1366   : > { %4016 = vrsqrt.f32 %v2662_v7 }
0x1367   : > { %v4011_v34 = vpop.eup %4010 }
0x1368   : > { %v2671_v37 = vmul.f32 %v4011_v34, %v4826_v36  ;;  %v3382_v36 = vld [vmem:[%s689_s1] ss:$0 sm:$0xff] }
0x136b   : > { %v4013_v35 = vpop.eup %4012 }
0x136c   : > { %v2672_v25 = vmul.f32 %v4013_v35, %v4831_v48 }
0x136e   : > { %v2676_v39 = vpack.c.bf16 %v2672_v25, %v2671_v37 }
0x136f   : > { %v4015_v40 = vpop.eup %4014 }
0x1370   : > { %3706 = vmatmul.mubr.msk.bf16.gmra.mxu1 %vm846_vm3, %v2676_v39  ;;  %v2673_v31 = vmul.f32 %v4015_v40, %v4837_v53  ;;  %v3388_v40 = vld [vmem:[%s5048_s21] ss:$0 sm:$0xff] }
0x1371   : > { %3709 = vmatprep.mubr.msk.bf16.mxu1 %vm4106_vm4, %v4105_v61 }
0x1373   : > { %v4017_v5 = vpop.eup %4016 }
0x1374   : > { %v2674_v26 = vmul.f32 %v4017_v5, %v4843_v60 }
0x1376   : > { %v2677_v33 = vpack.c.bf16 %v2674_v26, %v2673_v31 }
0x1378   : > { %3710 = vmatmul.mubr.msk.bf16.gmra.mxu1 %vm846_vm3, %v2677_v33 }
0x13ab   : > { %v2744_v38 = vpop.f32.mrf.mxu1 }
0x13ac   : > { %v2745_v48 = vadd.f32 %v3382_v36, %v2744_v38 }
0x13ad   : > { %v3703_v42 = vpop.f32.mrf.mxu1 }
0x13ae   : > { %v2773_v50 = vmul.f32 0.70710677, %v2745_v48  ;;  %v2767_v57 = vmul.f32 0.5, %v2745_v48 }
0x13af   : > { %v2747_v52 = vpop.f32.mrf.mxu1 }
0x13b0   : > { %4018 = verf.f32 %v2773_v50  ;;  %v2748_v27 = vadd.f32 %v3382_v36, %v2747_v52 }
0x13b1   : > { %v3704_v47 = vpop.f32.mrf.mxu1 }
0x13b2   : > { %v2774_v51 = vmul.f32 0.70710677, %v2748_v27  ;;  %v2768_v58 = vmul.f32 0.5, %v2748_v27 }
0x13b4   : > { %4020 = verf.f32 %v2774_v51 }
0x13bd   : > { %v4019_v53 = vpop.eup %4018 }
0x13be   : > { %v2785_v54 = vadd.f32 1.0, %v4019_v53 }
0x13c0   : > { %v2791_v60 = vmul.f32 %v2785_v54, %v2767_v57 }
0x13c1   : > { %v4021_v55 = vpop.eup %4020 }
0x13c2   : > { %v2786_v59 = vadd.f32 1.0, %v4021_v55 }
0x13c4   : > { %v2792_v63 = vmul.f32 %v2786_v59, %v2768_v58 }
0x13c6   : > { %v2797_v0 = vpack.c.bf16 %v2792_v63, %v2791_v60 }
0x13c8   : > { %3730 = vmatmul.mubr.bf16.vlgmr.msra.gmra.mxu0 %v2797_v0 }
0x13c9   : > { %3733 = vmatprep.mubr.msk.bf16.mxu0 %vm4106_vm4, %v4105_v61 }
0x1430   : > { %v2752_v3 = vpop.f32.mrf.mxu1 }
0x1431   : > { %v2753_v41 = vadd.f32 %v3382_v36, %v2752_v3 }
0x1432   : > { %v3707_v44 = vpop.f32.mrf.mxu1 }
0x1433   : > { %v2775_v4 = vmul.f32 0.70710677, %v2753_v41  ;;  %v2769_v20 = vmul.f32 0.5, %v2753_v41 }
0x1434   : > { %v2755_v6 = vpop.f32.mrf.mxu1 }
0x1435   : > { %4022 = verf.f32 %v2775_v4  ;;  %v2756_v49 = vadd.f32 %v3382_v36, %v2755_v6 }
0x1436   : > { %v3708_v30 = vpop.f32.mrf.mxu1 }
0x1437   : > { %v2776_v10 = vmul.f32 0.70710677, %v2756_v49  ;;  %v2770_v21 = vmul.f32 0.5, %v2756_v49 }
0x1438   : > { %v2760_v28 = vpop.f32.mrf.mxu1 }
0x1439   : > { %4024 = verf.f32 %v2776_v10  ;;  %v2761_v15 = vadd.f32 %v3382_v36, %v2760_v28 }
0x143a   : > { %v3711_v8 = vpop.f32.mrf.mxu1 }
0x143b   : > { %v2777_v9 = vmul.f32 0.70710677, %v2761_v15  ;;  %v2771_v7 = vmul.f32 0.5, %v2761_v15 }
0x143c   : > { %v2763_v19 = vpop.f32.mrf.mxu1 }
0x143d   : > { %4026 = verf.f32 %v2777_v9  ;;  %v2764_v56 = vadd.f32 %v3382_v36, %v2763_v19 }
0x143e   : > { %v3712_v11 = vpop.f32.mrf.mxu1 }
0x143f   : > { %v2778_v14 = vmul.f32 0.70710677, %v2764_v56  ;;  %v2772_v34 = vmul.f32 0.5, %v2764_v56 }
0x1441   : > { %4028 = verf.f32 %v2778_v14 }
0x1442   : > { %v4023_v16 = vpop.eup %4022 }
0x1443   : > { %v2787_v17 = vadd.f32 1.0, %v4023_v16 }
0x1445   : > { %v2793_v1 = vmul.f32 %v2787_v17, %v2769_v20 }
0x1446   : > { %v4025_v18 = vpop.eup %4024 }
0x1447   : > { %v2788_v23 = vadd.f32 1.0, %v4025_v18 }
0x1449   : > { %v2794_v24 = vmul.f32 %v2788_v23, %v2770_v21 }
0x144a   : > { %v4027_v29 = vpop.eup %4026 }
0x144b   : > { %v2798_v43 = vpack.c.bf16 %v2794_v24, %v2793_v1  ;;  %v2789_v45 = vadd.f32 1.0, %v4027_v29 }
0x144d   : > { %3734 = vmatmul.mubr.bf16.gmra.mxu0 %v2798_v43  ;;  %v2795_v37 = vmul.f32 %v2789_v45, %v2771_v7 }
0x144e   : > { %v4029_v46 = vpop.eup %4028  ;;  %3737 = vmatprep.mubr.msk.bf16.mxu0 %vm4106_vm4, %v4105_v61 }
0x144f   : > { %v2790_v35 = vadd.f32 1.0, %v4029_v46 }
0x1451   : > { %v2796_v25 = vmul.f32 %v2790_v35, %v2772_v34 }
0x1453   : > { %v2799_v39 = vpack.c.bf16 %v2796_v25, %v2795_v37 }
0x1455   : > { %3738 = vmatmul.mubr.bf16.gmra.mxu0 %v2799_v39 }
0x1488   : > { %v2905_v5 = vpop.f32.mrf.mxu0 }
0x1489   : > { %v2906_v31 = vadd.f32 %v3388_v40, %v2905_v5 }
0x148a   : > { %v3731_v26 = vpop.f32.mrf.mxu0 }
0x148b   : > { %v2928_v33 = vadd.f32 %v2906_v31, %v4768_v2 }
0x148c   : > { %v2908_v36 = vpop.f32.mrf.mxu0 }
0x148d   : > { %2934 = vst.msk [vmem:[#allocation2] sm:$0xff] %vm846_vm3, %v2928_v33  ;;  %v2909_v61 = vadd.f32 %v3388_v40, %v2908_v36 }
0x148e   : > { %v3732_v38 = vpop.f32.mrf.mxu0 }
0x148f   : > { %v2929_v48 = vadd.f32 %v2909_v61, %v4763_v22 }
0x1491   : > { %2935 = vst.msk [vmem:[#allocation2 + $0x8] sm:$0xff] %vm846_vm3, %v2929_v48 }
0x150d   : > { %v2913_v42 = vpop.f32.mrf.mxu0 }
0x150e   : > { %v2914_v50 = vadd.f32 %v3388_v40, %v2913_v42 }
0x150f   : > { %v3735_v52 = vpop.f32.mrf.mxu0 }
0x1510   : > { %v4894_v27 = vadd.f32 %v2914_v50, %v4799_v13 }
0x1511   : > { %v2916_v47 = vpop.f32.mrf.mxu0 }
0x1512   : > { %2936 = vst.msk [vmem:[#allocation2 + $0x10] sm:$0xff] %vm846_vm3, %v4894_v27  ;;  %v2917_v2 = vadd.f32 %v3388_v40, %v2916_v47 }
0x1513   : > { %v3736_v51 = vpop.f32.mrf.mxu0 }
0x1514   : > { %v2931_v53 = vadd.f32 %v2917_v2, %v4804_v12 }
0x1515   : > { %v2921_v54 = vpop.f32.mrf.mxu0 }
0x1516   : > { %2937 = vst.msk [vmem:[#allocation2 + $0x18] sm:$0xff] %vm846_vm3, %v2931_v53  ;;  %v2922_v22 = vadd.f32 %v3388_v40, %v2921_v54 }
0x1517   : > { %v3739_v55 = vpop.f32.mrf.mxu0 }
0x1518   : > { %v2932_v57 = vadd.f32 %v2922_v22, %v4810_v62 }
0x1519   : > { %v2924_v58 = vpop.f32.mrf.mxu0 }
0x151a   : > { %2938 = vst.msk [vmem:[#allocation2 + $0x20] sm:$0xff] %vm846_vm3, %v2932_v57  ;;  %v2925_v13 = vadd.f32 %v3388_v40, %v2924_v58  ;;  %2943 = sbr.rel (%p3397_p6) target bundleno = 5921 (0x1721), region = 92 }
0x151b   : > { %v3740_v59 = vpop.f32.mrf.mxu0 }
0x151c   : > { %v4903_v60 = vadd.f32 %v2925_v13, %v4816_v32 }
0x151e   : > { %2939 = vst.msk [vmem:[#allocation2 + $0x28] sm:$0xff] %vm846_vm3, %v4903_v60 }
0x151f   : > { %v2955_v12 = vsel %vm846_vm3, %v2931_v53, 0.0  ;;  %v2946_v63 = vsel %vm846_vm3, %v2928_v33, 0.0  ;;  %v2949_v62 = vsel %vm846_vm3, %v2929_v48, 0.0  ;;  %v2958_v0 = vsel %vm846_vm3, %v2932_v57, 0.0  ;;  %v4037_v23 = vld [vmem:[%s5024_s14 + $0x8] sm:$0xff]   ;;  %v4038_v24 = vld [vmem:[%s5024_s14] sm:$0xff]  }
0x1520   : > { %2956 = vadd.xlane.f32.xlu0 %v2955_v12  ;;  %v2952_v56 = vsel %vm846_vm3, %v4894_v27, 0.0  ;;  %v2961_v18 = vsel %vm846_vm3, %v4903_v60, 0.0  ;;  %v4121_v1 = vmov 0.0   ;;  %vm4122_vm10 = vmmov 0   ;;  %v3399_v51 = vld [vmem:[%s5023_s13] ss:$0 sm:$0xff] }
0x1521   : > { %3741 = vmatprep.subr.bf16.mxu0 %v4121_v1  ;;  %3745 = vmatprep.mubr.msk.bf16.mxu0 %vm4122_vm10, %v4121_v1  ;;  %vm3057_vm11 = vcmask 1040384  }
0x1522   : > { %3742 = vmatpush3.bf16.msra.mxu0 %v4037_v23 }
0x1523   : > { %3743 = vmatprep.subr.bf16.mxu0 %v4121_v1 }
0x1524   : > { %2947 = vadd.xlane.f32.xlu0 %v2946_v63 }
0x1526   : > { %3744 = vmatpush3.bf16.msra.mxu0 %v4038_v24 }
0x1528   : > { %2950 = vadd.xlane.f32.xlu0 %v2949_v62 }
0x152c   : > { %2959 = vadd.xlane.f32.xlu0 %v2958_v0 }
0x15a9   : > { %v2957_v32 = vpop.xlane.xlu0 %2956 }
0x15aa   : > { %v2967_v3 = vmul.f32 0.03125, %v2957_v32 }
0x15ac   : > { %v4912_v41 = vsub.f32 %v2931_v53, %v2967_v3 }
0x15ad   : > { %v2948_v44 = vpop.xlane.xlu0 %2947 }
0x15ae   : > { %v2964_v4 = vmul.f32 0.03125, %v2948_v44  ;;  %v2979_v6 = vmul.f32 %v4912_v41, %v4912_v41 }
0x15b0   : > { %v4916_v49 = vsub.f32 %v2928_v33, %v2964_v4  ;;  %v2991_v30 = vsel %vm846_vm3, %v2979_v6, 0.0 }
0x15b1   : > { %2992 = vadd.xlane.f32.xlu1 %v2991_v30  ;;  %v2951_v10 = vpop.xlane.xlu0 %2950 }
0x15b2   : > { %v2976_v28 = vmul.f32 %v4916_v49, %v4916_v49  ;;  %v2965_v15 = vmul.f32 0.03125, %v2951_v10 }
0x15b4   : > { %v2982_v8 = vsel %vm846_vm3, %v2976_v28, 0.0  ;;  %v4922_v9 = vsub.f32 %v2929_v48, %v2965_v15 }
0x15b5   : > { %2983 = vadd.xlane.f32.xlu1 %v2982_v8  ;;  %v2960_v19 = vpop.xlane.xlu0 %2959 }
0x15b6   : > { %v2968_v11 = vmul.f32 0.03125, %v2960_v19  ;;  %v2977_v14 = vmul.f32 %v4922_v9, %v4922_v9 }
0x15b8   : > { %v4928_v16 = vsub.f32 %v2932_v57, %v2968_v11  ;;  %v2985_v17 = vsel %vm846_vm3, %v2977_v14, 0.0 }
0x15b9   : > { %2953 = vadd.xlane.f32.xlu1 %v2952_v56  ;;  %2986 = vadd.xlane.f32.xlu0 %v2985_v17  ;;  %v3400_v17 = vld [vmem:[%s5050_s23] ss:$0 sm:$0xff] }
0x15ba   : > { %v2980_v20 = vmul.f32 %v4928_v16, %v4928_v16 }
0x15bc   : > { %v2994_v21 = vsel %vm846_vm3, %v2980_v20, 0.0 }
0x15bd   : > { %2962 = vadd.xlane.f32.xlu1 %v2961_v18  ;;  %2995 = vadd.xlane.f32.xlu0 %v2994_v21 }
0x163a   : > { %v2993_v29 = vpop.xlane.xlu1 %2992 }
0x163b   : > { %v3003_v43 = vmul.f32 0.03125, %v2993_v29 }
0x163d   : > { %v3009_v45 = vadd.f32 1e-06, %v3003_v43 }
0x163e   : > { %v2984_v46 = vpop.xlane.xlu1 %2983 }
0x163f   : > { %4039 = vrsqrt.f32 %v3009_v45  ;;  %v3000_v7 = vmul.f32 0.03125, %v2984_v46 }
0x1641   : > { %v3006_v34 = vadd.f32 1e-06, %v3000_v7 }
0x1642   : > { %v2954_v35 = vpop.xlane.xlu1 %2953  ;;  %v2987_v37 = vpop.xlane.xlu0 %2986 }
0x1643   : > { %4041 = vrsqrt.f32 %v3006_v34  ;;  %v2966_v25 = vmul.f32 0.03125, %v2954_v35  ;;  %v3001_v39 = vmul.f32 0.03125, %v2987_v37 }
0x1645   : > { %v2972_v40 = vsub.f32 %v4894_v27, %v2966_v25  ;;  %v3007_v5 = vadd.f32 1e-06, %v3001_v39  ;;  %v3398_v27 = vld [vmem:[%s5022_s12] ss:$0 sm:$0xff] }
0x1646   : > { %v2963_v31 = vpop.xlane.xlu1 %2962  ;;  %v2996_v26 = vpop.xlane.xlu0 %2995 }
0x1647   : > { %v2969_v33 = vmul.f32 0.03125, %v2963_v31  ;;  %v2978_v36 = vmul.f32 %v2972_v40, %v2972_v40  ;;  %4043 = vrsqrt.f32 %v3007_v5  ;;  %v3004_v61 = vmul.f32 0.03125, %v2996_v26 }
0x1649   : > { %v2975_v38 = vsub.f32 %v4903_v60, %v2969_v33  ;;  %v2988_v48 = vsel %vm846_vm3, %v2978_v36, 0.0  ;;  %v3010_v42 = vadd.f32 1e-06, %v3004_v61 }
0x164a   : > { %2989 = vadd.xlane.f32.xlu1 %v2988_v48 }
0x164b   : > { %v2981_v50 = vmul.f32 %v2975_v38, %v2975_v38  ;;  %4045 = vrsqrt.f32 %v3010_v42 }
0x164c   : > { %v4040_v52 = vpop.eup %4039 }
0x164d   : > { %v2997_v47 = vsel %vm846_vm3, %v2981_v50, 0.0  ;;  %v3021_v2 = vmul.f32 %v4040_v52, %v4912_v41 }
0x164e   : > { %2998 = vadd.xlane.f32.xlu1 %v2997_v47 }
0x164f   : > { %v3033_v53 = vmul.f32 %v3398_v27, %v3021_v2 }
0x1650   : > { %v4042_v54 = vpop.eup %4041 }
0x1651   : > { %v3018_v22 = vmul.f32 %v4042_v54, %v4916_v49  ;;  %v3045_v55 = vadd.f32 %v3399_v51, %v3033_v53 }
0x1653   : > { %v3030_v57 = vmul.f32 %v3398_v27, %v3018_v22  ;;  %3051 = vst.msk [vmem:[%s5049_s30 + $0x18] sm:$0xff] %vm846_vm3, %v3045_v55  ;;  %v3055_v59 = vrot.slane %v3045_v55, 7 }
0x1654   : > { %v4044_v58 = vpop.eup %4043 }
0x1655   : > { %v3042_v13 = vadd.f32 %v3399_v51, %v3030_v57  ;;  %v3019_v60 = vmul.f32 %v4044_v58, %v4922_v9 }
0x1657   : > { %3048 = vst.msk [vmem:[%s5049_s30] sm:$0xff] %vm846_vm3, %v3042_v13  ;;  %v3058_v12 = vsel %vm3057_vm11, %v3042_v13, %v3055_v59  ;;  %v3031_v63 = vmul.f32 %v3398_v27, %v3019_v60 }
0x1658   : > { %v4046_v62 = vpop.eup %4045  ;;  %v3059_v0 = vpack.c.bf16 %v3058_v12, %v3058_v12 }
0x1659   : > { %v3043_v32 = vadd.f32 %v3399_v51, %v3031_v63  ;;  %v3022_v3 = vmul.f32 %v4046_v62, %v4928_v16 }
0x165a   : > { %3746 = vmatmul.mubr.msk.bf16.vlgmr.msra.gmra.mxu0 %vm846_vm3, %v3059_v0 }
0x165b   : > { %3049 = vst.msk [vmem:[%s5049_s30 + $0x8] sm:$0xff] %vm846_vm3, %v3043_v32  ;;  %v3034_v41 = vmul.f32 %v3398_v27, %v3022_v3 }
0x165d   : > { %v3046_v44 = vadd.f32 %v3399_v51, %v3034_v41 }
0x165f   : > { %3052 = vst.msk [vmem:[%s5049_s30 + $0x20] sm:$0xff] %vm846_vm3, %v3046_v44 }
0x16d3   : > { %v2990_v4 = vpop.xlane.xlu1 %2989 }
0x16d4   : > { %v3002_v6 = vmul.f32 0.03125, %v2990_v4 }
0x16d6   : > { %v3008_v49 = vadd.f32 1e-06, %v3002_v6 }
0x16d7   : > { %v2999_v30 = vpop.xlane.xlu1 %2998 }
0x16d8   : > { %4047 = vrsqrt.f32 %v3008_v49  ;;  %v3005_v10 = vmul.f32 0.03125, %v2999_v30 }
0x16da   : > { %v3011_v28 = vadd.f32 1e-06, %v3005_v10 }
0x16dc   : > { %4049 = vrsqrt.f32 %v3011_v28 }
0x16e5   : > { %v4048_v15 = vpop.eup %4047 }
0x16e6   : > { %v3020_v8 = vmul.f32 %v4048_v15, %v2972_v40 }
0x16e8   : > { %v3032_v9 = vmul.f32 %v3398_v27, %v3020_v8 }
0x16e9   : > { %v4050_v19 = vpop.eup %4049 }
0x16ea   : > { %v3044_v56 = vadd.f32 %v3399_v51, %v3032_v9  ;;  %v3023_v11 = vmul.f32 %v4050_v19, %v2975_v38 }
0x16ec   : > { %3050 = vst.msk [vmem:[%s5049_s30 + $0x10] sm:$0xff] %vm846_vm3, %v3044_v56  ;;  %v3035_v14 = vmul.f32 %v3398_v27, %v3023_v11 }
0x16ee   : > { %v3047_v16 = vadd.f32 %v3399_v51, %v3035_v14 }
0x16f0   : > { %3053 = vst.msk [vmem:[%s5049_s30 + $0x28] sm:$0xff] %vm846_vm3, %v3047_v16 }
0x171a   : > { %v3120_v18 = vpop.f32.mrf.mxu0 }
0x171b   : > { %v3121_v20 = vadd.f32 %v3400_v17, %v3120_v18 }
0x171c   : > { %v3747_v21 = vpop.f32.mrf.mxu0 }
0x171d   : > { %3126 = vst [vmem:[#allocation4] sm:$0x3] %v3121_v20 }
0x171e   : > { %v3123_v23 = vpop.f32.mrf.mxu0 }
0x1720   : > { %v3748_v1 = vpop.f32.mrf.mxu0 }
0x1721 PF: > { %s5051_s0 = sld [smem:[#allocation8_spill]]  ;;  %s4123_s19 = smov [#allocation4]  }
0x1722   : > { %s3141_s27 = sshll.u32 %s4123_s19, 4  ;;  %s3142_s27 = int_to_ptr.vmem [resolvable:$true] %s3141_s27 }
0x1723   : > { %s4051_s25 = scalar_lea.vmem %s3142_s27, 32  ;;  %p4058_p11 = scmp.lt.s32.totalorder %s3142_s27, %s3142_s27 }
0x1724   : > { %p4052_p8 = scmp.ne.s32.totalorder %s3142_s27, %s4051_s25  ;;  %p4059_p12 = scmp.lt.s32.totalorder %s4051_s25, %s4051_s25 }
0x1726   : > { %p4060_p13 = por %p4059_p12, %p4058_p11 }
0x1727   : > { %s5052_s4 = sadd.s32 4294967295, %s5051_s0  }
0x1728   : > { %p4986_p7 = scmp.eq.s32.totalorder %s5052_s4, 1 }
0x172a   : > { %p4053_p9 = pnand %p4052_p8, %p4986_p7 }
0x172c   : > { %p4054_p10 = pneg %p4053_p9 }
0x172e   : > { %p4061_p0 = pnand %p4060_p13, %p4054_p10 }
0x1730   : > { %4064 = shalt.err (!%p4061_p0)
}
0x1731   : > { %s5054_s1 = sld [smem:[#allocation15_spill]] }
0x1737   : > { %3780 = dma.vmem_to_hbm [thread:$0]  (%p4986_p7), %s3142_s27, 32, %s5054_s1, [#allocation5]  }
0x1738   : > { %4088 = dma.done.wait (%p4986_p7), [#allocation5], 32  }
0x1739   : > { %4090 = vsyncadd (%p4986_p7), [#allocation5], 4294967264 }
0x173a PF: > { %s5055_s22 = sld [smem:[#allocation8_spill]] }
0x173b   : > { %s5056_s24 = sld [smem:[#allocation7_spill]] }
0x173c   : > { %s5057_s25 = sld [smem:[#allocation9_spill]] }
0x1740   : > { %s29_s26 = sadd.s32 1, %s5055_s22  }
0x1741   : > { %p26_p1 = scmp.ge.s32.totalorder %s29_s26, 4  }
0x1743   :  { %28 = sbr.rel (!%p26_p1) target bundleno = 10 (0xa), region = 156 }
0x1748   :  { %3166 = vsyncpa [#allocation5], 1 }
0x1749   :  { %3168 = vsyncpa [#allocation5 + $0x1], 1 }

</bundles_post_ra>
